<compile_context>
chip_gen: v6e
topology: v6e:2x2x1
jax: 0.10.0
libtpu: 0.0.40
codegen_flags: <defaults>
</compile_context>

<pallas_src>
import math
from functools import partial

import jax
import jax.numpy as jnp
from jax.experimental import pallas as pl
from jax.experimental.pallas import tpu as pltpu


# ----------------------------- fused Pallas kernel -----------------------------

def _layernorm(y, g, b, eps):
    mu = jnp.mean(y, axis=-1, keepdims=True)
    d = y - mu
    var = jnp.mean(d * d, axis=-1, keepdims=True)
    return d * jax.lax.rsqrt(var + eps) * g + b


def _transformer_kernel(
        x_ref, pe_ref, inw_ref, inb_ref,
        wq_ref, bq_ref, wk_ref, bk_ref, wv_ref, bv_ref,
        wo_ref, bo_ref, w1_ref, b1_ref, w2_ref, b2_ref,
        ln1g_ref, ln1b_ref, ln2g_ref, ln2b_ref,
        fcw_ref, fcb_ref, o_ref,
        *, num_layers, num_heads, eps):
    # One batch element per grid step.
    x = x_ref[0]                                                     # (S, In)

    # Input projection + positional encoding.
    h = jnp.dot(x, inw_ref[...], preferred_element_type=jnp.float32)
    h = h + inb_ref[...] + pe_ref[...]                               # (S, E)

    dh = wq_ref.shape[-1]
    scale = 1.0 / math.sqrt(dh)

    for l in range(num_layers):
        # ---------- multi-head self-attention (per-head weights, no transposes) ----------
        attn = jnp.zeros_like(h)                                     # (S, E)
        for hd in range(num_heads):
            # Scale folded into q: cheaper than scaling the (S, S) score matrix.
            q = (jnp.dot(h, wq_ref[l, hd], preferred_element_type=jnp.float32)
                 + bq_ref[l, hd]) * scale                                          # (S, Dh)
            k = jnp.dot(h, wk_ref[l, hd], preferred_element_type=jnp.float32) + bk_ref[l, hd]
            v = jnp.dot(h, wv_ref[l, hd], preferred_element_type=jnp.float32) + bv_ref[l, hd]
            # scores = q @ k^T  (contract head dim of both operands)
            s = jax.lax.dot_general(q, k, (((1,), (1,)), ((), ())),
                                    preferred_element_type=jnp.float32)            # (S, S)
            m = jnp.max(s, axis=-1, keepdims=True)
            p = jnp.exp(s - m)
            p = p / jnp.sum(p, axis=-1, keepdims=True)
            oh = jnp.dot(p, v, preferred_element_type=jnp.float32)                 # (S, Dh)
            # out-projection accumulated per head: concat-free.
            attn = attn + jnp.dot(oh, wo_ref[l, hd], preferred_element_type=jnp.float32)
        attn = attn + bo_ref[l]

        # ---------- add & layer-norm 1 (post-LN) ----------
        h = _layernorm(h + attn, ln1g_ref[l], ln1b_ref[l], eps)

        # ---------- feed-forward (ReLU) ----------
        ff = jnp.dot(h, w1_ref[l], preferred_element_type=jnp.float32) + b1_ref[l]
        ff = jnp.maximum(ff, 0.0)
        ff = jnp.dot(ff, w2_ref[l], preferred_element_type=jnp.float32) + b2_ref[l]

        # ---------- add & layer-norm 2 ----------
        h = _layernorm(h + ff, ln2g_ref[l], ln2b_ref[l], eps)

    # ---------- final fc on the last token ----------
    last = h[h.shape[0] - 1:, :]                                     # (1, E)
    o_ref[0] = jnp.dot(last, fcw_ref[...], preferred_element_type=jnp.float32) + fcb_ref[...]


def transformer_forward(x, params):
    """x: (B, S, input_size) -> (B, output_size).  Single fused pallas_call."""
    B, S, In = x.shape
    E = int(params["embed_dim"])
    H = int(params["num_heads"])
    L = int(params["wq"].shape[0])
    F = int(params["w1"].shape[-1])
    out_size = int(params["fc_w"].shape[1])
    pe = params["pe"][:S]                                            # (S, E)

    weights = (
        pe, params["in_w"], params["in_b"],
        params["wq"], params["bq"], params["wk"], params["bk"],
        params["wv"], params["bv"], params["wo"], params["bo"],
        params["w1"], params["b1"], params["w2"], params["b2"],
        params["ln1_g"], params["ln1_b"], params["ln2_g"], params["ln2_b"],
        params["fc_w"], params["fc_b"],
    )

    def const_spec(a):
        n = a.ndim
        return pl.BlockSpec(a.shape, lambda b, _n=n: (0,) * _n)      # VMEM-resident, revisited

    in_specs = [pl.BlockSpec((1, S, In), lambda b: (b, 0, 0))] + [const_spec(w) for w in weights]

    kernel = partial(_transformer_kernel, num_layers=L, num_heads=H, eps=1e-5)

    # Advisory cost hint for XLA's scheduler around the custom call.
    flops_per_batch = 2 * (
        S * In * E                                   # input projection
        + L * (4 * S * E * E + 2 * S * S * E)        # attention (qkv + out proj + scores + ctx)
        + L * (2 * S * E * F)                        # feed-forward
        + E * out_size                               # final fc
    )
    bytes_weights = sum(int(w.size) * 4 for w in weights)
    cost = pl.CostEstimate(
        flops=int(B * flops_per_batch),
        transcendentals=int(B * L * H * S * S),      # exp in softmax
        bytes_accessed=int(bytes_weights + x.size * 4 + B * out_size * 4),
    )

    out = pl.pallas_call(
        kernel,
        out_shape=jax.ShapeDtypeStruct((B, 1, out_size), jnp.float32),
        grid=(B,),
        in_specs=in_specs,
        out_specs=pl.BlockSpec((1, 1, out_size), lambda b: (b, 0, 0)),
        compiler_params=pltpu.CompilerParams(dimension_semantics=("parallel",)),
        cost_estimate=cost,
    )(x, *weights)
    return out[:, 0, :]


# ----------------------------- params -----------------------------

def make_positional_encoding(max_len, d_model):
    position = jnp.arange(max_len, dtype=jnp.float32)[:, None]
    div_term = jnp.exp(jnp.arange(0, d_model, 2, dtype=jnp.float32)
                       * (-math.log(10000.0) / d_model))
    pe = jnp.zeros((max_len, d_model), jnp.float32)
    pe = pe.at[:, 0::2].set(jnp.sin(position * div_term))
    pe = pe.at[:, 1::2].set(jnp.cos(position * div_term))
    return pe  # (max_len, d_model)


def init_params(key, input_size, num_heads, num_layers, output_size,
                dim_feedforward=2048, max_len=64):
    E = (input_size + num_heads - 1) // num_heads * num_heads
    Dh = E // num_heads
    ks = jax.random.split(key, 20)

    def w(k, shape, scale=0.05):
        return (scale * jax.random.normal(k, shape)).astype(jnp.float32)

    params = {
        "embed_dim": E,
        "num_heads": num_heads,
        "pe": make_positional_encoding(max_len, E),
        "in_w": w(ks[0], (input_size, E)),
        "in_b": w(ks[1], (1, E), 0.02),
        "fc_w": w(ks[2], (E, output_size)),
        "fc_b": w(ks[3], (1, output_size), 0.02),
        # per-layer, per-head attention weights (L, H, E, Dh) / (L, H, Dh, E)
        "wq": w(ks[4], (num_layers, num_heads, E, Dh)),
        "bq": w(ks[5], (num_layers, num_heads, 1, Dh), 0.02),
        "wk": w(ks[6], (num_layers, num_heads, E, Dh)),
        "bk": w(ks[7], (num_layers, num_heads, 1, Dh), 0.02),
        "wv": w(ks[8], (num_layers, num_heads, E, Dh)),
        "bv": w(ks[9], (num_layers, num_heads, 1, Dh), 0.02),
        "wo": w(ks[10], (num_layers, num_heads, Dh, E)),
        "bo": w(ks[11], (num_layers, 1, E), 0.02),
        # feed-forward
        "w1": w(ks[12], (num_layers, E, dim_feedforward)),
        "b1": w(ks[13], (num_layers, 1, dim_feedforward), 0.02),
        "w2": w(ks[14], (num_layers, dim_feedforward, E), 0.02),
        "b2": w(ks[15], (num_layers, 1, E), 0.02),
        # layer norms (slightly perturbed to exercise the code paths)
        "ln1_g": 1.0 + w(ks[16], (num_layers, 1, E), 0.02),
        "ln1_b": w(ks[17], (num_layers, 1, E), 0.02),
        "ln2_g": 1.0 + w(ks[18], (num_layers, 1, E), 0.02),
        "ln2_b": w(ks[19], (num_layers, 1, E), 0.02),
    }
    return params


# --------------------------- pure-JAX reference ---------------------------

def _ref_forward(x, params):
    B, S, _ = x.shape
    E, H = params["embed_dim"], params["num_heads"]
    Dh = E // H
    L = params["wq"].shape[0]

    def ln(y, g, b):
        mu = y.mean(-1, keepdims=True)
        var = ((y - mu) ** 2).mean(-1, keepdims=True)
        return (y - mu) / jnp.sqrt(var + 1e-5) * g + b

    h = x @ params["in_w"] + params["in_b"][0] + params["pe"][:S][None]
    for l in range(L):
        Wq = params["wq"][l].transpose(1, 0, 2).reshape(E, E)
        Wk = params["wk"][l].transpose(1, 0, 2).reshape(E, E)
        Wv = params["wv"][l].transpose(1, 0, 2).reshape(E, E)
        bq = params["bq"][l].reshape(E)
        bk = params["bk"][l].reshape(E)
        bv = params["bv"][l].reshape(E)
        Wo = params["wo"][l].reshape(E, E)
        bo = params["bo"][l][0]

        q = (h @ Wq + bq).reshape(B, S, H, Dh).transpose(0, 2, 1, 3)
        k = (h @ Wk + bk).reshape(B, S, H, Dh).transpose(0, 2, 1, 3)
        v = (h @ Wv + bv).reshape(B, S, H, Dh).transpose(0, 2, 1, 3)
        s = jnp.einsum("bhqd,bhkd->bhqk", q, k) / math.sqrt(Dh)
        a = jax.nn.softmax(s, axis=-1)
        o = jnp.einsum("bhqk,bhkd->bhqd", a, v).transpose(0, 2, 1, 3).reshape(B, S, E)
        o = o @ Wo + bo

        h1 = ln(h + o, params["ln1_g"][l][0], params["ln1_b"][l][0])
        ff = jnp.maximum(h1 @ params["w1"][l] + params["b1"][l][0], 0.0)
        ff = ff @ params["w2"][l] + params["b2"][l][0]
        h = ln(h1 + ff, params["ln2_g"][l][0], params["ln2_b"][l][0])
    return h[:, -1, :] @ params["fc_w"] + params["fc_b"][0]


# --------------------------------- main ---------------------------------

if __name__ == "__main__":
    # Shapes consistent with the module: input_size=30, num_heads=4
    # -> embed_dim = 32, head_dim = 8; num_layers=2, output_size=4.
    B, S, input_size = 2, 8, 30
    num_heads, num_layers, output_size = 4, 2, 4

    key = jax.random.PRNGKey(0)
    pkey, xkey = jax.random.split(key)
    params = init_params(pkey, input_size, num_heads, num_layers, output_size)
    x = jax.random.normal(xkey, (B, S, input_size), dtype=jnp.float32)

    out = transformer_forward(x, params)
    out = jax.block_until_ready(out)

    ref = jax.block_until_ready(_ref_forward(x, params))
    assert out.shape == (B, output_size)
    assert jnp.allclose(out, ref, rtol=2e-4, atol=2e-4), "Pallas output mismatch"

    print("KERNEL_OK")
</pallas_src>

<mosaic_0001>
module attributes {stable_mosaic.version = 11 : i64} {
  func.func @_transformer_kernel(%arg0: i32, %arg1: memref<1x8x30xf32, #tpu.memory_space<vmem>>, %arg2: memref<8x32xf32, #tpu.memory_space<vmem>>, %arg3: memref<30x32xf32, #tpu.memory_space<vmem>>, %arg4: memref<1x32xf32, #tpu.memory_space<vmem>>, %arg5: memref<2x4x32x8xf32, #tpu.memory_space<vmem>>, %arg6: memref<2x4x1x8xf32, #tpu.memory_space<vmem>>, %arg7: memref<2x4x32x8xf32, #tpu.memory_space<vmem>>, %arg8: memref<2x4x1x8xf32, #tpu.memory_space<vmem>>, %arg9: memref<2x4x32x8xf32, #tpu.memory_space<vmem>>, %arg10: memref<2x4x1x8xf32, #tpu.memory_space<vmem>>, %arg11: memref<2x4x8x32xf32, #tpu.memory_space<vmem>>, %arg12: memref<2x1x32xf32, #tpu.memory_space<vmem>>, %arg13: memref<2x32x2048xf32, #tpu.memory_space<vmem>>, %arg14: memref<2x1x2048xf32, #tpu.memory_space<vmem>>, %arg15: memref<2x2048x32xf32, #tpu.memory_space<vmem>>, %arg16: memref<2x1x32xf32, #tpu.memory_space<vmem>>, %arg17: memref<2x1x32xf32, #tpu.memory_space<vmem>>, %arg18: memref<2x1x32xf32, #tpu.memory_space<vmem>>, %arg19: memref<2x1x32xf32, #tpu.memory_space<vmem>>, %arg20: memref<2x1x32xf32, #tpu.memory_space<vmem>>, %arg21: memref<32x4xf32, #tpu.memory_space<vmem>>, %arg22: memref<1x4xf32, #tpu.memory_space<vmem>>, %arg23: memref<1x1x4xf32, #tpu.memory_space<vmem>>) attributes {dimension_semantics = [#tpu.dimension_semantics<parallel>], iteration_bounds = array<i64: 2>, scalar_prefetch = 0 : i64, scratch_operands = 0 : i64, tpu.core_type = #tpu.core_type<tc>, window_params = [{transform_indices = @transform_0, window_bounds = array<i64: 1, 8, 30>}, {pipeline_mode = #tpu.pipeline_mode<synchronous>, transform_indices = @transform_1, window_bounds = array<i64: 8, 32>}, {pipeline_mode = #tpu.pipeline_mode<synchronous>, transform_indices = @transform_2, window_bounds = array<i64: 30, 32>}, {pipeline_mode = #tpu.pipeline_mode<synchronous>, transform_indices = @transform_3, window_bounds = array<i64: 1, 32>}, {pipeline_mode = #tpu.pipeline_mode<synchronous>, transform_indices = @transform_4, window_bounds = array<i64: 2, 4, 32, 8>}, {pipeline_mode = #tpu.pipeline_mode<synchronous>, transform_indices = @transform_5, window_bounds = array<i64: 2, 4, 1, 8>}, {pipeline_mode = #tpu.pipeline_mode<synchronous>, transform_indices = @transform_6, window_bounds = array<i64: 2, 4, 32, 8>}, {pipeline_mode = #tpu.pipeline_mode<synchronous>, transform_indices = @transform_7, window_bounds = array<i64: 2, 4, 1, 8>}, {pipeline_mode = #tpu.pipeline_mode<synchronous>, transform_indices = @transform_8, window_bounds = array<i64: 2, 4, 32, 8>}, {pipeline_mode = #tpu.pipeline_mode<synchronous>, transform_indices = @transform_9, window_bounds = array<i64: 2, 4, 1, 8>}, {pipeline_mode = #tpu.pipeline_mode<synchronous>, transform_indices = @transform_10, window_bounds = array<i64: 2, 4, 8, 32>}, {pipeline_mode = #tpu.pipeline_mode<synchronous>, transform_indices = @transform_11, window_bounds = array<i64: 2, 1, 32>}, {pipeline_mode = #tpu.pipeline_mode<synchronous>, transform_indices = @transform_12, window_bounds = array<i64: 2, 32, 2048>}, {pipeline_mode = #tpu.pipeline_mode<synchronous>, transform_indices = @transform_13, window_bounds = array<i64: 2, 1, 2048>}, {pipeline_mode = #tpu.pipeline_mode<synchronous>, transform_indices = @transform_14, window_bounds = array<i64: 2, 2048, 32>}, {pipeline_mode = #tpu.pipeline_mode<synchronous>, transform_indices = @transform_15, window_bounds = array<i64: 2, 1, 32>}, {pipeline_mode = #tpu.pipeline_mode<synchronous>, transform_indices = @transform_16, window_bounds = array<i64: 2, 1, 32>}, {pipeline_mode = #tpu.pipeline_mode<synchronous>, transform_indices = @transform_17, window_bounds = array<i64: 2, 1, 32>}, {pipeline_mode = #tpu.pipeline_mode<synchronous>, transform_indices = @transform_18, window_bounds = array<i64: 2, 1, 32>}, {pipeline_mode = #tpu.pipeline_mode<synchronous>, transform_indices = @transform_19, window_bounds = array<i64: 2, 1, 32>}, {pipeline_mode = #tpu.pipeline_mode<synchronous>, transform_indices = @transform_20, window_bounds = array<i64: 32, 4>}, {pipeline_mode = #tpu.pipeline_mode<synchronous>, transform_indices = @transform_21, window_bounds = array<i64: 1, 4>}, {transform_indices = @transform_22, window_bounds = array<i64: 1, 1, 4>}]} {
    %c0 = arith.constant 0 : index
    %c0_0 = arith.constant 0 : index
    %c0_1 = arith.constant 0 : index
    %0 = vector.load %arg1[%c0, %c0_0, %c0_1] : memref<1x8x30xf32, #tpu.memory_space<vmem>>, vector<1x8x30xf32>
    %1 = vector.shape_cast %0 : vector<1x8x30xf32> to vector<8x30xf32>
    %c0_2 = arith.constant 0 : index
    %c0_3 = arith.constant 0 : index
    %2 = vector.load %arg3[%c0_2, %c0_3] : memref<30x32xf32, #tpu.memory_space<vmem>>, vector<30x32xf32>
    %cst = arith.constant dense<0.000000e+00> : vector<8x32xf32>
    %3 = tpu.matmul %1, %2, %cst {dimension_numbers = #tpu.dot_dimension_numbers<[1], [0], [0], [1], [0, 0, 1, 1], [], []>} : vector<8x30xf32>, vector<30x32xf32>, vector<8x32xf32> -> vector<8x32xf32>
    %c0_4 = arith.constant 0 : index
    %c0_5 = arith.constant 0 : index
    %4 = vector.load %arg4[%c0_4, %c0_5] : memref<1x32xf32, #tpu.memory_space<vmem>>, vector<1x32xf32>
    %5 = vector.broadcast %4 : vector<1x32xf32> to vector<8x32xf32>
    %6 = arith.addf %3, %5 : vector<8x32xf32>
    %c0_6 = arith.constant 0 : index
    %c0_7 = arith.constant 0 : index
    %7 = vector.load %arg2[%c0_6, %c0_7] : memref<8x32xf32, #tpu.memory_space<vmem>>, vector<8x32xf32>
    %8 = arith.addf %6, %7 : vector<8x32xf32>
    %cst_8 = arith.constant 0.000000e+00 : f32
    %9 = vector.broadcast %cst_8 : f32 to vector<8x32xf32>
    %c0_9 = arith.constant 0 : index
    %c0_10 = arith.constant 0 : index
    %c0_11 = arith.constant 0 : index
    %c0_12 = arith.constant 0 : index
    %10 = vector.load %arg5[%c0_9, %c0_10, %c0_11, %c0_12] : memref<2x4x32x8xf32, #tpu.memory_space<vmem>>, vector<1x1x32x8xf32>
    %11 = vector.shape_cast %10 : vector<1x1x32x8xf32> to vector<32x8xf32>
    %cst_13 = arith.constant dense<0.000000e+00> : vector<8x8xf32>
    %12 = tpu.matmul %8, %11, %cst_13 {dimension_numbers = #tpu.dot_dimension_numbers<[1], [0], [0], [1], [0, 0, 1, 1], [], []>} : vector<8x32xf32>, vector<32x8xf32>, vector<8x8xf32> -> vector<8x8xf32>
    %c0_14 = arith.constant 0 : index
    %c0_15 = arith.constant 0 : index
    %c0_16 = arith.constant 0 : index
    %c0_17 = arith.constant 0 : index
    %13 = vector.load %arg6[%c0_14, %c0_15, %c0_16, %c0_17] : memref<2x4x1x8xf32, #tpu.memory_space<vmem>>, vector<1x1x1x8xf32>
    %14 = vector.shape_cast %13 : vector<1x1x1x8xf32> to vector<1x8xf32>
    %15 = vector.broadcast %14 : vector<1x8xf32> to vector<8x8xf32>
    %16 = arith.addf %12, %15 : vector<8x8xf32>
    %cst_18 = arith.constant 0.353553385 : f32
    %17 = vector.broadcast %cst_18 : f32 to vector<8x8xf32>
    %18 = arith.mulf %16, %17 : vector<8x8xf32>
    %c0_19 = arith.constant 0 : index
    %c0_20 = arith.constant 0 : index
    %c0_21 = arith.constant 0 : index
    %c0_22 = arith.constant 0 : index
    %19 = vector.load %arg7[%c0_19, %c0_20, %c0_21, %c0_22] : memref<2x4x32x8xf32, #tpu.memory_space<vmem>>, vector<1x1x32x8xf32>
    %20 = vector.shape_cast %19 : vector<1x1x32x8xf32> to vector<32x8xf32>
    %cst_23 = arith.constant dense<0.000000e+00> : vector<8x8xf32>
    %21 = tpu.matmul %8, %20, %cst_23 {dimension_numbers = #tpu.dot_dimension_numbers<[1], [0], [0], [1], [0, 0, 1, 1], [], []>} : vector<8x32xf32>, vector<32x8xf32>, vector<8x8xf32> -> vector<8x8xf32>
    %c0_24 = arith.constant 0 : index
    %c0_25 = arith.constant 0 : index
    %c0_26 = arith.constant 0 : index
    %c0_27 = arith.constant 0 : index
    %22 = vector.load %arg8[%c0_24, %c0_25, %c0_26, %c0_27] : memref<2x4x1x8xf32, #tpu.memory_space<vmem>>, vector<1x1x1x8xf32>
    %23 = vector.shape_cast %22 : vector<1x1x1x8xf32> to vector<1x8xf32>
    %24 = vector.broadcast %23 : vector<1x8xf32> to vector<8x8xf32>
    %25 = arith.addf %21, %24 : vector<8x8xf32>
    %c0_28 = arith.constant 0 : index
    %c0_29 = arith.constant 0 : index
    %c0_30 = arith.constant 0 : index
    %c0_31 = arith.constant 0 : index
    %26 = vector.load %arg9[%c0_28, %c0_29, %c0_30, %c0_31] : memref<2x4x32x8xf32, #tpu.memory_space<vmem>>, vector<1x1x32x8xf32>
    %27 = vector.shape_cast %26 : vector<1x1x32x8xf32> to vector<32x8xf32>
    %cst_32 = arith.constant dense<0.000000e+00> : vector<8x8xf32>
    %28 = tpu.matmul %8, %27, %cst_32 {dimension_numbers = #tpu.dot_dimension_numbers<[1], [0], [0], [1], [0, 0, 1, 1], [], []>} : vector<8x32xf32>, vector<32x8xf32>, vector<8x8xf32> -> vector<8x8xf32>
    %c0_33 = arith.constant 0 : index
    %c0_34 = arith.constant 0 : index
    %c0_35 = arith.constant 0 : index
    %c0_36 = arith.constant 0 : index
    %29 = vector.load %arg10[%c0_33, %c0_34, %c0_35, %c0_36] : memref<2x4x1x8xf32, #tpu.memory_space<vmem>>, vector<1x1x1x8xf32>
    %30 = vector.shape_cast %29 : vector<1x1x1x8xf32> to vector<1x8xf32>
    %31 = vector.broadcast %30 : vector<1x8xf32> to vector<8x8xf32>
    %32 = arith.addf %28, %31 : vector<8x8xf32>
    %cst_37 = arith.constant dense<0.000000e+00> : vector<8x8xf32>
    %33 = tpu.matmul %18, %25, %cst_37 {dimension_numbers = #tpu.dot_dimension_numbers<[1], [1], [0], [0], [0, 0, 1, 0], [], []>} : vector<8x8xf32>, vector<8x8xf32>, vector<8x8xf32> -> vector<8x8xf32>
    %cst_38 = arith.constant dense<0xFF800000> : vector<8xf32>
    %34 = vector.multi_reduction <maximumf>, %33, %cst_38 [1] : vector<8x8xf32> to vector<8xf32>
    %35 = vector.shape_cast %34 : vector<8xf32> to vector<8x1xf32>
    %36 = vector.broadcast %35 : vector<8x1xf32> to vector<8x8xf32>
    %37 = arith.subf %33, %36 : vector<8x8xf32>
    %38 = math.exp %37 : vector<8x8xf32>
    %cst_39 = arith.constant dense<0.000000e+00> : vector<8xf32>
    %39 = vector.multi_reduction <add>, %38, %cst_39 [1] : vector<8x8xf32> to vector<8xf32>
    %40 = vector.shape_cast %39 : vector<8xf32> to vector<8x1xf32>
    %41 = vector.broadcast %40 : vector<8x1xf32> to vector<8x8xf32>
    %42 = arith.divf %38, %41 : vector<8x8xf32>
    %cst_40 = arith.constant dense<0.000000e+00> : vector<8x8xf32>
    %43 = tpu.matmul %42, %32, %cst_40 {dimension_numbers = #tpu.dot_dimension_numbers<[1], [0], [0], [1], [0, 0, 1, 1], [], []>} : vector<8x8xf32>, vector<8x8xf32>, vector<8x8xf32> -> vector<8x8xf32>
    %c0_41 = arith.constant 0 : index
    %c0_42 = arith.constant 0 : index
    %c0_43 = arith.constant 0 : index
    %c0_44 = arith.constant 0 : index
    %44 = vector.load %arg11[%c0_41, %c0_42, %c0_43, %c0_44] : memref<2x4x8x32xf32, #tpu.memory_space<vmem>>, vector<1x1x8x32xf32>
    %45 = vector.shape_cast %44 : vector<1x1x8x32xf32> to vector<8x32xf32>
    %cst_45 = arith.constant dense<0.000000e+00> : vector<8x32xf32>
    %46 = tpu.matmul %43, %45, %cst_45 {dimension_numbers = #tpu.dot_dimension_numbers<[1], [0], [0], [1], [0, 0, 1, 1], [], []>} : vector<8x8xf32>, vector<8x32xf32>, vector<8x32xf32> -> vector<8x32xf32>
    %47 = arith.addf %9, %46 : vector<8x32xf32>
    %c0_46 = arith.constant 0 : index
    %c1 = arith.constant 1 : index
    %c0_47 = arith.constant 0 : index
    %c0_48 = arith.constant 0 : index
    %48 = vector.load %arg5[%c0_46, %c1, %c0_47, %c0_48] : memref<2x4x32x8xf32, #tpu.memory_space<vmem>>, vector<1x1x32x8xf32>
    %49 = vector.shape_cast %48 : vector<1x1x32x8xf32> to vector<32x8xf32>
    %cst_49 = arith.constant dense<0.000000e+00> : vector<8x8xf32>
    %50 = tpu.matmul %8, %49, %cst_49 {dimension_numbers = #tpu.dot_dimension_numbers<[1], [0], [0], [1], [0, 0, 1, 1], [], []>} : vector<8x32xf32>, vector<32x8xf32>, vector<8x8xf32> -> vector<8x8xf32>
    %c0_50 = arith.constant 0 : index
    %c1_51 = arith.constant 1 : index
    %c0_52 = arith.constant 0 : index
    %c0_53 = arith.constant 0 : index
    %51 = vector.load %arg6[%c0_50, %c1_51, %c0_52, %c0_53] : memref<2x4x1x8xf32, #tpu.memory_space<vmem>>, vector<1x1x1x8xf32>
    %52 = vector.shape_cast %51 : vector<1x1x1x8xf32> to vector<1x8xf32>
    %53 = vector.broadcast %52 : vector<1x8xf32> to vector<8x8xf32>
    %54 = arith.addf %50, %53 : vector<8x8xf32>
    %cst_54 = arith.constant 0.353553385 : f32
    %55 = vector.broadcast %cst_54 : f32 to vector<8x8xf32>
    %56 = arith.mulf %54, %55 : vector<8x8xf32>
    %c0_55 = arith.constant 0 : index
    %c1_56 = arith.constant 1 : index
    %c0_57 = arith.constant 0 : index
    %c0_58 = arith.constant 0 : index
    %57 = vector.load %arg7[%c0_55, %c1_56, %c0_57, %c0_58] : memref<2x4x32x8xf32, #tpu.memory_space<vmem>>, vector<1x1x32x8xf32>
    %58 = vector.shape_cast %57 : vector<1x1x32x8xf32> to vector<32x8xf32>
    %cst_59 = arith.constant dense<0.000000e+00> : vector<8x8xf32>
    %59 = tpu.matmul %8, %58, %cst_59 {dimension_numbers = #tpu.dot_dimension_numbers<[1], [0], [0], [1], [0, 0, 1, 1], [], []>} : vector<8x32xf32>, vector<32x8xf32>, vector<8x8xf32> -> vector<8x8xf32>
    %c0_60 = arith.constant 0 : index
    %c1_61 = arith.constant 1 : index
    %c0_62 = arith.constant 0 : index
    %c0_63 = arith.constant 0 : index
    %60 = vector.load %arg8[%c0_60, %c1_61, %c0_62, %c0_63] : memref<2x4x1x8xf32, #tpu.memory_space<vmem>>, vector<1x1x1x8xf32>
    %61 = vector.shape_cast %60 : vector<1x1x1x8xf32> to vector<1x8xf32>
    %62 = vector.broadcast %61 : vector<1x8xf32> to vector<8x8xf32>
    %63 = arith.addf %59, %62 : vector<8x8xf32>
    %c0_64 = arith.constant 0 : index
    %c1_65 = arith.constant 1 : index
    %c0_66 = arith.constant 0 : index
    %c0_67 = arith.constant 0 : index
    %64 = vector.load %arg9[%c0_64, %c1_65, %c0_66, %c0_67] : memref<2x4x32x8xf32, #tpu.memory_space<vmem>>, vector<1x1x32x8xf32>
    %65 = vector.shape_cast %64 : vector<1x1x32x8xf32> to vector<32x8xf32>
    %cst_68 = arith.constant dense<0.000000e+00> : vector<8x8xf32>
    %66 = tpu.matmul %8, %65, %cst_68 {dimension_numbers = #tpu.dot_dimension_numbers<[1], [0], [0], [1], [0, 0, 1, 1], [], []>} : vector<8x32xf32>, vector<32x8xf32>, vector<8x8xf32> -> vector<8x8xf32>
    %c0_69 = arith.constant 0 : index
    %c1_70 = arith.constant 1 : index
    %c0_71 = arith.constant 0 : index
    %c0_72 = arith.constant 0 : index
    %67 = vector.load %arg10[%c0_69, %c1_70, %c0_71, %c0_72] : memref<2x4x1x8xf32, #tpu.memory_space<vmem>>, vector<1x1x1x8xf32>
    %68 = vector.shape_cast %67 : vector<1x1x1x8xf32> to vector<1x8xf32>
    %69 = vector.broadcast %68 : vector<1x8xf32> to vector<8x8xf32>
    %70 = arith.addf %66, %69 : vector<8x8xf32>
    %cst_73 = arith.constant dense<0.000000e+00> : vector<8x8xf32>
    %71 = tpu.matmul %56, %63, %cst_73 {dimension_numbers = #tpu.dot_dimension_numbers<[1], [1], [0], [0], [0, 0, 1, 0], [], []>} : vector<8x8xf32>, vector<8x8xf32>, vector<8x8xf32> -> vector<8x8xf32>
    %cst_74 = arith.constant dense<0xFF800000> : vector<8xf32>
    %72 = vector.multi_reduction <maximumf>, %71, %cst_74 [1] : vector<8x8xf32> to vector<8xf32>
    %73 = vector.shape_cast %72 : vector<8xf32> to vector<8x1xf32>
    %74 = vector.broadcast %73 : vector<8x1xf32> to vector<8x8xf32>
    %75 = arith.subf %71, %74 : vector<8x8xf32>
    %76 = math.exp %75 : vector<8x8xf32>
    %cst_75 = arith.constant dense<0.000000e+00> : vector<8xf32>
    %77 = vector.multi_reduction <add>, %76, %cst_75 [1] : vector<8x8xf32> to vector<8xf32>
    %78 = vector.shape_cast %77 : vector<8xf32> to vector<8x1xf32>
    %79 = vector.broadcast %78 : vector<8x1xf32> to vector<8x8xf32>
    %80 = arith.divf %76, %79 : vector<8x8xf32>
    %cst_76 = arith.constant dense<0.000000e+00> : vector<8x8xf32>
    %81 = tpu.matmul %80, %70, %cst_76 {dimension_numbers = #tpu.dot_dimension_numbers<[1], [0], [0], [1], [0, 0, 1, 1], [], []>} : vector<8x8xf32>, vector<8x8xf32>, vector<8x8xf32> -> vector<8x8xf32>
    %c0_77 = arith.constant 0 : index
    %c1_78 = arith.constant 1 : index
    %c0_79 = arith.constant 0 : index
    %c0_80 = arith.constant 0 : index
    %82 = vector.load %arg11[%c0_77, %c1_78, %c0_79, %c0_80] : memref<2x4x8x32xf32, #tpu.memory_space<vmem>>, vector<1x1x8x32xf32>
    %83 = vector.shape_cast %82 : vector<1x1x8x32xf32> to vector<8x32xf32>
    %cst_81 = arith.constant dense<0.000000e+00> : vector<8x32xf32>
    %84 = tpu.matmul %81, %83, %cst_81 {dimension_numbers = #tpu.dot_dimension_numbers<[1], [0], [0], [1], [0, 0, 1, 1], [], []>} : vector<8x8xf32>, vector<8x32xf32>, vector<8x32xf32> -> vector<8x32xf32>
    %85 = arith.addf %47, %84 : vector<8x32xf32>
    %c0_82 = arith.constant 0 : index
    %c2 = arith.constant 2 : index
    %c0_83 = arith.constant 0 : index
    %c0_84 = arith.constant 0 : index
    %86 = vector.load %arg5[%c0_82, %c2, %c0_83, %c0_84] : memref<2x4x32x8xf32, #tpu.memory_space<vmem>>, vector<1x1x32x8xf32>
    %87 = vector.shape_cast %86 : vector<1x1x32x8xf32> to vector<32x8xf32>
    %cst_85 = arith.constant dense<0.000000e+00> : vector<8x8xf32>
    %88 = tpu.matmul %8, %87, %cst_85 {dimension_numbers = #tpu.dot_dimension_numbers<[1], [0], [0], [1], [0, 0, 1, 1], [], []>} : vector<8x32xf32>, vector<32x8xf32>, vector<8x8xf32> -> vector<8x8xf32>
    %c0_86 = arith.constant 0 : index
    %c2_87 = arith.constant 2 : index
    %c0_88 = arith.constant 0 : index
    %c0_89 = arith.constant 0 : index
    %89 = vector.load %arg6[%c0_86, %c2_87, %c0_88, %c0_89] : memref<2x4x1x8xf32, #tpu.memory_space<vmem>>, vector<1x1x1x8xf32>
    %90 = vector.shape_cast %89 : vector<1x1x1x8xf32> to vector<1x8xf32>
    %91 = vector.broadcast %90 : vector<1x8xf32> to vector<8x8xf32>
    %92 = arith.addf %88, %91 : vector<8x8xf32>
    %cst_90 = arith.constant 0.353553385 : f32
    %93 = vector.broadcast %cst_90 : f32 to vector<8x8xf32>
    %94 = arith.mulf %92, %93 : vector<8x8xf32>
    %c0_91 = arith.constant 0 : index
    %c2_92 = arith.constant 2 : index
    %c0_93 = arith.constant 0 : index
    %c0_94 = arith.constant 0 : index
    %95 = vector.load %arg7[%c0_91, %c2_92, %c0_93, %c0_94] : memref<2x4x32x8xf32, #tpu.memory_space<vmem>>, vector<1x1x32x8xf32>
    %96 = vector.shape_cast %95 : vector<1x1x32x8xf32> to vector<32x8xf32>
    %cst_95 = arith.constant dense<0.000000e+00> : vector<8x8xf32>
    %97 = tpu.matmul %8, %96, %cst_95 {dimension_numbers = #tpu.dot_dimension_numbers<[1], [0], [0], [1], [0, 0, 1, 1], [], []>} : vector<8x32xf32>, vector<32x8xf32>, vector<8x8xf32> -> vector<8x8xf32>
    %c0_96 = arith.constant 0 : index
    %c2_97 = arith.constant 2 : index
    %c0_98 = arith.constant 0 : index
    %c0_99 = arith.constant 0 : index
    %98 = vector.load %arg8[%c0_96, %c2_97, %c0_98, %c0_99] : memref<2x4x1x8xf32, #tpu.memory_space<vmem>>, vector<1x1x1x8xf32>
    %99 = vector.shape_cast %98 : vector<1x1x1x8xf32> to vector<1x8xf32>
    %100 = vector.broadcast %99 : vector<1x8xf32> to vector<8x8xf32>
    %101 = arith.addf %97, %100 : vector<8x8xf32>
    %c0_100 = arith.constant 0 : index
    %c2_101 = arith.constant 2 : index
    %c0_102 = arith.constant 0 : index
    %c0_103 = arith.constant 0 : index
    %102 = vector.load %arg9[%c0_100, %c2_101, %c0_102, %c0_103] : memref<2x4x32x8xf32, #tpu.memory_space<vmem>>, vector<1x1x32x8xf32>
    %103 = vector.shape_cast %102 : vector<1x1x32x8xf32> to vector<32x8xf32>
    %cst_104 = arith.constant dense<0.000000e+00> : vector<8x8xf32>
    %104 = tpu.matmul %8, %103, %cst_104 {dimension_numbers = #tpu.dot_dimension_numbers<[1], [0], [0], [1], [0, 0, 1, 1], [], []>} : vector<8x32xf32>, vector<32x8xf32>, vector<8x8xf32> -> vector<8x8xf32>
    %c0_105 = arith.constant 0 : index
    %c2_106 = arith.constant 2 : index
    %c0_107 = arith.constant 0 : index
    %c0_108 = arith.constant 0 : index
    %105 = vector.load %arg10[%c0_105, %c2_106, %c0_107, %c0_108] : memref<2x4x1x8xf32, #tpu.memory_space<vmem>>, vector<1x1x1x8xf32>
    %106 = vector.shape_cast %105 : vector<1x1x1x8xf32> to vector<1x8xf32>
    %107 = vector.broadcast %106 : vector<1x8xf32> to vector<8x8xf32>
    %108 = arith.addf %104, %107 : vector<8x8xf32>
    %cst_109 = arith.constant dense<0.000000e+00> : vector<8x8xf32>
    %109 = tpu.matmul %94, %101, %cst_109 {dimension_numbers = #tpu.dot_dimension_numbers<[1], [1], [0], [0], [0, 0, 1, 0], [], []>} : vector<8x8xf32>, vector<8x8xf32>, vector<8x8xf32> -> vector<8x8xf32>
    %cst_110 = arith.constant dense<0xFF800000> : vector<8xf32>
    %110 = vector.multi_reduction <maximumf>, %109, %cst_110 [1] : vector<8x8xf32> to vector<8xf32>
    %111 = vector.shape_cast %110 : vector<8xf32> to vector<8x1xf32>
    %112 = vector.broadcast %111 : vector<8x1xf32> to vector<8x8xf32>
    %113 = arith.subf %109, %112 : vector<8x8xf32>
    %114 = math.exp %113 : vector<8x8xf32>
    %cst_111 = arith.constant dense<0.000000e+00> : vector<8xf32>
    %115 = vector.multi_reduction <add>, %114, %cst_111 [1] : vector<8x8xf32> to vector<8xf32>
    %116 = vector.shape_cast %115 : vector<8xf32> to vector<8x1xf32>
    %117 = vector.broadcast %116 : vector<8x1xf32> to vector<8x8xf32>
    %118 = arith.divf %114, %117 : vector<8x8xf32>
    %cst_112 = arith.constant dense<0.000000e+00> : vector<8x8xf32>
    %119 = tpu.matmul %118, %108, %cst_112 {dimension_numbers = #tpu.dot_dimension_numbers<[1], [0], [0], [1], [0, 0, 1, 1], [], []>} : vector<8x8xf32>, vector<8x8xf32>, vector<8x8xf32> -> vector<8x8xf32>
    %c0_113 = arith.constant 0 : index
    %c2_114 = arith.constant 2 : index
    %c0_115 = arith.constant 0 : index
    %c0_116 = arith.constant 0 : index
    %120 = vector.load %arg11[%c0_113, %c2_114, %c0_115, %c0_116] : memref<2x4x8x32xf32, #tpu.memory_space<vmem>>, vector<1x1x8x32xf32>
    %121 = vector.shape_cast %120 : vector<1x1x8x32xf32> to vector<8x32xf32>
    %cst_117 = arith.constant dense<0.000000e+00> : vector<8x32xf32>
    %122 = tpu.matmul %119, %121, %cst_117 {dimension_numbers = #tpu.dot_dimension_numbers<[1], [0], [0], [1], [0, 0, 1, 1], [], []>} : vector<8x8xf32>, vector<8x32xf32>, vector<8x32xf32> -> vector<8x32xf32>
    %123 = arith.addf %85, %122 : vector<8x32xf32>
    %c0_118 = arith.constant 0 : index
    %c3 = arith.constant 3 : index
    %c0_119 = arith.constant 0 : index
    %c0_120 = arith.constant 0 : index
    %124 = vector.load %arg5[%c0_118, %c3, %c0_119, %c0_120] : memref<2x4x32x8xf32, #tpu.memory_space<vmem>>, vector<1x1x32x8xf32>
    %125 = vector.shape_cast %124 : vector<1x1x32x8xf32> to vector<32x8xf32>
    %cst_121 = arith.constant dense<0.000000e+00> : vector<8x8xf32>
    %126 = tpu.matmul %8, %125, %cst_121 {dimension_numbers = #tpu.dot_dimension_numbers<[1], [0], [0], [1], [0, 0, 1, 1], [], []>} : vector<8x32xf32>, vector<32x8xf32>, vector<8x8xf32> -> vector<8x8xf32>
    %c0_122 = arith.constant 0 : index
    %c3_123 = arith.constant 3 : index
    %c0_124 = arith.constant 0 : index
    %c0_125 = arith.constant 0 : index
    %127 = vector.load %arg6[%c0_122, %c3_123, %c0_124, %c0_125] : memref<2x4x1x8xf32, #tpu.memory_space<vmem>>, vector<1x1x1x8xf32>
    %128 = vector.shape_cast %127 : vector<1x1x1x8xf32> to vector<1x8xf32>
    %129 = vector.broadcast %128 : vector<1x8xf32> to vector<8x8xf32>
    %130 = arith.addf %126, %129 : vector<8x8xf32>
    %cst_126 = arith.constant 0.353553385 : f32
    %131 = vector.broadcast %cst_126 : f32 to vector<8x8xf32>
    %132 = arith.mulf %130, %131 : vector<8x8xf32>
    %c0_127 = arith.constant 0 : index
    %c3_128 = arith.constant 3 : index
    %c0_129 = arith.constant 0 : index
    %c0_130 = arith.constant 0 : index
    %133 = vector.load %arg7[%c0_127, %c3_128, %c0_129, %c0_130] : memref<2x4x32x8xf32, #tpu.memory_space<vmem>>, vector<1x1x32x8xf32>
    %134 = vector.shape_cast %133 : vector<1x1x32x8xf32> to vector<32x8xf32>
    %cst_131 = arith.constant dense<0.000000e+00> : vector<8x8xf32>
    %135 = tpu.matmul %8, %134, %cst_131 {dimension_numbers = #tpu.dot_dimension_numbers<[1], [0], [0], [1], [0, 0, 1, 1], [], []>} : vector<8x32xf32>, vector<32x8xf32>, vector<8x8xf32> -> vector<8x8xf32>
    %c0_132 = arith.constant 0 : index
    %c3_133 = arith.constant 3 : index
    %c0_134 = arith.constant 0 : index
    %c0_135 = arith.constant 0 : index
    %136 = vector.load %arg8[%c0_132, %c3_133, %c0_134, %c0_135] : memref<2x4x1x8xf32, #tpu.memory_space<vmem>>, vector<1x1x1x8xf32>
    %137 = vector.shape_cast %136 : vector<1x1x1x8xf32> to vector<1x8xf32>
    %138 = vector.broadcast %137 : vector<1x8xf32> to vector<8x8xf32>
    %139 = arith.addf %135, %138 : vector<8x8xf32>
    %c0_136 = arith.constant 0 : index
    %c3_137 = arith.constant 3 : index
    %c0_138 = arith.constant 0 : index
    %c0_139 = arith.constant 0 : index
    %140 = vector.load %arg9[%c0_136, %c3_137, %c0_138, %c0_139] : memref<2x4x32x8xf32, #tpu.memory_space<vmem>>, vector<1x1x32x8xf32>
    %141 = vector.shape_cast %140 : vector<1x1x32x8xf32> to vector<32x8xf32>
    %cst_140 = arith.constant dense<0.000000e+00> : vector<8x8xf32>
    %142 = tpu.matmul %8, %141, %cst_140 {dimension_numbers = #tpu.dot_dimension_numbers<[1], [0], [0], [1], [0, 0, 1, 1], [], []>} : vector<8x32xf32>, vector<32x8xf32>, vector<8x8xf32> -> vector<8x8xf32>
    %c0_141 = arith.constant 0 : index
    %c3_142 = arith.constant 3 : index
    %c0_143 = arith.constant 0 : index
    %c0_144 = arith.constant 0 : index
    %143 = vector.load %arg10[%c0_141, %c3_142, %c0_143, %c0_144] : memref<2x4x1x8xf32, #tpu.memory_space<vmem>>, vector<1x1x1x8xf32>
    %144 = vector.shape_cast %143 : vector<1x1x1x8xf32> to vector<1x8xf32>
    %145 = vector.broadcast %144 : vector<1x8xf32> to vector<8x8xf32>
    %146 = arith.addf %142, %145 : vector<8x8xf32>
    %cst_145 = arith.constant dense<0.000000e+00> : vector<8x8xf32>
    %147 = tpu.matmul %132, %139, %cst_145 {dimension_numbers = #tpu.dot_dimension_numbers<[1], [1], [0], [0], [0, 0, 1, 0], [], []>} : vector<8x8xf32>, vector<8x8xf32>, vector<8x8xf32> -> vector<8x8xf32>
    %cst_146 = arith.constant dense<0xFF800000> : vector<8xf32>
    %148 = vector.multi_reduction <maximumf>, %147, %cst_146 [1] : vector<8x8xf32> to vector<8xf32>
    %149 = vector.shape_cast %148 : vector<8xf32> to vector<8x1xf32>
    %150 = vector.broadcast %149 : vector<8x1xf32> to vector<8x8xf32>
    %151 = arith.subf %147, %150 : vector<8x8xf32>
    %152 = math.exp %151 : vector<8x8xf32>
    %cst_147 = arith.constant dense<0.000000e+00> : vector<8xf32>
    %153 = vector.multi_reduction <add>, %152, %cst_147 [1] : vector<8x8xf32> to vector<8xf32>
    %154 = vector.shape_cast %153 : vector<8xf32> to vector<8x1xf32>
    %155 = vector.broadcast %154 : vector<8x1xf32> to vector<8x8xf32>
    %156 = arith.divf %152, %155 : vector<8x8xf32>
    %cst_148 = arith.constant dense<0.000000e+00> : vector<8x8xf32>
    %157 = tpu.matmul %156, %146, %cst_148 {dimension_numbers = #tpu.dot_dimension_numbers<[1], [0], [0], [1], [0, 0, 1, 1], [], []>} : vector<8x8xf32>, vector<8x8xf32>, vector<8x8xf32> -> vector<8x8xf32>
    %c0_149 = arith.constant 0 : index
    %c3_150 = arith.constant 3 : index
    %c0_151 = arith.constant 0 : index
    %c0_152 = arith.constant 0 : index
    %158 = vector.load %arg11[%c0_149, %c3_150, %c0_151, %c0_152] : memref<2x4x8x32xf32, #tpu.memory_space<vmem>>, vector<1x1x8x32xf32>
    %159 = vector.shape_cast %158 : vector<1x1x8x32xf32> to vector<8x32xf32>
    %cst_153 = arith.constant dense<0.000000e+00> : vector<8x32xf32>
    %160 = tpu.matmul %157, %159, %cst_153 {dimension_numbers = #tpu.dot_dimension_numbers<[1], [0], [0], [1], [0, 0, 1, 1], [], []>} : vector<8x8xf32>, vector<8x32xf32>, vector<8x32xf32> -> vector<8x32xf32>
    %161 = arith.addf %123, %160 : vector<8x32xf32>
    %c0_154 = arith.constant 0 : index
    %c0_155 = arith.constant 0 : index
    %c0_156 = arith.constant 0 : index
    %162 = vector.load %arg12[%c0_154, %c0_155, %c0_156] : memref<2x1x32xf32, #tpu.memory_space<vmem>>, vector<1x1x32xf32>
    %163 = vector.shape_cast %162 : vector<1x1x32xf32> to vector<1x32xf32>
    %164 = vector.broadcast %163 : vector<1x32xf32> to vector<8x32xf32>
    %165 = arith.addf %161, %164 : vector<8x32xf32>
    %166 = arith.addf %8, %165 : vector<8x32xf32>
    %c0_157 = arith.constant 0 : index
    %c0_158 = arith.constant 0 : index
    %c0_159 = arith.constant 0 : index
    %167 = vector.load %arg17[%c0_157, %c0_158, %c0_159] : memref<2x1x32xf32, #tpu.memory_space<vmem>>, vector<1x1x32xf32>
    %168 = vector.shape_cast %167 : vector<1x1x32xf32> to vector<1x32xf32>
    %c0_160 = arith.constant 0 : index
    %c0_161 = arith.constant 0 : index
    %c0_162 = arith.constant 0 : index
    %169 = vector.load %arg18[%c0_160, %c0_161, %c0_162] : memref<2x1x32xf32, #tpu.memory_space<vmem>>, vector<1x1x32xf32>
    %170 = vector.shape_cast %169 : vector<1x1x32xf32> to vector<1x32xf32>
    %cst_163 = arith.constant dense<0.000000e+00> : vector<8xf32>
    %171 = vector.multi_reduction <add>, %166, %cst_163 [1] : vector<8x32xf32> to vector<8xf32>
    %172 = vector.shape_cast %171 : vector<8xf32> to vector<8x1xf32>
    %cst_164 = arith.constant 3.200000e+01 : f32
    %173 = vector.broadcast %cst_164 : f32 to vector<8x1xf32>
    %174 = arith.divf %172, %173 : vector<8x1xf32>
    %175 = vector.broadcast %174 : vector<8x1xf32> to vector<8x32xf32>
    %176 = arith.subf %166, %175 : vector<8x32xf32>
    %177 = arith.mulf %176, %176 : vector<8x32xf32>
    %cst_165 = arith.constant dense<0.000000e+00> : vector<8xf32>
    %178 = vector.multi_reduction <add>, %177, %cst_165 [1] : vector<8x32xf32> to vector<8xf32>
    %179 = vector.shape_cast %178 : vector<8xf32> to vector<8x1xf32>
    %cst_166 = arith.constant 3.200000e+01 : f32
    %180 = vector.broadcast %cst_166 : f32 to vector<8x1xf32>
    %181 = arith.divf %179, %180 : vector<8x1xf32>
    %cst_167 = arith.constant 9.99999974E-6 : f32
    %182 = vector.broadcast %cst_167 : f32 to vector<8x1xf32>
    %183 = arith.addf %181, %182 : vector<8x1xf32>
    %184 = math.rsqrt %183 : vector<8x1xf32>
    %185 = vector.broadcast %184 : vector<8x1xf32> to vector<8x32xf32>
    %186 = arith.mulf %176, %185 : vector<8x32xf32>
    %187 = vector.broadcast %168 : vector<1x32xf32> to vector<8x32xf32>
    %188 = arith.mulf %186, %187 : vector<8x32xf32>
    %189 = vector.broadcast %170 : vector<1x32xf32> to vector<8x32xf32>
    %190 = arith.addf %188, %189 : vector<8x32xf32>
    %c0_168 = arith.constant 0 : index
    %c0_169 = arith.constant 0 : index
    %c0_170 = arith.constant 0 : index
    %191 = vector.load %arg13[%c0_168, %c0_169, %c0_170] : memref<2x32x2048xf32, #tpu.memory_space<vmem>>, vector<1x32x2048xf32>
    %192 = vector.shape_cast %191 : vector<1x32x2048xf32> to vector<32x2048xf32>
    %cst_171 = arith.constant dense<0.000000e+00> : vector<8x2048xf32>
    %193 = tpu.matmul %190, %192, %cst_171 {dimension_numbers = #tpu.dot_dimension_numbers<[1], [0], [0], [1], [0, 0, 1, 1], [], []>} : vector<8x32xf32>, vector<32x2048xf32>, vector<8x2048xf32> -> vector<8x2048xf32>
    %c0_172 = arith.constant 0 : index
    %c0_173 = arith.constant 0 : index
    %c0_174 = arith.constant 0 : index
    %194 = vector.load %arg14[%c0_172, %c0_173, %c0_174] : memref<2x1x2048xf32, #tpu.memory_space<vmem>>, vector<1x1x2048xf32>
    %195 = vector.shape_cast %194 : vector<1x1x2048xf32> to vector<1x2048xf32>
    %196 = vector.broadcast %195 : vector<1x2048xf32> to vector<8x2048xf32>
    %197 = arith.addf %193, %196 : vector<8x2048xf32>
    %cst_175 = arith.constant 0.000000e+00 : f32
    %198 = vector.broadcast %cst_175 : f32 to vector<8x2048xf32>
    %199 = arith.maximumf %197, %198 : vector<8x2048xf32>
    %c0_176 = arith.constant 0 : index
    %c0_177 = arith.constant 0 : index
    %c0_178 = arith.constant 0 : index
    %200 = vector.load %arg15[%c0_176, %c0_177, %c0_178] : memref<2x2048x32xf32, #tpu.memory_space<vmem>>, vector<1x2048x32xf32>
    %201 = vector.shape_cast %200 : vector<1x2048x32xf32> to vector<2048x32xf32>
    %cst_179 = arith.constant dense<0.000000e+00> : vector<8x32xf32>
    %202 = tpu.matmul %199, %201, %cst_179 {dimension_numbers = #tpu.dot_dimension_numbers<[1], [0], [0], [1], [0, 0, 1, 1], [], []>} : vector<8x2048xf32>, vector<2048x32xf32>, vector<8x32xf32> -> vector<8x32xf32>
    %c0_180 = arith.constant 0 : index
    %c0_181 = arith.constant 0 : index
    %c0_182 = arith.constant 0 : index
    %203 = vector.load %arg16[%c0_180, %c0_181, %c0_182] : memref<2x1x32xf32, #tpu.memory_space<vmem>>, vector<1x1x32xf32>
    %204 = vector.shape_cast %203 : vector<1x1x32xf32> to vector<1x32xf32>
    %205 = vector.broadcast %204 : vector<1x32xf32> to vector<8x32xf32>
    %206 = arith.addf %202, %205 : vector<8x32xf32>
    %207 = arith.addf %190, %206 : vector<8x32xf32>
    %c0_183 = arith.constant 0 : index
    %c0_184 = arith.constant 0 : index
    %c0_185 = arith.constant 0 : index
    %208 = vector.load %arg19[%c0_183, %c0_184, %c0_185] : memref<2x1x32xf32, #tpu.memory_space<vmem>>, vector<1x1x32xf32>
    %209 = vector.shape_cast %208 : vector<1x1x32xf32> to vector<1x32xf32>
    %c0_186 = arith.constant 0 : index
    %c0_187 = arith.constant 0 : index
    %c0_188 = arith.constant 0 : index
    %210 = vector.load %arg20[%c0_186, %c0_187, %c0_188] : memref<2x1x32xf32, #tpu.memory_space<vmem>>, vector<1x1x32xf32>
    %211 = vector.shape_cast %210 : vector<1x1x32xf32> to vector<1x32xf32>
    %cst_189 = arith.constant dense<0.000000e+00> : vector<8xf32>
    %212 = vector.multi_reduction <add>, %207, %cst_189 [1] : vector<8x32xf32> to vector<8xf32>
    %213 = vector.shape_cast %212 : vector<8xf32> to vector<8x1xf32>
    %cst_190 = arith.constant 3.200000e+01 : f32
    %214 = vector.broadcast %cst_190 : f32 to vector<8x1xf32>
    %215 = arith.divf %213, %214 : vector<8x1xf32>
    %216 = vector.broadcast %215 : vector<8x1xf32> to vector<8x32xf32>
    %217 = arith.subf %207, %216 : vector<8x32xf32>
    %218 = arith.mulf %217, %217 : vector<8x32xf32>
    %cst_191 = arith.constant dense<0.000000e+00> : vector<8xf32>
    %219 = vector.multi_reduction <add>, %218, %cst_191 [1] : vector<8x32xf32> to vector<8xf32>
    %220 = vector.shape_cast %219 : vector<8xf32> to vector<8x1xf32>
    %cst_192 = arith.constant 3.200000e+01 : f32
    %221 = vector.broadcast %cst_192 : f32 to vector<8x1xf32>
    %222 = arith.divf %220, %221 : vector<8x1xf32>
    %cst_193 = arith.constant 9.99999974E-6 : f32
    %223 = vector.broadcast %cst_193 : f32 to vector<8x1xf32>
    %224 = arith.addf %222, %223 : vector<8x1xf32>
    %225 = math.rsqrt %224 : vector<8x1xf32>
    %226 = vector.broadcast %225 : vector<8x1xf32> to vector<8x32xf32>
    %227 = arith.mulf %217, %226 : vector<8x32xf32>
    %228 = vector.broadcast %209 : vector<1x32xf32> to vector<8x32xf32>
    %229 = arith.mulf %227, %228 : vector<8x32xf32>
    %230 = vector.broadcast %211 : vector<1x32xf32> to vector<8x32xf32>
    %231 = arith.addf %229, %230 : vector<8x32xf32>
    %cst_194 = arith.constant 0.000000e+00 : f32
    %232 = vector.broadcast %cst_194 : f32 to vector<8x32xf32>
    %c1_195 = arith.constant 1 : index
    %c0_196 = arith.constant 0 : index
    %c0_197 = arith.constant 0 : index
    %c0_198 = arith.constant 0 : index
    %233 = vector.load %arg5[%c1_195, %c0_196, %c0_197, %c0_198] : memref<2x4x32x8xf32, #tpu.memory_space<vmem>>, vector<1x1x32x8xf32>
    %234 = vector.shape_cast %233 : vector<1x1x32x8xf32> to vector<32x8xf32>
    %cst_199 = arith.constant dense<0.000000e+00> : vector<8x8xf32>
    %235 = tpu.matmul %231, %234, %cst_199 {dimension_numbers = #tpu.dot_dimension_numbers<[1], [0], [0], [1], [0, 0, 1, 1], [], []>} : vector<8x32xf32>, vector<32x8xf32>, vector<8x8xf32> -> vector<8x8xf32>
    %c1_200 = arith.constant 1 : index
    %c0_201 = arith.constant 0 : index
    %c0_202 = arith.constant 0 : index
    %c0_203 = arith.constant 0 : index
    %236 = vector.load %arg6[%c1_200, %c0_201, %c0_202, %c0_203] : memref<2x4x1x8xf32, #tpu.memory_space<vmem>>, vector<1x1x1x8xf32>
    %237 = vector.shape_cast %236 : vector<1x1x1x8xf32> to vector<1x8xf32>
    %238 = vector.broadcast %237 : vector<1x8xf32> to vector<8x8xf32>
    %239 = arith.addf %235, %238 : vector<8x8xf32>
    %cst_204 = arith.constant 0.353553385 : f32
    %240 = vector.broadcast %cst_204 : f32 to vector<8x8xf32>
    %241 = arith.mulf %239, %240 : vector<8x8xf32>
    %c1_205 = arith.constant 1 : index
    %c0_206 = arith.constant 0 : index
    %c0_207 = arith.constant 0 : index
    %c0_208 = arith.constant 0 : index
    %242 = vector.load %arg7[%c1_205, %c0_206, %c0_207, %c0_208] : memref<2x4x32x8xf32, #tpu.memory_space<vmem>>, vector<1x1x32x8xf32>
    %243 = vector.shape_cast %242 : vector<1x1x32x8xf32> to vector<32x8xf32>
    %cst_209 = arith.constant dense<0.000000e+00> : vector<8x8xf32>
    %244 = tpu.matmul %231, %243, %cst_209 {dimension_numbers = #tpu.dot_dimension_numbers<[1], [0], [0], [1], [0, 0, 1, 1], [], []>} : vector<8x32xf32>, vector<32x8xf32>, vector<8x8xf32> -> vector<8x8xf32>
    %c1_210 = arith.constant 1 : index
    %c0_211 = arith.constant 0 : index
    %c0_212 = arith.constant 0 : index
    %c0_213 = arith.constant 0 : index
    %245 = vector.load %arg8[%c1_210, %c0_211, %c0_212, %c0_213] : memref<2x4x1x8xf32, #tpu.memory_space<vmem>>, vector<1x1x1x8xf32>
    %246 = vector.shape_cast %245 : vector<1x1x1x8xf32> to vector<1x8xf32>
    %247 = vector.broadcast %246 : vector<1x8xf32> to vector<8x8xf32>
    %248 = arith.addf %244, %247 : vector<8x8xf32>
    %c1_214 = arith.constant 1 : index
    %c0_215 = arith.constant 0 : index
    %c0_216 = arith.constant 0 : index
    %c0_217 = arith.constant 0 : index
    %249 = vector.load %arg9[%c1_214, %c0_215, %c0_216, %c0_217] : memref<2x4x32x8xf32, #tpu.memory_space<vmem>>, vector<1x1x32x8xf32>
    %250 = vector.shape_cast %249 : vector<1x1x32x8xf32> to vector<32x8xf32>
    %cst_218 = arith.constant dense<0.000000e+00> : vector<8x8xf32>
    %251 = tpu.matmul %231, %250, %cst_218 {dimension_numbers = #tpu.dot_dimension_numbers<[1], [0], [0], [1], [0, 0, 1, 1], [], []>} : vector<8x32xf32>, vector<32x8xf32>, vector<8x8xf32> -> vector<8x8xf32>
    %c1_219 = arith.constant 1 : index
    %c0_220 = arith.constant 0 : index
    %c0_221 = arith.constant 0 : index
    %c0_222 = arith.constant 0 : index
    %252 = vector.load %arg10[%c1_219, %c0_220, %c0_221, %c0_222] : memref<2x4x1x8xf32, #tpu.memory_space<vmem>>, vector<1x1x1x8xf32>
    %253 = vector.shape_cast %252 : vector<1x1x1x8xf32> to vector<1x8xf32>
    %254 = vector.broadcast %253 : vector<1x8xf32> to vector<8x8xf32>
    %255 = arith.addf %251, %254 : vector<8x8xf32>
    %cst_223 = arith.constant dense<0.000000e+00> : vector<8x8xf32>
    %256 = tpu.matmul %241, %248, %cst_223 {dimension_numbers = #tpu.dot_dimension_numbers<[1], [1], [0], [0], [0, 0, 1, 0], [], []>} : vector<8x8xf32>, vector<8x8xf32>, vector<8x8xf32> -> vector<8x8xf32>
    %cst_224 = arith.constant dense<0xFF800000> : vector<8xf32>
    %257 = vector.multi_reduction <maximumf>, %256, %cst_224 [1] : vector<8x8xf32> to vector<8xf32>
    %258 = vector.shape_cast %257 : vector<8xf32> to vector<8x1xf32>
    %259 = vector.broadcast %258 : vector<8x1xf32> to vector<8x8xf32>
    %260 = arith.subf %256, %259 : vector<8x8xf32>
    %261 = math.exp %260 : vector<8x8xf32>
    %cst_225 = arith.constant dense<0.000000e+00> : vector<8xf32>
    %262 = vector.multi_reduction <add>, %261, %cst_225 [1] : vector<8x8xf32> to vector<8xf32>
    %263 = vector.shape_cast %262 : vector<8xf32> to vector<8x1xf32>
    %264 = vector.broadcast %263 : vector<8x1xf32> to vector<8x8xf32>
    %265 = arith.divf %261, %264 : vector<8x8xf32>
    %cst_226 = arith.constant dense<0.000000e+00> : vector<8x8xf32>
    %266 = tpu.matmul %265, %255, %cst_226 {dimension_numbers = #tpu.dot_dimension_numbers<[1], [0], [0], [1], [0, 0, 1, 1], [], []>} : vector<8x8xf32>, vector<8x8xf32>, vector<8x8xf32> -> vector<8x8xf32>
    %c1_227 = arith.constant 1 : index
    %c0_228 = arith.constant 0 : index
    %c0_229 = arith.constant 0 : index
    %c0_230 = arith.constant 0 : index
    %267 = vector.load %arg11[%c1_227, %c0_228, %c0_229, %c0_230] : memref<2x4x8x32xf32, #tpu.memory_space<vmem>>, vector<1x1x8x32xf32>
    %268 = vector.shape_cast %267 : vector<1x1x8x32xf32> to vector<8x32xf32>
    %cst_231 = arith.constant dense<0.000000e+00> : vector<8x32xf32>
    %269 = tpu.matmul %266, %268, %cst_231 {dimension_numbers = #tpu.dot_dimension_numbers<[1], [0], [0], [1], [0, 0, 1, 1], [], []>} : vector<8x8xf32>, vector<8x32xf32>, vector<8x32xf32> -> vector<8x32xf32>
    %270 = arith.addf %232, %269 : vector<8x32xf32>
    %c1_232 = arith.constant 1 : index
    %c1_233 = arith.constant 1 : index
    %c0_234 = arith.constant 0 : index
    %c0_235 = arith.constant 0 : index
    %271 = vector.load %arg5[%c1_232, %c1_233, %c0_234, %c0_235] : memref<2x4x32x8xf32, #tpu.memory_space<vmem>>, vector<1x1x32x8xf32>
    %272 = vector.shape_cast %271 : vector<1x1x32x8xf32> to vector<32x8xf32>
    %cst_236 = arith.constant dense<0.000000e+00> : vector<8x8xf32>
    %273 = tpu.matmul %231, %272, %cst_236 {dimension_numbers = #tpu.dot_dimension_numbers<[1], [0], [0], [1], [0, 0, 1, 1], [], []>} : vector<8x32xf32>, vector<32x8xf32>, vector<8x8xf32> -> vector<8x8xf32>
    %c1_237 = arith.constant 1 : index
    %c1_238 = arith.constant 1 : index
    %c0_239 = arith.constant 0 : index
    %c0_240 = arith.constant 0 : index
    %274 = vector.load %arg6[%c1_237, %c1_238, %c0_239, %c0_240] : memref<2x4x1x8xf32, #tpu.memory_space<vmem>>, vector<1x1x1x8xf32>
    %275 = vector.shape_cast %274 : vector<1x1x1x8xf32> to vector<1x8xf32>
    %276 = vector.broadcast %275 : vector<1x8xf32> to vector<8x8xf32>
    %277 = arith.addf %273, %276 : vector<8x8xf32>
    %cst_241 = arith.constant 0.353553385 : f32
    %278 = vector.broadcast %cst_241 : f32 to vector<8x8xf32>
    %279 = arith.mulf %277, %278 : vector<8x8xf32>
    %c1_242 = arith.constant 1 : index
    %c1_243 = arith.constant 1 : index
    %c0_244 = arith.constant 0 : index
    %c0_245 = arith.constant 0 : index
    %280 = vector.load %arg7[%c1_242, %c1_243, %c0_244, %c0_245] : memref<2x4x32x8xf32, #tpu.memory_space<vmem>>, vector<1x1x32x8xf32>
    %281 = vector.shape_cast %280 : vector<1x1x32x8xf32> to vector<32x8xf32>
    %cst_246 = arith.constant dense<0.000000e+00> : vector<8x8xf32>
    %282 = tpu.matmul %231, %281, %cst_246 {dimension_numbers = #tpu.dot_dimension_numbers<[1], [0], [0], [1], [0, 0, 1, 1], [], []>} : vector<8x32xf32>, vector<32x8xf32>, vector<8x8xf32> -> vector<8x8xf32>
    %c1_247 = arith.constant 1 : index
    %c1_248 = arith.constant 1 : index
    %c0_249 = arith.constant 0 : index
    %c0_250 = arith.constant 0 : index
    %283 = vector.load %arg8[%c1_247, %c1_248, %c0_249, %c0_250] : memref<2x4x1x8xf32, #tpu.memory_space<vmem>>, vector<1x1x1x8xf32>
    %284 = vector.shape_cast %283 : vector<1x1x1x8xf32> to vector<1x8xf32>
    %285 = vector.broadcast %284 : vector<1x8xf32> to vector<8x8xf32>
    %286 = arith.addf %282, %285 : vector<8x8xf32>
    %c1_251 = arith.constant 1 : index
    %c1_252 = arith.constant 1 : index
    %c0_253 = arith.constant 0 : index
    %c0_254 = arith.constant 0 : index
    %287 = vector.load %arg9[%c1_251, %c1_252, %c0_253, %c0_254] : memref<2x4x32x8xf32, #tpu.memory_space<vmem>>, vector<1x1x32x8xf32>
    %288 = vector.shape_cast %287 : vector<1x1x32x8xf32> to vector<32x8xf32>
    %cst_255 = arith.constant dense<0.000000e+00> : vector<8x8xf32>
    %289 = tpu.matmul %231, %288, %cst_255 {dimension_numbers = #tpu.dot_dimension_numbers<[1], [0], [0], [1], [0, 0, 1, 1], [], []>} : vector<8x32xf32>, vector<32x8xf32>, vector<8x8xf32> -> vector<8x8xf32>
    %c1_256 = arith.constant 1 : index
    %c1_257 = arith.constant 1 : index
    %c0_258 = arith.constant 0 : index
    %c0_259 = arith.constant 0 : index
    %290 = vector.load %arg10[%c1_256, %c1_257, %c0_258, %c0_259] : memref<2x4x1x8xf32, #tpu.memory_space<vmem>>, vector<1x1x1x8xf32>
    %291 = vector.shape_cast %290 : vector<1x1x1x8xf32> to vector<1x8xf32>
    %292 = vector.broadcast %291 : vector<1x8xf32> to vector<8x8xf32>
    %293 = arith.addf %289, %292 : vector<8x8xf32>
    %cst_260 = arith.constant dense<0.000000e+00> : vector<8x8xf32>
    %294 = tpu.matmul %279, %286, %cst_260 {dimension_numbers = #tpu.dot_dimension_numbers<[1], [1], [0], [0], [0, 0, 1, 0], [], []>} : vector<8x8xf32>, vector<8x8xf32>, vector<8x8xf32> -> vector<8x8xf32>
    %cst_261 = arith.constant dense<0xFF800000> : vector<8xf32>
    %295 = vector.multi_reduction <maximumf>, %294, %cst_261 [1] : vector<8x8xf32> to vector<8xf32>
    %296 = vector.shape_cast %295 : vector<8xf32> to vector<8x1xf32>
    %297 = vector.broadcast %296 : vector<8x1xf32> to vector<8x8xf32>
    %298 = arith.subf %294, %297 : vector<8x8xf32>
    %299 = math.exp %298 : vector<8x8xf32>
    %cst_262 = arith.constant dense<0.000000e+00> : vector<8xf32>
    %300 = vector.multi_reduction <add>, %299, %cst_262 [1] : vector<8x8xf32> to vector<8xf32>
    %301 = vector.shape_cast %300 : vector<8xf32> to vector<8x1xf32>
    %302 = vector.broadcast %301 : vector<8x1xf32> to vector<8x8xf32>
    %303 = arith.divf %299, %302 : vector<8x8xf32>
    %cst_263 = arith.constant dense<0.000000e+00> : vector<8x8xf32>
    %304 = tpu.matmul %303, %293, %cst_263 {dimension_numbers = #tpu.dot_dimension_numbers<[1], [0], [0], [1], [0, 0, 1, 1], [], []>} : vector<8x8xf32>, vector<8x8xf32>, vector<8x8xf32> -> vector<8x8xf32>
    %c1_264 = arith.constant 1 : index
    %c1_265 = arith.constant 1 : index
    %c0_266 = arith.constant 0 : index
    %c0_267 = arith.constant 0 : index
    %305 = vector.load %arg11[%c1_264, %c1_265, %c0_266, %c0_267] : memref<2x4x8x32xf32, #tpu.memory_space<vmem>>, vector<1x1x8x32xf32>
    %306 = vector.shape_cast %305 : vector<1x1x8x32xf32> to vector<8x32xf32>
    %cst_268 = arith.constant dense<0.000000e+00> : vector<8x32xf32>
    %307 = tpu.matmul %304, %306, %cst_268 {dimension_numbers = #tpu.dot_dimension_numbers<[1], [0], [0], [1], [0, 0, 1, 1], [], []>} : vector<8x8xf32>, vector<8x32xf32>, vector<8x32xf32> -> vector<8x32xf32>
    %308 = arith.addf %270, %307 : vector<8x32xf32>
    %c1_269 = arith.constant 1 : index
    %c2_270 = arith.constant 2 : index
    %c0_271 = arith.constant 0 : index
    %c0_272 = arith.constant 0 : index
    %309 = vector.load %arg5[%c1_269, %c2_270, %c0_271, %c0_272] : memref<2x4x32x8xf32, #tpu.memory_space<vmem>>, vector<1x1x32x8xf32>
    %310 = vector.shape_cast %309 : vector<1x1x32x8xf32> to vector<32x8xf32>
    %cst_273 = arith.constant dense<0.000000e+00> : vector<8x8xf32>
    %311 = tpu.matmul %231, %310, %cst_273 {dimension_numbers = #tpu.dot_dimension_numbers<[1], [0], [0], [1], [0, 0, 1, 1], [], []>} : vector<8x32xf32>, vector<32x8xf32>, vector<8x8xf32> -> vector<8x8xf32>
    %c1_274 = arith.constant 1 : index
    %c2_275 = arith.constant 2 : index
    %c0_276 = arith.constant 0 : index
    %c0_277 = arith.constant 0 : index
    %312 = vector.load %arg6[%c1_274, %c2_275, %c0_276, %c0_277] : memref<2x4x1x8xf32, #tpu.memory_space<vmem>>, vector<1x1x1x8xf32>
    %313 = vector.shape_cast %312 : vector<1x1x1x8xf32> to vector<1x8xf32>
    %314 = vector.broadcast %313 : vector<1x8xf32> to vector<8x8xf32>
    %315 = arith.addf %311, %314 : vector<8x8xf32>
    %cst_278 = arith.constant 0.353553385 : f32
    %316 = vector.broadcast %cst_278 : f32 to vector<8x8xf32>
    %317 = arith.mulf %315, %316 : vector<8x8xf32>
    %c1_279 = arith.constant 1 : index
    %c2_280 = arith.constant 2 : index
    %c0_281 = arith.constant 0 : index
    %c0_282 = arith.constant 0 : index
    %318 = vector.load %arg7[%c1_279, %c2_280, %c0_281, %c0_282] : memref<2x4x32x8xf32, #tpu.memory_space<vmem>>, vector<1x1x32x8xf32>
    %319 = vector.shape_cast %318 : vector<1x1x32x8xf32> to vector<32x8xf32>
    %cst_283 = arith.constant dense<0.000000e+00> : vector<8x8xf32>
    %320 = tpu.matmul %231, %319, %cst_283 {dimension_numbers = #tpu.dot_dimension_numbers<[1], [0], [0], [1], [0, 0, 1, 1], [], []>} : vector<8x32xf32>, vector<32x8xf32>, vector<8x8xf32> -> vector<8x8xf32>
    %c1_284 = arith.constant 1 : index
    %c2_285 = arith.constant 2 : index
    %c0_286 = arith.constant 0 : index
    %c0_287 = arith.constant 0 : index
    %321 = vector.load %arg8[%c1_284, %c2_285, %c0_286, %c0_287] : memref<2x4x1x8xf32, #tpu.memory_space<vmem>>, vector<1x1x1x8xf32>
    %322 = vector.shape_cast %321 : vector<1x1x1x8xf32> to vector<1x8xf32>
    %323 = vector.broadcast %322 : vector<1x8xf32> to vector<8x8xf32>
    %324 = arith.addf %320, %323 : vector<8x8xf32>
    %c1_288 = arith.constant 1 : index
    %c2_289 = arith.constant 2 : index
    %c0_290 = arith.constant 0 : index
    %c0_291 = arith.constant 0 : index
    %325 = vector.load %arg9[%c1_288, %c2_289, %c0_290, %c0_291] : memref<2x4x32x8xf32, #tpu.memory_space<vmem>>, vector<1x1x32x8xf32>
    %326 = vector.shape_cast %325 : vector<1x1x32x8xf32> to vector<32x8xf32>
    %cst_292 = arith.constant dense<0.000000e+00> : vector<8x8xf32>
    %327 = tpu.matmul %231, %326, %cst_292 {dimension_numbers = #tpu.dot_dimension_numbers<[1], [0], [0], [1], [0, 0, 1, 1], [], []>} : vector<8x32xf32>, vector<32x8xf32>, vector<8x8xf32> -> vector<8x8xf32>
    %c1_293 = arith.constant 1 : index
    %c2_294 = arith.constant 2 : index
    %c0_295 = arith.constant 0 : index
    %c0_296 = arith.constant 0 : index
    %328 = vector.load %arg10[%c1_293, %c2_294, %c0_295, %c0_296] : memref<2x4x1x8xf32, #tpu.memory_space<vmem>>, vector<1x1x1x8xf32>
    %329 = vector.shape_cast %328 : vector<1x1x1x8xf32> to vector<1x8xf32>
    %330 = vector.broadcast %329 : vector<1x8xf32> to vector<8x8xf32>
    %331 = arith.addf %327, %330 : vector<8x8xf32>
    %cst_297 = arith.constant dense<0.000000e+00> : vector<8x8xf32>
    %332 = tpu.matmul %317, %324, %cst_297 {dimension_numbers = #tpu.dot_dimension_numbers<[1], [1], [0], [0], [0, 0, 1, 0], [], []>} : vector<8x8xf32>, vector<8x8xf32>, vector<8x8xf32> -> vector<8x8xf32>
    %cst_298 = arith.constant dense<0xFF800000> : vector<8xf32>
    %333 = vector.multi_reduction <maximumf>, %332, %cst_298 [1] : vector<8x8xf32> to vector<8xf32>
    %334 = vector.shape_cast %333 : vector<8xf32> to vector<8x1xf32>
    %335 = vector.broadcast %334 : vector<8x1xf32> to vector<8x8xf32>
    %336 = arith.subf %332, %335 : vector<8x8xf32>
    %337 = math.exp %336 : vector<8x8xf32>
    %cst_299 = arith.constant dense<0.000000e+00> : vector<8xf32>
    %338 = vector.multi_reduction <add>, %337, %cst_299 [1] : vector<8x8xf32> to vector<8xf32>
    %339 = vector.shape_cast %338 : vector<8xf32> to vector<8x1xf32>
    %340 = vector.broadcast %339 : vector<8x1xf32> to vector<8x8xf32>
    %341 = arith.divf %337, %340 : vector<8x8xf32>
    %cst_300 = arith.constant dense<0.000000e+00> : vector<8x8xf32>
    %342 = tpu.matmul %341, %331, %cst_300 {dimension_numbers = #tpu.dot_dimension_numbers<[1], [0], [0], [1], [0, 0, 1, 1], [], []>} : vector<8x8xf32>, vector<8x8xf32>, vector<8x8xf32> -> vector<8x8xf32>
    %c1_301 = arith.constant 1 : index
    %c2_302 = arith.constant 2 : index
    %c0_303 = arith.constant 0 : index
    %c0_304 = arith.constant 0 : index
    %343 = vector.load %arg11[%c1_301, %c2_302, %c0_303, %c0_304] : memref<2x4x8x32xf32, #tpu.memory_space<vmem>>, vector<1x1x8x32xf32>
    %344 = vector.shape_cast %343 : vector<1x1x8x32xf32> to vector<8x32xf32>
    %cst_305 = arith.constant dense<0.000000e+00> : vector<8x32xf32>
    %345 = tpu.matmul %342, %344, %cst_305 {dimension_numbers = #tpu.dot_dimension_numbers<[1], [0], [0], [1], [0, 0, 1, 1], [], []>} : vector<8x8xf32>, vector<8x32xf32>, vector<8x32xf32> -> vector<8x32xf32>
    %346 = arith.addf %308, %345 : vector<8x32xf32>
    %c1_306 = arith.constant 1 : index
    %c3_307 = arith.constant 3 : index
    %c0_308 = arith.constant 0 : index
    %c0_309 = arith.constant 0 : index
    %347 = vector.load %arg5[%c1_306, %c3_307, %c0_308, %c0_309] : memref<2x4x32x8xf32, #tpu.memory_space<vmem>>, vector<1x1x32x8xf32>
    %348 = vector.shape_cast %347 : vector<1x1x32x8xf32> to vector<32x8xf32>
    %cst_310 = arith.constant dense<0.000000e+00> : vector<8x8xf32>
    %349 = tpu.matmul %231, %348, %cst_310 {dimension_numbers = #tpu.dot_dimension_numbers<[1], [0], [0], [1], [0, 0, 1, 1], [], []>} : vector<8x32xf32>, vector<32x8xf32>, vector<8x8xf32> -> vector<8x8xf32>
    %c1_311 = arith.constant 1 : index
    %c3_312 = arith.constant 3 : index
    %c0_313 = arith.constant 0 : index
    %c0_314 = arith.constant 0 : index
    %350 = vector.load %arg6[%c1_311, %c3_312, %c0_313, %c0_314] : memref<2x4x1x8xf32, #tpu.memory_space<vmem>>, vector<1x1x1x8xf32>
    %351 = vector.shape_cast %350 : vector<1x1x1x8xf32> to vector<1x8xf32>
    %352 = vector.broadcast %351 : vector<1x8xf32> to vector<8x8xf32>
    %353 = arith.addf %349, %352 : vector<8x8xf32>
    %cst_315 = arith.constant 0.353553385 : f32
    %354 = vector.broadcast %cst_315 : f32 to vector<8x8xf32>
    %355 = arith.mulf %353, %354 : vector<8x8xf32>
    %c1_316 = arith.constant 1 : index
    %c3_317 = arith.constant 3 : index
    %c0_318 = arith.constant 0 : index
    %c0_319 = arith.constant 0 : index
    %356 = vector.load %arg7[%c1_316, %c3_317, %c0_318, %c0_319] : memref<2x4x32x8xf32, #tpu.memory_space<vmem>>, vector<1x1x32x8xf32>
    %357 = vector.shape_cast %356 : vector<1x1x32x8xf32> to vector<32x8xf32>
    %cst_320 = arith.constant dense<0.000000e+00> : vector<8x8xf32>
    %358 = tpu.matmul %231, %357, %cst_320 {dimension_numbers = #tpu.dot_dimension_numbers<[1], [0], [0], [1], [0, 0, 1, 1], [], []>} : vector<8x32xf32>, vector<32x8xf32>, vector<8x8xf32> -> vector<8x8xf32>
    %c1_321 = arith.constant 1 : index
    %c3_322 = arith.constant 3 : index
    %c0_323 = arith.constant 0 : index
    %c0_324 = arith.constant 0 : index
    %359 = vector.load %arg8[%c1_321, %c3_322, %c0_323, %c0_324] : memref<2x4x1x8xf32, #tpu.memory_space<vmem>>, vector<1x1x1x8xf32>
    %360 = vector.shape_cast %359 : vector<1x1x1x8xf32> to vector<1x8xf32>
    %361 = vector.broadcast %360 : vector<1x8xf32> to vector<8x8xf32>
    %362 = arith.addf %358, %361 : vector<8x8xf32>
    %c1_325 = arith.constant 1 : index
    %c3_326 = arith.constant 3 : index
    %c0_327 = arith.constant 0 : index
    %c0_328 = arith.constant 0 : index
    %363 = vector.load %arg9[%c1_325, %c3_326, %c0_327, %c0_328] : memref<2x4x32x8xf32, #tpu.memory_space<vmem>>, vector<1x1x32x8xf32>
    %364 = vector.shape_cast %363 : vector<1x1x32x8xf32> to vector<32x8xf32>
    %cst_329 = arith.constant dense<0.000000e+00> : vector<8x8xf32>
    %365 = tpu.matmul %231, %364, %cst_329 {dimension_numbers = #tpu.dot_dimension_numbers<[1], [0], [0], [1], [0, 0, 1, 1], [], []>} : vector<8x32xf32>, vector<32x8xf32>, vector<8x8xf32> -> vector<8x8xf32>
    %c1_330 = arith.constant 1 : index
    %c3_331 = arith.constant 3 : index
    %c0_332 = arith.constant 0 : index
    %c0_333 = arith.constant 0 : index
    %366 = vector.load %arg10[%c1_330, %c3_331, %c0_332, %c0_333] : memref<2x4x1x8xf32, #tpu.memory_space<vmem>>, vector<1x1x1x8xf32>
    %367 = vector.shape_cast %366 : vector<1x1x1x8xf32> to vector<1x8xf32>
    %368 = vector.broadcast %367 : vector<1x8xf32> to vector<8x8xf32>
    %369 = arith.addf %365, %368 : vector<8x8xf32>
    %cst_334 = arith.constant dense<0.000000e+00> : vector<8x8xf32>
    %370 = tpu.matmul %355, %362, %cst_334 {dimension_numbers = #tpu.dot_dimension_numbers<[1], [1], [0], [0], [0, 0, 1, 0], [], []>} : vector<8x8xf32>, vector<8x8xf32>, vector<8x8xf32> -> vector<8x8xf32>
    %cst_335 = arith.constant dense<0xFF800000> : vector<8xf32>
    %371 = vector.multi_reduction <maximumf>, %370, %cst_335 [1] : vector<8x8xf32> to vector<8xf32>
    %372 = vector.shape_cast %371 : vector<8xf32> to vector<8x1xf32>
    %373 = vector.broadcast %372 : vector<8x1xf32> to vector<8x8xf32>
    %374 = arith.subf %370, %373 : vector<8x8xf32>
    %375 = math.exp %374 : vector<8x8xf32>
    %cst_336 = arith.constant dense<0.000000e+00> : vector<8xf32>
    %376 = vector.multi_reduction <add>, %375, %cst_336 [1] : vector<8x8xf32> to vector<8xf32>
    %377 = vector.shape_cast %376 : vector<8xf32> to vector<8x1xf32>
    %378 = vector.broadcast %377 : vector<8x1xf32> to vector<8x8xf32>
    %379 = arith.divf %375, %378 : vector<8x8xf32>
    %cst_337 = arith.constant dense<0.000000e+00> : vector<8x8xf32>
    %380 = tpu.matmul %379, %369, %cst_337 {dimension_numbers = #tpu.dot_dimension_numbers<[1], [0], [0], [1], [0, 0, 1, 1], [], []>} : vector<8x8xf32>, vector<8x8xf32>, vector<8x8xf32> -> vector<8x8xf32>
    %c1_338 = arith.constant 1 : index
    %c3_339 = arith.constant 3 : index
    %c0_340 = arith.constant 0 : index
    %c0_341 = arith.constant 0 : index
    %381 = vector.load %arg11[%c1_338, %c3_339, %c0_340, %c0_341] : memref<2x4x8x32xf32, #tpu.memory_space<vmem>>, vector<1x1x8x32xf32>
    %382 = vector.shape_cast %381 : vector<1x1x8x32xf32> to vector<8x32xf32>
    %cst_342 = arith.constant dense<0.000000e+00> : vector<8x32xf32>
    %383 = tpu.matmul %380, %382, %cst_342 {dimension_numbers = #tpu.dot_dimension_numbers<[1], [0], [0], [1], [0, 0, 1, 1], [], []>} : vector<8x8xf32>, vector<8x32xf32>, vector<8x32xf32> -> vector<8x32xf32>
    %384 = arith.addf %346, %383 : vector<8x32xf32>
    %c1_343 = arith.constant 1 : index
    %c0_344 = arith.constant 0 : index
    %c0_345 = arith.constant 0 : index
    %385 = vector.load %arg12[%c1_343, %c0_344, %c0_345] : memref<2x1x32xf32, #tpu.memory_space<vmem>>, vector<1x1x32xf32>
    %386 = vector.shape_cast %385 : vector<1x1x32xf32> to vector<1x32xf32>
    %387 = vector.broadcast %386 : vector<1x32xf32> to vector<8x32xf32>
    %388 = arith.addf %384, %387 : vector<8x32xf32>
    %389 = arith.addf %231, %388 : vector<8x32xf32>
    %c1_346 = arith.constant 1 : index
    %c0_347 = arith.constant 0 : index
    %c0_348 = arith.constant 0 : index
    %390 = vector.load %arg17[%c1_346, %c0_347, %c0_348] : memref<2x1x32xf32, #tpu.memory_space<vmem>>, vector<1x1x32xf32>
    %391 = vector.shape_cast %390 : vector<1x1x32xf32> to vector<1x32xf32>
    %c1_349 = arith.constant 1 : index
    %c0_350 = arith.constant 0 : index
    %c0_351 = arith.constant 0 : index
    %392 = vector.load %arg18[%c1_349, %c0_350, %c0_351] : memref<2x1x32xf32, #tpu.memory_space<vmem>>, vector<1x1x32xf32>
    %393 = vector.shape_cast %392 : vector<1x1x32xf32> to vector<1x32xf32>
    %cst_352 = arith.constant dense<0.000000e+00> : vector<8xf32>
    %394 = vector.multi_reduction <add>, %389, %cst_352 [1] : vector<8x32xf32> to vector<8xf32>
    %395 = vector.shape_cast %394 : vector<8xf32> to vector<8x1xf32>
    %cst_353 = arith.constant 3.200000e+01 : f32
    %396 = vector.broadcast %cst_353 : f32 to vector<8x1xf32>
    %397 = arith.divf %395, %396 : vector<8x1xf32>
    %398 = vector.broadcast %397 : vector<8x1xf32> to vector<8x32xf32>
    %399 = arith.subf %389, %398 : vector<8x32xf32>
    %400 = arith.mulf %399, %399 : vector<8x32xf32>
    %cst_354 = arith.constant dense<0.000000e+00> : vector<8xf32>
    %401 = vector.multi_reduction <add>, %400, %cst_354 [1] : vector<8x32xf32> to vector<8xf32>
    %402 = vector.shape_cast %401 : vector<8xf32> to vector<8x1xf32>
    %cst_355 = arith.constant 3.200000e+01 : f32
    %403 = vector.broadcast %cst_355 : f32 to vector<8x1xf32>
    %404 = arith.divf %402, %403 : vector<8x1xf32>
    %cst_356 = arith.constant 9.99999974E-6 : f32
    %405 = vector.broadcast %cst_356 : f32 to vector<8x1xf32>
    %406 = arith.addf %404, %405 : vector<8x1xf32>
    %407 = math.rsqrt %406 : vector<8x1xf32>
    %408 = vector.broadcast %407 : vector<8x1xf32> to vector<8x32xf32>
    %409 = arith.mulf %399, %408 : vector<8x32xf32>
    %410 = vector.broadcast %391 : vector<1x32xf32> to vector<8x32xf32>
    %411 = arith.mulf %409, %410 : vector<8x32xf32>
    %412 = vector.broadcast %393 : vector<1x32xf32> to vector<8x32xf32>
    %413 = arith.addf %411, %412 : vector<8x32xf32>
    %c1_357 = arith.constant 1 : index
    %c0_358 = arith.constant 0 : index
    %c0_359 = arith.constant 0 : index
    %414 = vector.load %arg13[%c1_357, %c0_358, %c0_359] : memref<2x32x2048xf32, #tpu.memory_space<vmem>>, vector<1x32x2048xf32>
    %415 = vector.shape_cast %414 : vector<1x32x2048xf32> to vector<32x2048xf32>
    %cst_360 = arith.constant dense<0.000000e+00> : vector<8x2048xf32>
    %416 = tpu.matmul %413, %415, %cst_360 {dimension_numbers = #tpu.dot_dimension_numbers<[1], [0], [0], [1], [0, 0, 1, 1], [], []>} : vector<8x32xf32>, vector<32x2048xf32>, vector<8x2048xf32> -> vector<8x2048xf32>
    %c1_361 = arith.constant 1 : index
    %c0_362 = arith.constant 0 : index
    %c0_363 = arith.constant 0 : index
    %417 = vector.load %arg14[%c1_361, %c0_362, %c0_363] : memref<2x1x2048xf32, #tpu.memory_space<vmem>>, vector<1x1x2048xf32>
    %418 = vector.shape_cast %417 : vector<1x1x2048xf32> to vector<1x2048xf32>
    %419 = vector.broadcast %418 : vector<1x2048xf32> to vector<8x2048xf32>
    %420 = arith.addf %416, %419 : vector<8x2048xf32>
    %cst_364 = arith.constant 0.000000e+00 : f32
    %421 = vector.broadcast %cst_364 : f32 to vector<8x2048xf32>
    %422 = arith.maximumf %420, %421 : vector<8x2048xf32>
    %c1_365 = arith.constant 1 : index
    %c0_366 = arith.constant 0 : index
    %c0_367 = arith.constant 0 : index
    %423 = vector.load %arg15[%c1_365, %c0_366, %c0_367] : memref<2x2048x32xf32, #tpu.memory_space<vmem>>, vector<1x2048x32xf32>
    %424 = vector.shape_cast %423 : vector<1x2048x32xf32> to vector<2048x32xf32>
    %cst_368 = arith.constant dense<0.000000e+00> : vector<8x32xf32>
    %425 = tpu.matmul %422, %424, %cst_368 {dimension_numbers = #tpu.dot_dimension_numbers<[1], [0], [0], [1], [0, 0, 1, 1], [], []>} : vector<8x2048xf32>, vector<2048x32xf32>, vector<8x32xf32> -> vector<8x32xf32>
    %c1_369 = arith.constant 1 : index
    %c0_370 = arith.constant 0 : index
    %c0_371 = arith.constant 0 : index
    %426 = vector.load %arg16[%c1_369, %c0_370, %c0_371] : memref<2x1x32xf32, #tpu.memory_space<vmem>>, vector<1x1x32xf32>
    %427 = vector.shape_cast %426 : vector<1x1x32xf32> to vector<1x32xf32>
    %428 = vector.broadcast %427 : vector<1x32xf32> to vector<8x32xf32>
    %429 = arith.addf %425, %428 : vector<8x32xf32>
    %430 = arith.addf %413, %429 : vector<8x32xf32>
    %c1_372 = arith.constant 1 : index
    %c0_373 = arith.constant 0 : index
    %c0_374 = arith.constant 0 : index
    %431 = vector.load %arg19[%c1_372, %c0_373, %c0_374] : memref<2x1x32xf32, #tpu.memory_space<vmem>>, vector<1x1x32xf32>
    %432 = vector.shape_cast %431 : vector<1x1x32xf32> to vector<1x32xf32>
    %c1_375 = arith.constant 1 : index
    %c0_376 = arith.constant 0 : index
    %c0_377 = arith.constant 0 : index
    %433 = vector.load %arg20[%c1_375, %c0_376, %c0_377] : memref<2x1x32xf32, #tpu.memory_space<vmem>>, vector<1x1x32xf32>
    %434 = vector.shape_cast %433 : vector<1x1x32xf32> to vector<1x32xf32>
    %cst_378 = arith.constant dense<0.000000e+00> : vector<8xf32>
    %435 = vector.multi_reduction <add>, %430, %cst_378 [1] : vector<8x32xf32> to vector<8xf32>
    %436 = vector.shape_cast %435 : vector<8xf32> to vector<8x1xf32>
    %cst_379 = arith.constant 3.200000e+01 : f32
    %437 = vector.broadcast %cst_379 : f32 to vector<8x1xf32>
    %438 = arith.divf %436, %437 : vector<8x1xf32>
    %439 = vector.broadcast %438 : vector<8x1xf32> to vector<8x32xf32>
    %440 = arith.subf %430, %439 : vector<8x32xf32>
    %441 = arith.mulf %440, %440 : vector<8x32xf32>
    %cst_380 = arith.constant dense<0.000000e+00> : vector<8xf32>
    %442 = vector.multi_reduction <add>, %441, %cst_380 [1] : vector<8x32xf32> to vector<8xf32>
    %443 = vector.shape_cast %442 : vector<8xf32> to vector<8x1xf32>
    %cst_381 = arith.constant 3.200000e+01 : f32
    %444 = vector.broadcast %cst_381 : f32 to vector<8x1xf32>
    %445 = arith.divf %443, %444 : vector<8x1xf32>
    %cst_382 = arith.constant 9.99999974E-6 : f32
    %446 = vector.broadcast %cst_382 : f32 to vector<8x1xf32>
    %447 = arith.addf %445, %446 : vector<8x1xf32>
    %448 = math.rsqrt %447 : vector<8x1xf32>
    %449 = vector.broadcast %448 : vector<8x1xf32> to vector<8x32xf32>
    %450 = arith.mulf %440, %449 : vector<8x32xf32>
    %451 = vector.broadcast %432 : vector<1x32xf32> to vector<8x32xf32>
    %452 = arith.mulf %450, %451 : vector<8x32xf32>
    %453 = vector.broadcast %434 : vector<1x32xf32> to vector<8x32xf32>
    %454 = arith.addf %452, %453 : vector<8x32xf32>
    %455 = vector.extract_strided_slice %454 {offsets = [7, 0], sizes = [1, 32], strides = [1, 1]} : vector<8x32xf32> to vector<1x32xf32>
    %c0_383 = arith.constant 0 : index
    %c0_384 = arith.constant 0 : index
    %456 = vector.load %arg21[%c0_383, %c0_384] : memref<32x4xf32, #tpu.memory_space<vmem>>, vector<32x4xf32>
    %cst_385 = arith.constant dense<0.000000e+00> : vector<1x4xf32>
    %457 = tpu.matmul %455, %456, %cst_385 {dimension_numbers = #tpu.dot_dimension_numbers<[1], [0], [0], [1], [0, 0, 1, 1], [], []>} : vector<1x32xf32>, vector<32x4xf32>, vector<1x4xf32> -> vector<1x4xf32>
    %c0_386 = arith.constant 0 : index
    %c0_387 = arith.constant 0 : index
    %458 = vector.load %arg22[%c0_386, %c0_387] : memref<1x4xf32, #tpu.memory_space<vmem>>, vector<1x4xf32>
    %459 = arith.addf %457, %458 : vector<1x4xf32>
    %c0_388 = arith.constant 0 : index
    %c0_389 = arith.constant 0 : index
    %c0_390 = arith.constant 0 : index
    %460 = vector.load %arg23[%c0_388, %c0_389, %c0_390] : memref<1x1x4xf32, #tpu.memory_space<vmem>>, vector<1x1x4xf32>
    %461 = vector.shape_cast %460 : vector<1x1x4xf32> to vector<1x4xf32>
    %462 = vector.shape_cast %459 : vector<1x4xf32> to vector<1x1x4xf32>
    tpu.vector_store %arg23[%c0_388, %c0_389, %c0_390], %462 {strides = array<i32>} : memref<1x1x4xf32, #tpu.memory_space<vmem>>, vector<1x1x4xf32>,
    return
  }
  func.func @transform_0(%arg0: i32) -> (i32, i32, i32) {
    %c0_i32 = arith.constant 0 : i32
    %c0_i32_0 = arith.constant 0 : i32
    %c0_i32_1 = arith.constant 0 : i32
    return %arg0, %c0_i32, %c0_i32_0 : i32, i32, i32
  }
  func.func @transform_1(%arg0: i32) -> (i32, i32) {
    %c0_i32 = arith.constant 0 : i32
    %c0_i32_0 = arith.constant 0 : i32
    %c0_i32_1 = arith.constant 0 : i32
    return %c0_i32, %c0_i32_0 : i32, i32
  }
  func.func @transform_2(%arg0: i32) -> (i32, i32) {
    %c0_i32 = arith.constant 0 : i32
    %c0_i32_0 = arith.constant 0 : i32
    %c0_i32_1 = arith.constant 0 : i32
    return %c0_i32, %c0_i32_0 : i32, i32
  }
  func.func @transform_3(%arg0: i32) -> (i32, i32) {
    %c0_i32 = arith.constant 0 : i32
    %c0_i32_0 = arith.constant 0 : i32
    %c0_i32_1 = arith.constant 0 : i32
    return %c0_i32, %c0_i32_0 : i32, i32
  }
  func.func @transform_4(%arg0: i32) -> (i32, i32, i32, i32) {
    %c0_i32 = arith.constant 0 : i32
    %c0_i32_0 = arith.constant 0 : i32
    %c0_i32_1 = arith.constant 0 : i32
    %c0_i32_2 = arith.constant 0 : i32
    %c0_i32_3 = arith.constant 0 : i32
    return %c0_i32, %c0_i32_0, %c0_i32_1, %c0_i32_2 : i32, i32, i32, i32
  }
  func.func @transform_5(%arg0: i32) -> (i32, i32, i32, i32) {
    %c0_i32 = arith.constant 0 : i32
    %c0_i32_0 = arith.constant 0 : i32
    %c0_i32_1 = arith.constant 0 : i32
    %c0_i32_2 = arith.constant 0 : i32
    %c0_i32_3 = arith.constant 0 : i32
    return %c0_i32, %c0_i32_0, %c0_i32_1, %c0_i32_2 : i32, i32, i32, i32
  }
  func.func @transform_6(%arg0: i32) -> (i32, i32, i32, i32) {
    %c0_i32 = arith.constant 0 : i32
    %c0_i32_0 = arith.constant 0 : i32
    %c0_i32_1 = arith.constant 0 : i32
    %c0_i32_2 = arith.constant 0 : i32
    %c0_i32_3 = arith.constant 0 : i32
    return %c0_i32, %c0_i32_0, %c0_i32_1, %c0_i32_2 : i32, i32, i32, i32
  }
  func.func @transform_7(%arg0: i32) -> (i32, i32, i32, i32) {
    %c0_i32 = arith.constant 0 : i32
    %c0_i32_0 = arith.constant 0 : i32
    %c0_i32_1 = arith.constant 0 : i32
    %c0_i32_2 = arith.constant 0 : i32
    %c0_i32_3 = arith.constant 0 : i32
    return %c0_i32, %c0_i32_0, %c0_i32_1, %c0_i32_2 : i32, i32, i32, i32
  }
  func.func @transform_8(%arg0: i32) -> (i32, i32, i32, i32) {
    %c0_i32 = arith.constant 0 : i32
    %c0_i32_0 = arith.constant 0 : i32
    %c0_i32_1 = arith.constant 0 : i32
    %c0_i32_2 = arith.constant 0 : i32
    %c0_i32_3 = arith.constant 0 : i32
    return %c0_i32, %c0_i32_0, %c0_i32_1, %c0_i32_2 : i32, i32, i32, i32
  }
  func.func @transform_9(%arg0: i32) -> (i32, i32, i32, i32) {
    %c0_i32 = arith.constant 0 : i32
    %c0_i32_0 = arith.constant 0 : i32
    %c0_i32_1 = arith.constant 0 : i32
    %c0_i32_2 = arith.constant 0 : i32
    %c0_i32_3 = arith.constant 0 : i32
    return %c0_i32, %c0_i32_0, %c0_i32_1, %c0_i32_2 : i32, i32, i32, i32
  }
  func.func @transform_10(%arg0: i32) -> (i32, i32, i32, i32) {
    %c0_i32 = arith.constant 0 : i32
    %c0_i32_0 = arith.constant 0 : i32
    %c0_i32_1 = arith.constant 0 : i32
    %c0_i32_2 = arith.constant 0 : i32
    %c0_i32_3 = arith.constant 0 : i32
    return %c0_i32, %c0_i32_0, %c0_i32_1, %c0_i32_2 : i32, i32, i32, i32
  }
  func.func @transform_11(%arg0: i32) -> (i32, i32, i32) {
    %c0_i32 = arith.constant 0 : i32
    %c0_i32_0 = arith.constant 0 : i32
    %c0_i32_1 = arith.constant 0 : i32
    %c0_i32_2 = arith.constant 0 : i32
    return %c0_i32, %c0_i32_0, %c0_i32_1 : i32, i32, i32
  }
  func.func @transform_12(%arg0: i32) -> (i32, i32, i32) {
    %c0_i32 = arith.constant 0 : i32
    %c0_i32_0 = arith.constant 0 : i32
    %c0_i32_1 = arith.constant 0 : i32
    %c0_i32_2 = arith.constant 0 : i32
    return %c0_i32, %c0_i32_0, %c0_i32_1 : i32, i32, i32
  }
  func.func @transform_13(%arg0: i32) -> (i32, i32, i32) {
    %c0_i32 = arith.constant 0 : i32
    %c0_i32_0 = arith.constant 0 : i32
    %c0_i32_1 = arith.constant 0 : i32
    %c0_i32_2 = arith.constant 0 : i32
    return %c0_i32, %c0_i32_0, %c0_i32_1 : i32, i32, i32
  }
  func.func @transform_14(%arg0: i32) -> (i32, i32, i32) {
    %c0_i32 = arith.constant 0 : i32
    %c0_i32_0 = arith.constant 0 : i32
    %c0_i32_1 = arith.constant 0 : i32
    %c0_i32_2 = arith.constant 0 : i32
    return %c0_i32, %c0_i32_0, %c0_i32_1 : i32, i32, i32
  }
  func.func @transform_15(%arg0: i32) -> (i32, i32, i32) {
    %c0_i32 = arith.constant 0 : i32
    %c0_i32_0 = arith.constant 0 : i32
    %c0_i32_1 = arith.constant 0 : i32
    %c0_i32_2 = arith.constant 0 : i32
    return %c0_i32, %c0_i32_0, %c0_i32_1 : i32, i32, i32
  }
  func.func @transform_16(%arg0: i32) -> (i32, i32, i32) {
    %c0_i32 = arith.constant 0 : i32
    %c0_i32_0 = arith.constant 0 : i32
    %c0_i32_1 = arith.constant 0 : i32
    %c0_i32_2 = arith.constant 0 : i32
    return %c0_i32, %c0_i32_0, %c0_i32_1 : i32, i32, i32
  }
  func.func @transform_17(%arg0: i32) -> (i32, i32, i32) {
    %c0_i32 = arith.constant 0 : i32
    %c0_i32_0 = arith.constant 0 : i32
    %c0_i32_1 = arith.constant 0 : i32
    %c0_i32_2 = arith.constant 0 : i32
    return %c0_i32, %c0_i32_0, %c0_i32_1 : i32, i32, i32
  }
  func.func @transform_18(%arg0: i32) -> (i32, i32, i32) {
    %c0_i32 = arith.constant 0 : i32
    %c0_i32_0 = arith.constant 0 : i32
    %c0_i32_1 = arith.constant 0 : i32
    %c0_i32_2 = arith.constant 0 : i32
    return %c0_i32, %c0_i32_0, %c0_i32_1 : i32, i32, i32
  }
  func.func @transform_19(%arg0: i32) -> (i32, i32, i32) {
    %c0_i32 = arith.constant 0 : i32
    %c0_i32_0 = arith.constant 0 : i32
    %c0_i32_1 = arith.constant 0 : i32
    %c0_i32_2 = arith.constant 0 : i32
    return %c0_i32, %c0_i32_0, %c0_i32_1 : i32, i32, i32
  }
  func.func @transform_20(%arg0: i32) -> (i32, i32) {
    %c0_i32 = arith.constant 0 : i32
    %c0_i32_0 = arith.constant 0 : i32
    %c0_i32_1 = arith.constant 0 : i32
    return %c0_i32, %c0_i32_0 : i32, i32
  }
  func.func @transform_21(%arg0: i32) -> (i32, i32) {
    %c0_i32 = arith.constant 0 : i32
    %c0_i32_0 = arith.constant 0 : i32
    %c0_i32_1 = arith.constant 0 : i32
    return %c0_i32, %c0_i32_0 : i32, i32
  }
  func.func @transform_22(%arg0: i32) -> (i32, i32, i32) {
    %c0_i32 = arith.constant 0 : i32
    %c0_i32_0 = arith.constant 0 : i32
    %c0_i32_1 = arith.constant 0 : i32
    return %arg0, %c0_i32, %c0_i32_0 : i32, i32, i32
  }
}

</mosaic_0001>

<bundles_post_ra>
// kernel: tpu_custom_call.1
= control target key start
LH: loop header
LB: loop body
LE: loop exit
PB: predicated region body
PF: predicated region fallthrough
CT: control target
= control target key end

     0   :  { %s13048_s0 = inlined_call_operand.vmem [shape: f32[2,8,30], index: 0, kind: input, shape index: {}]   ;;  %s13049_s1 = inlined_call_operand.vmem [shape: f32[8,32], index: 1, kind: input, shape index: {}]   ;;  %s13050_s2 = inlined_call_operand.vmem [shape: f32[30,32], index: 2, kind: input, shape index: {}]   ;;  %s13051_s3 = inlined_call_operand.vmem [shape: f32[1,32], index: 3, kind: input, shape index: {}]   ;;  %s13052_s4 = inlined_call_operand.vmem [shape: f32[2,4,32,8], index: 4, kind: input, shape index: {}]   ;;  %s13053_s5 = inlined_call_operand.vmem [shape: f32[2,4,1,8], index: 5, kind: input, shape index: {}]   ;;  %s13054_s6 = inlined_call_operand.vmem [shape: f32[2,4,32,8], index: 6, kind: input, shape index: {}]   ;;  %s13055_s7 = inlined_call_operand.vmem [shape: f32[2,4,1,8], index: 7, kind: input, shape index: {}]   ;;  %s13056_s8 = inlined_call_operand.vmem [shape: f32[2,4,32,8], index: 8, kind: input, shape index: {}]   ;;  %s13057_s9 = inlined_call_operand.vmem [shape: f32[2,4,1,8], index: 9, kind: input, shape index: {}]   ;;  %s13058_s10 = inlined_call_operand.vmem [shape: f32[2,4,8,32], index: 10, kind: input, shape index: {}]   ;;  %s13059_s11 = inlined_call_operand.vmem [shape: f32[2,1,32], index: 11, kind: input, shape index: {}]   ;;  %s13060_s12 = inlined_call_operand.vmem [shape: f32[2,32,2048], index: 12, kind: input, shape index: {}]   ;;  %s13061_s13 = inlined_call_operand.vmem [shape: f32[2,1,2048], index: 13, kind: input, shape index: {}]   ;;  %s13062_s14 = inlined_call_operand.vmem [shape: f32[2,2048,32], index: 14, kind: input, shape index: {}]   ;;  %s13063_s15 = inlined_call_operand.vmem [shape: f32[2,1,32], index: 15, kind: input, shape index: {}]   ;;  %s13064_s16 = inlined_call_operand.vmem [shape: f32[2,1,32], index: 16, kind: input, shape index: {}]   ;;  %s13065_s17 = inlined_call_operand.vmem [shape: f32[2,1,32], index: 17, kind: input, shape index: {}]   ;;  %s13066_s18 = inlined_call_operand.vmem [shape: f32[2,1,32], index: 18, kind: input, shape index: {}]   ;;  %s13067_s19 = inlined_call_operand.vmem [shape: f32[2,1,32], index: 19, kind: input, shape index: {}]   ;;  %s13068_s20 = inlined_call_operand.vmem [shape: f32[32,4], index: 20, kind: input, shape index: {}]   ;;  %s13069_s21 = inlined_call_operand.vmem [shape: f32[1,4], index: 21, kind: input, shape index: {}]   ;;  %s13070_s22 = inlined_call_operand.hbm [shape: f32[2,1,4], index: 22, kind: output, shape index: {}]  }
   0x1   :  { %13083 = sst [smem:[#allocation11_spill]] %s13048_s0 }
   0x2   :  { %13084 = sst [smem:[#allocation12_spill]] %s13049_s1 }
   0x3   :  { %13085 = sst [smem:[#allocation13_spill]] %s13050_s2 }
   0x4   :  { %13086 = sst [smem:[#allocation14_spill]] %s13051_s3 }
   0x5   :  { %13087 = sst [smem:[#allocation15_spill]] %s13052_s4 }
   0x6   :  { %13088 = sst [smem:[#allocation16_spill]] %s13053_s5 }
   0x7   :  { %13089 = sst [smem:[#allocation17_spill]] %s13054_s6 }
   0x8   :  { %13090 = sst [smem:[#allocation18_spill]] %s13055_s7 }
   0x9   :  { %13091 = sst [smem:[#allocation19_spill]] %s13056_s8 }
   0xa   :  { %13092 = sst [smem:[#allocation20_spill]] %s13057_s9 }
   0xb   :  { %13093 = sst [smem:[#allocation21_spill]] %s13070_s22 }
   0xc   :  { %27 = vsyncpa [#allocation3], 0 }
   0xd   :  { %29 = vsyncpa [#allocation3 + $0x1], 0  ;;  %s10031_s3 = smov 0   ;;  %s10033_s28 = smov 0  }
   0xe   :  { %s10035_s29 = smov 0   ;;  %s10037_s30 = smov 0  }
   0xf LB: > { %13094 = sst [smem:[#allocation5_spill]] %s9899_s3  ;;  %s10052_s4 = sadd.s32 4294967295, %s9911_s30   ;;  %s9911_s30 = sphi %s10037_s30, %s13118_s30   ;;  %s9907_s29 = sphi %s10035_s29, %s13120_s29   ;;  %s9903_s28 = sphi %s10033_s28, %s13122_s28   ;;  %s9899_s3 = sphi %s10031_s3, %s13121_s3  }
  0x10   : > { %13095 = sst [smem:[#allocation6_spill]] %s9907_s29  ;;  %s8066_s0 = sadd.s32 4294967294, %s9911_s30  }
  0x11   : > { %13096 = sst [smem:[#allocation7_spill]] %s9911_s30  ;;  %s10056_s23 = sadd.s32 1, %s9911_s30  }
  0x12   : > { %13097 = sst [smem:[#allocation8_spill]] %s10056_s23  ;;  %s509_s1 = sadd.s32 1, %s9907_s29 }
  0x13   : > { %s506_s5 = ssub.s32 %s9911_s30, %s10056_s23  ;;  %p519_p0 = scmp.ne.s32.totalorder %s9907_s29, %s9903_s28 }
  0x14   : > { %p507_p1 = scmp.eq.s32.totalorder %s506_s5, 0  ;;  %p520_p2 = scmp.eq.s32.totalorder %s10052_s4, 1 }
  0x15   : > { %p525_p3 = scmp.ne.s32.totalorder %s9903_s28, %s9899_s3  ;;  %p526_p4 = scmp.eq.s32.totalorder %s8066_s0, 1 }
  0x16   : > { %s10067_s24 = scalar_select %p507_p1, %s9907_s29, %s509_s1  }
  0x17   : > { %p10069_p5 = por %p520_p2, %p519_p0  ;;  %p10073_p6 = por %p526_p4, %p525_p3 }
  0x18   : > { %13098 = sst [smem:[#allocation9_spill]] %s10067_s24  ;;  %p8069_p7 = scmp.ge.s32.totalorder %s9911_s30, 1 }
  0x19   : > { %s13100_s25 = scalar_select %p10073_p6, 1, 0 }
  0x1a   : > { %p614_p8 = scmp.lt.s32.totalorder %s9911_s30, 3 }
  0x1b   : > { %13101 = sst [smem:[#allocation10_spill]] %s13100_s25 }
  0x1c   : > { %p615_p9 = pnand %p8069_p7, %p614_p8 }
  0x1d   : > { %s13102_s27 = sld [smem:[#allocation13_spill]] (!%p615_p9)  ;;  %p674_p10 = scmp.lt.s32.totalorder (!%p615_p9), %s10052_s4, 1 }
  0x1e   : > { %618 = sbr.rel (%p615_p9) target bundleno = 9917 (0x26bd), region = 108  ;;  %s13103_s29 = sld [smem:[#allocation15_spill]] (!%p615_p9) }
  0x1f   : > { %s13105_s3 = sld [smem:[#allocation11_spill]] (!%p615_p9)  ;;  %s672_s0 = sand.u32 (!%p615_p9), 1, %s9903_s28  }
  0x20   : > { %s13106_s22 = sld [smem:[#allocation17_spill]] (!%p615_p9) }
  0x21   : > { %s13109_s8 = sld [smem:[#allocation19_spill]] (!%p615_p9) }
  0x22   : > { %s13112_s7 = sld [smem:[#allocation18_spill]] (!%p615_p9) }
  0x23   : > { %v682_v0 = vld [vmem:[%s13102_s27 + $0x18] sm:$0x3f]  ;;  %vm694_vm0 = vcmask 1045504   ;;  %v9913_v1 = vmov 0.0   ;;  %v681_v2 = vld [vmem:[%s13102_s27 + $0x10] sm:$0xff]  ;;  %vm9914_vm1 = vmmov 0  }
  0x24   : > { %9364 = vmatprep.subr.mxu0 %v9913_v1  ;;  %9375 = vmatprep.subr.mxu1 %v9913_v1  ;;  %s13104_s23 = smov %s13103_s29  ;;  %v773_v3 = vld [vmem:[%s13103_s29 + $0x18] sm:$0xff]  ;;  %v680_v5 = vld [vmem:[%s13102_s27 + $0x8] sm:$0xff]  ;;  %v679_v6 = vld [vmem:[%s13102_s27] sm:$0xff]  ;;  %vm690_vm2 = vcmask 244736   ;;  %vm781_vm3 = vcmask 261120   ;;  %vm1018_vm4 = vcmask 64512  }
  0x25   : > { %9365 = vmatpush3.msk.msra.mxu0 %vm694_vm0, %v682_v0  ;;  %9372 = vmatprep.mubr.msk.f32.mxu0 %vm9914_vm1, %v9913_v1  ;;  %v772_v4 = vld [vmem:[%s13104_s23 + $0x10] sm:$0xff]  ;;  %s675_s25 = scalar_select %p674_p10, %s10052_s4, 1  ;;  %v771_v10 = vld [vmem:[%s13104_s23 + $0x8] sm:$0xff]  ;;  %v770_v12 = vld [vmem:[%s13104_s23] sm:$0xff]  ;;  %vm7996_vm5 = vcmask 24576  }
  0x26   : > { %9366 = vmatprep.subr.mxu0 %v9913_v1  ;;  %9376 = vmatpush3.msra.mxu1 %v773_v3  ;;  %v859_v8 = vld [vmem:[%s13106_s22 + $0x18] sm:$0xff]  ;;  %v858_v9 = vld [vmem:[%s13106_s22 + $0x10] sm:$0xff]  ;;  %v857_v11 = vld [vmem:[%s13106_s22 + $0x8] sm:$0xff]  ;;  %s13113_s9 = sld [smem:[#allocation20_spill]]  ;;  %s673_s29 = scalar_lea.vmem [#allocation2], %s672_s0 }
  0x27   : > { %9367 = vmatpush3.msra.mxu0 %v681_v2  ;;  %9377 = vmatprep.subr.mxu1 %v9913_v1  ;;  %s8070_s5 = sshll.u32 %s675_s25, 3  ;;  %v856_v13 = vld [vmem:[%s13106_s22] sm:$0xff]  ;;  %v940_v20 = vld [vmem:[%s13109_s8 + $0x18] sm:$0xff]  ;;  %v939_v22 = vld [vmem:[%s13109_s8 + $0x10] sm:$0xff]  ;;  %s8623_s25 = sshll.u32 %s10052_s4, 4 }
  0x28   : > { %9368 = vmatprep.subr.mxu0 %v9913_v1  ;;  %9378 = vmatpush3.msra.mxu1 %v772_v4  ;;  %s677_s30 = scalar_lea.vmem %s13105_s3, %s8070_s5  ;;  %s13107_s3 = sld [smem:[#allocation14_spill]]  ;;  %v8086_v21 = vld [vmem:[%s13104_s23 + $0x38] sm:$0xff]  ;;  %v8085_v23 = vld [vmem:[%s13104_s23 + $0x30] sm:$0xff]  ;;  %v938_v24 = vld [vmem:[%s13109_s8 + $0x8] sm:$0xff] }
  0x29   : > { %9369 = vmatpush3.msra.mxu0 %v680_v5  ;;  %9379 = vmatprep.subr.mxu1 %v9913_v1  ;;  %v678_v7 = vld [vmem:[%s677_s30] sm:$0xff]  ;;  %s13108_s5 = sld [smem:[#allocation12_spill]]  ;;  %v8084_v25 = vld [vmem:[%s13104_s23 + $0x28] sm:$0xff]  ;;  %v8100_v28 = vld [vmem:[%s13109_s8 + $0x38] sm:$0xff]  ;;  %s9915_s4 = smov [#allocation2]  }
  0x2a   : > { %9370 = vmatprep.subr.mxu0 %v9913_v1  ;;  %9383 = vmatprep.mubr.msk.f32.mxu1 %vm9914_vm1, %v9913_v1  ;;  %v937_v26 = vld [vmem:[%s13109_s8] sm:$0xff]  ;;  %v8099_v29 = vld [vmem:[%s13109_s8 + $0x30] sm:$0xff]  ;;  %v8098_v30 = vld [vmem:[%s13109_s8 + $0x28] sm:$0xff]  ;;  %s13114_s26 = sld [smem:[#allocation21_spill]]  ;;  %s9855_s1 = sshll.u32 %s9915_s4, 4  ;;  %s9856_s1 = int_to_ptr.vmem [resolvable:$false] %s9855_s1 }
  0x2b   : > { %9371 = vmatpush3.msra.mxu0 %v679_v6  ;;  %9380 = vmatpush3.msra.mxu1 %v771_v10  ;;  %v8083_v27 = vld [vmem:[%s13104_s23 + $0x20] sm:$0xff]  ;;  %v8093_v60 = vld [vmem:[%s13106_s22 + $0x38] sm:$0xff]  ;;  %v8092_v61 = vld [vmem:[%s13106_s22 + $0x30] sm:$0xff]  ;;  %s9857_s27 = scalar_lea.vmem %s9856_s1, 32 }
  0x2c   : > { %9373 = vmatmul.mubr.msk.f32.vlgmr.msra.gmra.mxu0 %vm690_vm2, %v678_v7  ;;  %9386 = vmatprep.subr.mxu0 %v9913_v1  ;;  %v8097_v31 = vld [vmem:[%s13109_s8 + $0x20] sm:$0xff]  ;;  %v8091_v62 = vld [vmem:[%s13106_s22 + $0x28] sm:$0xff] }
  0x2d   : > { %9387 = vmatpush3.msra.mxu0 %v859_v8  ;;  %9394 = vmatprep.mubr.msk.f32.mxu0 %vm9914_vm1, %v9913_v1  ;;  %v8076_v33 = vld [vmem:[%s13112_s7] ss:$0 sm:$0xff]  ;;  %v8095_v4 = vld [vmem:[%s13112_s7 + $0x1] ss:$0 sm:$0xff] }
  0x2e   : > { %9388 = vmatprep.subr.mxu0 %v9913_v1  ;;  %9381 = vmatprep.subr.mxu1 %v9913_v1  ;;  %v8071_v14 = vld [vmem:[%s13107_s3] ss:$0 sm:$0xff]  ;;  %s13110_s3 = sld [smem:[#allocation16_spill]]  ;;  %v8102_v8 = vld [vmem:[%s13113_s9 + $0x1] ss:$0 sm:$0xff] }
  0x2f   : > { %9389 = vmatpush3.msra.mxu0 %v858_v9  ;;  %9382 = vmatpush3.msra.mxu1 %v770_v12  ;;  %v768_v16 = vld [vmem:[%s13108_s5] sm:$0xff] }
  0x30   : > { %9390 = vmatprep.subr.mxu0 %v9913_v1  ;;  %9397 = vmatprep.subr.mxu1 %v9913_v1  ;;  %v8078_v41 = vld [vmem:[%s13113_s9] ss:$0 sm:$0xff]  ;;  %s13013_s2 = scalar_lea.hbm %s13114_s26, %s8623_s25 }
  0x31   : > { %9391 = vmatpush3.msra.mxu0 %v857_v11  ;;  %v8090_v63 = vld [vmem:[%s13106_s22 + $0x20] sm:$0xff] }
  0x32   : > { %9392 = vmatprep.subr.mxu0 %v9913_v1 }
  0x33   : > { %9393 = vmatpush3.msra.mxu0 %v856_v13 }
  0x34   : > { %9418 = vmatprep.subr.mxu0 %v9913_v1  ;;  %s13111_s24 = smov %s13110_s3  ;;  %v8074_v32 = vld [vmem:[%s13110_s3] ss:$0 sm:$0xff]  ;;  %s8011_s3 = sshll.u32 %s673_s29, 4  ;;  %s8012_s3 = int_to_ptr.vmem [resolvable:$true] %s8011_s3 }
  0x35   : > { %v8088_v3 = vld [vmem:[%s13111_s24 + $0x1] ss:$0 sm:$0xff]  ;;  %p9858_p0 = scmp.lt.s32.totalorder %s8012_s3, %s9856_s1 }
  0xec   : > { %v764_v15 = vpop.f32.mrf.mxu0 }
  0xed   : > { %v765_v17 = vadd.f32 %v8071_v14, %v764_v15 }
  0xee   : > { %v9374_v18 = vpop.f32.mrf.mxu0 }
  0xef   : > { %v10146_v19 = vadd.f32 %v768_v16, %v765_v17 }
  0xf1   : > { %9384 = vmatmul.mubr.msk.f32.vlgmr.msra.gmra.mxu1 %vm781_vm3, %v10146_v19  ;;  %9395 = vmatmul.mubr.msk.f32.vlgmr.msra.gmra.mxu0 %vm781_vm3, %v10146_v19 }
  0xf2   : > { %9398 = vmatpush3.msra.mxu1 %v940_v20  ;;  %9419 = vmatpush3.msra.mxu0 %v8086_v21  ;;  %v8107_v21 = vld [vmem:[%s13058_s10 + $0x8] sm:$0xff] }
  0xf3   : > { %9399 = vmatprep.subr.mxu1 %v9913_v1  ;;  %9420 = vmatprep.subr.mxu0 %v9913_v1 }
  0xf4   : > { %9400 = vmatpush3.msra.mxu1 %v939_v22  ;;  %9421 = vmatpush3.msra.mxu0 %v8085_v23 }
  0xf5   : > { %9401 = vmatprep.subr.mxu1 %v9913_v1  ;;  %9422 = vmatprep.subr.mxu0 %v9913_v1 }
  0xf6   : > { %9402 = vmatpush3.msra.mxu1 %v938_v24  ;;  %9423 = vmatpush3.msra.mxu0 %v8084_v25  ;;  %v1179_v25 = vld [vmem:[%s13058_s10] sm:$0xff] }
  0xf7   : > { %9403 = vmatprep.subr.mxu1 %v9913_v1  ;;  %9424 = vmatprep.subr.mxu0 %v9913_v1 }
  0xf8   : > { %9404 = vmatpush3.msra.mxu1 %v937_v26  ;;  %9405 = vmatprep.mubr.msk.f32.mxu1 %vm9914_vm1, %v9913_v1  ;;  %v8120_v26 = vld [vmem:[%s13106_s22 + $0x58] sm:$0xff] }
  0xf9   : > { %9425 = vmatpush3.msra.mxu0 %v8083_v27  ;;  %9426 = vmatprep.mubr.msk.f32.mxu0 %vm9914_vm1, %v9913_v1  ;;  %v8119_v27 = vld [vmem:[%s13106_s22 + $0x50] sm:$0xff] }
  0xfa   : > { %9406 = vmatmul.mubr.msk.f32.vlgmr.msra.gmra.mxu1 %vm781_vm3, %v10146_v19  ;;  %9427 = vmatmul.mubr.msk.f32.vlgmr.msra.gmra.mxu0 %vm781_vm3, %v10146_v19 }
  0xfb   : > { %9440 = vmatprep.subr.mxu0 %v9913_v1  ;;  %9448 = vmatprep.mubr.msk.f32.mxu0 %vm9914_vm1, %v9913_v1 }
  0xfc   : > { %9441 = vmatpush3.msra.mxu0 %v8100_v28  ;;  %9408 = vmatprep.subr.mxu1 %v9913_v1  ;;  %v8118_v28 = vld [vmem:[%s13106_s22 + $0x48] sm:$0xff] }
  0xfd   : > { %9442 = vmatprep.subr.mxu0 %v9913_v1  ;;  %9410 = vmatprep.mubr.msk.f32.mxu1 %vm9914_vm1, %v9913_v1 }
  0xfe   : > { %9443 = vmatpush3.msra.mxu0 %v8099_v29  ;;  %v8117_v29 = vld [vmem:[%s13106_s22 + $0x40] sm:$0xff] }
  0xff   : > { %9444 = vmatprep.subr.mxu0 %v9913_v1 }
 0x100   : > { %9445 = vmatpush3.msra.mxu0 %v8098_v30  ;;  %v8113_v30 = vld [vmem:[%s13104_s23 + $0x58] sm:$0xff] }
 0x101   : > { %9446 = vmatprep.subr.mxu0 %v9913_v1 }
 0x102   : > { %9447 = vmatpush3.msra.mxu0 %v8097_v31 }
 0x103   : > { %9449 = vmatmul.mubr.msk.f32.vlgmr.msra.gmra.mxu0 %vm781_vm3, %v10146_v19  ;;  %9461 = vmatprep.subr.mxu0 %v9913_v1 }
 0x104   : > { %9463 = vmatprep.mubr.msk.f32.mxu0 %vm9914_vm1, %v9913_v1  ;;  %9462 = vmatpush3.msra.mxu0 %v8107_v21 }
 0x105   : > { %9471 = vmatprep.subr.mxu0 %v9913_v1 }
 0x1b1   : > { %v851_v34 = vpop.f32.mrf.mxu1  ;;  %v933_v35 = vpop.f32.mrf.mxu0 }
 0x1b2   : > { %v852_v36 = vadd.f32 %v8074_v32, %v851_v34  ;;  %v934_v37 = vadd.f32 %v8076_v33, %v933_v35  ;;  %v8112_v32 = vld [vmem:[%s13104_s23 + $0x50] sm:$0xff]  ;;  %v8111_v34 = vld [vmem:[%s13104_s23 + $0x48] sm:$0xff] }
 0x1b3   : > { %v9385_v38 = vpop.f32.mrf.mxu1  ;;  %v9396_v39 = vpop.f32.mrf.mxu0 }
 0x1b4   : > { %v855_v40 = vmul.f32 0.35355338, %v852_v36  ;;  %9409 = vmatpush3.xpose.msk.msra.mxu1 %vm1018_vm4, %v934_v37  ;;  %v8110_v36 = vld [vmem:[%s13104_s23 + $0x40] sm:$0xff]  ;;  %v8127_v38 = vld [vmem:[%s13109_s8 + $0x58] sm:$0xff]  ;;  %v8126_v39 = vld [vmem:[%s13109_s8 + $0x50] sm:$0xff] }
 0x1b5   : > { %9413 = vmatprep.subr.mxu1 %v9913_v1 }
 0x1b7   : > { %9411 = vmatmul.mubr.msk.f32.vlgmr.msra.gmra.mxu1 %vm1018_vm4, %v855_v40  ;;  %v8122_v40 = vld [vmem:[%s13112_s7 + $0x2] ss:$0 sm:$0xff] }
 0x1b8   : > { %9415 = vmatprep.mubr.msk.f32.mxu1 %vm9914_vm1, %v9913_v1 }
 0x1ba   : > { %v1014_v42 = vpop.f32.mrf.mxu1  ;;  %v1259_v43 = vpop.f32.mrf.mxu0 }
 0x1bb   : > { %v1015_v44 = vadd.f32 %v8078_v41, %v1014_v42  ;;  %v1260_v5 = vadd.f32 %v8088_v3, %v1259_v43  ;;  %v8125_v41 = vld [vmem:[%s13109_s8 + $0x48] sm:$0xff] }
 0x1bc   : > { %v9407_v45 = vpop.f32.mrf.mxu1  ;;  %v9428_v46 = vpop.f32.mrf.mxu0 }
 0x1bd   : > { %9414 = vmatpush3.msra.mxu1 %v1015_v44  ;;  %v1263_v10 = vmul.f32 0.35355338, %v1260_v5  ;;  %v8124_v44 = vld [vmem:[%s13109_s8 + $0x40] sm:$0xff] }
 0x1be   : > { %9429 = vmatprep.subr.mxu1 %v9913_v1 }
 0x1c3   : > { %v1426_v47 = vpop.f32.mrf.mxu0 }
 0x1c4   : > { %v1427_v11 = vadd.f32 %v8102_v8, %v1426_v47  ;;  %v8137_v8 = vld [vmem:[%s13104_s23 + $0x68] sm:$0xff] }
 0x1c5   : > { %v9450_v48 = vpop.f32.mrf.mxu0 }
 0x1c6   : > { %v8115_v48 = vld [vmem:[%s13111_s24 + $0x2] ss:$0 sm:$0xff] }
 0x277   : > { %v1091_v49 = vpop.f32.mrf.mxu1 }
 0x278   : > { %v1095_v50 = vsel %vm1018_vm4, %v1091_v49, -inf }
 0x279   : > { %1096 = vmax.xlane.f32.xlu0 %v1095_v50  ;;  %v9412_v51 = vpop.f32.mrf.mxu1 }
 0x302   : > { %v1097_v52 = vpop.xlane.xlu0 %1096 }
 0x303   : > { %v1098_v53 = vsub.f32 %v1091_v49, %v1097_v52 }
 0x305   : > { %v1099_v54 = vmul.f32 1.442695, %v1098_v53  ;;  %v8129_v53 = vld [vmem:[%s13113_s9 + $0x2] ss:$0 sm:$0xff] }
 0x307   : > { %9811 = vpow2.f32 %v1099_v54 }
 0x314   : > { %v9812_v55 = vpop.eup %9811 }
 0x315   : > { %v1101_v56 = vsel %vm1018_vm4, %v9812_v55, 0.0 }
 0x316   : > { %1102 = vadd.xlane.f32.xlu0 %v1101_v56 }
 0x39f   : > { %v1103_v57 = vpop.xlane.xlu0 %1102 }
 0x3a0   : > { %9813 = vrcp.f32 %v1103_v57 }
 0x3ad   : > { %v9814_v58 = vpop.eup %9813 }
 0x3ae   : > { %v1105_v59 = vmul.f32 %v9814_v58, %v9812_v55 }
 0x3b0   : > { %9416 = vmatmul.mubr.msk.f32.vlgmr.msra.gmra.mxu1 %vm1018_vm4, %v1105_v59 }
 0x3b1   : > { %9430 = vmatpush3.msra.mxu1 %v8093_v60  ;;  %9437 = vmatprep.mubr.msk.f32.mxu1 %vm9914_vm1, %v9913_v1 }
 0x3b2   : > { %9431 = vmatprep.subr.mxu1 %v9913_v1 }
 0x3b3   : > { %9432 = vmatpush3.msra.mxu1 %v8092_v61 }
 0x3b4   : > { %9433 = vmatprep.subr.mxu1 %v9913_v1 }
 0x3b5   : > { %9434 = vmatpush3.msra.mxu1 %v8091_v62 }
 0x3b6   : > { %9435 = vmatprep.subr.mxu1 %v9913_v1 }
 0x3b7   : > { %9436 = vmatpush3.msra.mxu1 %v8090_v63 }
 0x3b8   : > { %9438 = vmatmul.mubr.msk.f32.vlgmr.msra.gmra.mxu1 %vm781_vm3, %v10146_v19  ;;  %9451 = vmatprep.subr.mxu1 %v9913_v1 }
 0x3b9   : > { %9453 = vmatprep.mubr.msk.f32.mxu1 %vm9914_vm1, %v9913_v1 }
 0x470   : > { %v1175_v0 = vpop.f32.mrf.mxu1 }
 0x472   : > { %v9417_v2 = vpop.f32.mrf.mxu1 }
 0x473   : > { %v8134_v2 = vld [vmem:[%s13058_s10 + $0x10] sm:$0xff] }
 0x478   : > { %v1343_v6 = vpop.f32.mrf.mxu1 }
 0x479   : > { %v1344_v7 = vadd.f32 %v8095_v4, %v1343_v6  ;;  %v8139_v6 = vld [vmem:[%s13104_s23 + $0x78] sm:$0xff] }
 0x47a   : > { %v9439_v9 = vpop.f32.mrf.mxu1 }
 0x47b   : > { %9452 = vmatpush3.xpose.msk.msra.mxu1 %vm1018_vm4, %v1344_v7  ;;  %v8138_v7 = vld [vmem:[%s13104_s23 + $0x70] sm:$0xff]  ;;  %v8136_v9 = vld [vmem:[%s13104_s23 + $0x60] sm:$0xff] }
 0x47c   : > { %9456 = vmatprep.subr.mxu1 %v9913_v1 }
 0x47e   : > { %9454 = vmatmul.mubr.msk.f32.vlgmr.msra.gmra.mxu1 %vm1018_vm4, %v1263_v10  ;;  %v8153_v10 = vld [vmem:[%s13109_s8 + $0x78] sm:$0xff] }
 0x47f   : > { %9457 = vmatpush3.msra.mxu1 %v1427_v11  ;;  %9458 = vmatprep.mubr.msk.f32.mxu1 %vm9914_vm1, %v9913_v1  ;;  %v8152_v11 = vld [vmem:[%s13109_s8 + $0x70] sm:$0xff] }
 0x480   : > { %9466 = vmatprep.subr.mxu1 %v9913_v1 }
 0x53e   : > { %v1502_v12 = vpop.f32.mrf.mxu1 }
 0x53f   : > { %v1506_v13 = vsel %vm1018_vm4, %v1502_v12, -inf }
 0x540   : > { %1507 = vmax.xlane.f32.xlu1 %v1506_v13  ;;  %v9455_v14 = vpop.f32.mrf.mxu1  ;;  %v8150_v13 = vld [vmem:[%s13109_s8 + $0x60] sm:$0xff] }
 0x541   : > { %v8146_v14 = vld [vmem:[%s13106_s22 + $0x78] sm:$0xff] }
 0x5c9   : > { %v1508_v15 = vpop.xlane.xlu1 %1507 }
 0x5ca   : > { %v1509_v16 = vsub.f32 %v1502_v12, %v1508_v15  ;;  %v8151_v12 = vld [vmem:[%s13109_s8 + $0x68] sm:$0xff] }
 0x5cc   : > { %v1510_v17 = vmul.f32 1.442695, %v1509_v16  ;;  %v8145_v16 = vld [vmem:[%s13106_s22 + $0x70] sm:$0xff] }
 0x5ce   : > { %9815 = vpow2.f32 %v1510_v17 }
 0x5db   : > { %v9816_v18 = vpop.eup %9815 }
 0x5dc   : > { %v1512_v20 = vsel %vm1018_vm4, %v9816_v18, 0.0 }
 0x5dd   : > { %1513 = vadd.xlane.f32.xlu1 %v1512_v20  ;;  %v8143_v20 = vld [vmem:[%s13106_s22 + $0x60] sm:$0xff] }
 0x666   : > { %v1514_v22 = vpop.xlane.xlu1 %1513 }
 0x667   : > { %9817 = vrcp.f32 %v1514_v22 }
 0x674   : > { %v9818_v23 = vpop.eup %9817 }
 0x675   : > { %v1516_v24 = vmul.f32 %v9818_v23, %v9816_v18  ;;  %v8144_v18 = vld [vmem:[%s13106_s22 + $0x68] sm:$0xff] }
 0x677   : > { %9459 = vmatmul.mubr.msk.f32.vlgmr.msra.gmra.mxu1 %vm1018_vm4, %v1516_v24 }
 0x678   : > { %9467 = vmatpush3.msra.mxu1 %v1179_v25  ;;  %9468 = vmatprep.mubr.msk.f32.mxu1 %vm9914_vm1, %v9913_v1 }
 0x679   : > { %9482 = vmatprep.subr.mxu1 %v9913_v1 }
 0x67b   : > { %9469 = vmatmul.mubr.msk.f32.vlgmr.msra.gmra.mxu1 %vm1018_vm4, %v1175_v0 }
 0x67c   : > { %9483 = vmatpush3.msra.mxu1 %v8120_v26  ;;  %9490 = vmatprep.mubr.msk.f32.mxu1 %vm9914_vm1, %v9913_v1 }
 0x67d   : > { %9484 = vmatprep.subr.mxu1 %v9913_v1 }
 0x67e   : > { %9485 = vmatpush3.msra.mxu1 %v8119_v27 }
 0x67f   : > { %9486 = vmatprep.subr.mxu1 %v9913_v1 }
 0x680   : > { %9487 = vmatpush3.msra.mxu1 %v8118_v28 }
 0x681   : > { %9488 = vmatprep.subr.mxu1 %v9913_v1 }
 0x682   : > { %9489 = vmatpush3.msra.mxu1 %v8117_v29  ;;  %v8141_v29 = vld [vmem:[%s13111_s24 + $0x3] ss:$0 sm:$0xff] }
 0x683   : > { %9491 = vmatmul.mubr.msk.f32.vlgmr.msra.gmra.mxu1 %vm781_vm3, %v10146_v19  ;;  %9504 = vmatprep.subr.mxu1 %v9913_v1 }
 0x684   : > { %9506 = vmatprep.mubr.msk.f32.mxu1 %vm9914_vm1, %v9913_v1 }
 0x737   : > { %v1586_v31 = vpop.f32.mrf.mxu1 }
 0x738   : > { %9464 = vmatmul.mubr.msk.f32.vlgmr.msra.gmra.mxu0 %vm1018_vm4, %v1586_v31 }
 0x739   : > { %9472 = vmatpush3.msra.mxu0 %v8113_v30  ;;  %v9460_v33 = vpop.f32.mrf.mxu1  ;;  %9479 = vmatprep.mubr.msk.f32.mxu0 %vm9914_vm1, %v9913_v1  ;;  %v8148_v30 = vld [vmem:[%s13112_s7 + $0x3] ss:$0 sm:$0xff] }
 0x73a   : > { %9473 = vmatprep.subr.mxu0 %v9913_v1 }
 0x73b   : > { %9474 = vmatpush3.msra.mxu0 %v8112_v32  ;;  %v10320_v35 = vpop.f32.mrf.mxu1 }
 0x73c   : > { %9475 = vmatprep.subr.mxu0 %v9913_v1 }
 0x73d   : > { %9476 = vmatpush3.msra.mxu0 %v8111_v34  ;;  %v9470_v37 = vpop.f32.mrf.mxu1  ;;  %v8155_v34 = vld [vmem:[%s13113_s9 + $0x3] ss:$0 sm:$0xff] }
 0x73e   : > { %9477 = vmatprep.subr.mxu0 %v9913_v1 }
 0x73f   : > { %9478 = vmatpush3.msra.mxu0 %v8110_v36 }
 0x740   : > { %9480 = vmatmul.mubr.msk.f32.vlgmr.msra.gmra.mxu0 %vm781_vm3, %v10146_v19  ;;  %9493 = vmatprep.subr.mxu0 %v9913_v1 }
 0x741   : > { %9494 = vmatpush3.msra.mxu0 %v8127_v38  ;;  %9501 = vmatprep.mubr.msk.f32.mxu0 %vm9914_vm1, %v9913_v1 }
 0x742   : > { %9495 = vmatprep.subr.mxu0 %v9913_v1 }
 0x743   : > { %v1901_v42 = vpop.f32.mrf.mxu1  ;;  %9496 = vmatpush3.msra.mxu0 %v8126_v39 }
 0x744   : > { %v1902_v43 = vadd.f32 %v8122_v40, %v1901_v42  ;;  %9497 = vmatprep.subr.mxu0 %v9913_v1 }
 0x745   : > { %v9492_v45 = vpop.f32.mrf.mxu1  ;;  %9498 = vmatpush3.msra.mxu0 %v8125_v41 }
 0x746   : > { %9499 = vmatprep.subr.mxu0 %v9913_v1  ;;  %9505 = vmatpush3.xpose.msk.msra.mxu1 %vm1018_vm4, %v1902_v43 }
 0x747   : > { %9500 = vmatpush3.msra.mxu0 %v8124_v44  ;;  %9509 = vmatprep.subr.mxu1 %v9913_v1 }
 0x748   : > { %9502 = vmatmul.mubr.msk.f32.vlgmr.msra.gmra.mxu0 %vm781_vm3, %v10146_v19  ;;  %9514 = vmatprep.subr.mxu0 %v9913_v1 }
 0x749   : > { %9516 = vmatprep.mubr.msk.f32.mxu0 %vm9914_vm1, %v9913_v1  ;;  %9515 = vmatpush3.msra.mxu0 %v8134_v2  ;;  %v2800_v2 = vld [vmem:[%s13060_s12 + $0x198] sm:$0xff] }
 0x74a   : > { %9530 = vmatprep.subr.mxu0 %v9913_v1 }
 0x7f8   : > { %v10357_v46 = vpop.f32.mrf.mxu0 }
 0x7f9   : > { %v1735_v25 = vadd.f32 %v10320_v35, %v10357_v46  ;;  %v8160_v46 = vld [vmem:[%s13058_s10 + $0x18] sm:$0xff] }
 0x7fa   : > { %v9465_v47 = vpop.f32.mrf.mxu0 }
 0x800   : > { %v1817_v49 = vpop.f32.mrf.mxu0 }
 0x801   : > { %v1818_v50 = vadd.f32 %v8115_v48, %v1817_v49 }
 0x802   : > { %v9481_v51 = vpop.f32.mrf.mxu0 }
 0x803   : > { %v1821_v52 = vmul.f32 0.35355338, %v1818_v50 }
 0x805   : > { %9507 = vmatmul.mubr.msk.f32.vlgmr.msra.gmra.mxu1 %vm1018_vm4, %v1821_v52 }
 0x806   : > { %9511 = vmatprep.mubr.msk.f32.mxu1 %vm9914_vm1, %v9913_v1 }
 0x808   : > { %v1984_v54 = vpop.f32.mrf.mxu0 }
 0x809   : > { %v1985_v55 = vadd.f32 %v8129_v53, %v1984_v54  ;;  %v8162_v53 = vld [vmem:[%s13059_s11] ss:$0 sm:$0xff] }
 0x80a   : > { %v9503_v56 = vpop.f32.mrf.mxu0 }
 0x80b   : > { %9510 = vmatpush3.msra.mxu1 %v1985_v55 }
 0x80c   : > { %9519 = vmatprep.subr.mxu1 %v9913_v1 }
 0x8c5   : > { %v2060_v57 = vpop.f32.mrf.mxu1 }
 0x8c6   : > { %v2064_v58 = vsel %vm1018_vm4, %v2060_v57, -inf }
 0x8c7   : > { %2065 = vmax.xlane.f32.xlu0 %v2064_v58  ;;  %v9508_v59 = vpop.f32.mrf.mxu1 }
 0x950   : > { %v2066_v60 = vpop.xlane.xlu0 %2065 }
 0x951   : > { %v2067_v61 = vsub.f32 %v2060_v57, %v2066_v60 }
 0x953   : > { %v2068_v62 = vmul.f32 1.442695, %v2067_v61 }
 0x955   : > { %9819 = vpow2.f32 %v2068_v62 }
 0x962   : > { %v9820_v63 = vpop.eup %9819 }
 0x963   : > { %v2070_v0 = vsel %vm1018_vm4, %v9820_v63, 0.0 }
 0x964   : > { %2071 = vadd.xlane.f32.xlu1 %v2070_v0  ;;  %v2798_v0 = vld [vmem:[%s13060_s12 + $0x188] sm:$0xff] }
 0x9ed   : > { %v2072_v3 = vpop.xlane.xlu1 %2071 }
 0x9ee   : > { %9821 = vrcp.f32 %v2072_v3  ;;  %v2799_v3 = vld [vmem:[%s13060_s12 + $0x190] sm:$0xff] }
 0x9fb   : > { %v9822_v4 = vpop.eup %9821 }
 0x9fc   : > { %v2074_v5 = vmul.f32 %v9822_v4, %v9820_v63  ;;  %v2782_v4 = vld [vmem:[%s13060_s12 + $0x108] sm:$0xff] }
 0x9fe   : > { %9512 = vmatmul.mubr.msk.f32.vlgmr.msra.gmra.mxu1 %vm1018_vm4, %v2074_v5  ;;  %v2784_v5 = vld [vmem:[%s13060_s12 + $0x118] sm:$0xff] }
 0x9ff   : > { %9520 = vmatpush3.msra.mxu1 %v8139_v6  ;;  %9527 = vmatprep.mubr.msk.f32.mxu1 %vm9914_vm1, %v9913_v1  ;;  %v2781_v6 = vld [vmem:[%s13060_s12 + $0x100] sm:$0xff] }
 0xa00   : > { %9521 = vmatprep.subr.mxu1 %v9913_v1 }
 0xa01   : > { %9522 = vmatpush3.msra.mxu1 %v8138_v7  ;;  %v2783_v7 = vld [vmem:[%s13060_s12 + $0x110] sm:$0xff] }
 0xa02   : > { %9523 = vmatprep.subr.mxu1 %v9913_v1 }
 0xa03   : > { %9524 = vmatpush3.msra.mxu1 %v8137_v8  ;;  %v2766_v8 = vld [vmem:[%s13060_s12 + $0x88] sm:$0xff] }
 0xa04   : > { %9525 = vmatprep.subr.mxu1 %v9913_v1 }
 0xa05   : > { %9526 = vmatpush3.msra.mxu1 %v8136_v9  ;;  %v2768_v9 = vld [vmem:[%s13060_s12 + $0x98] sm:$0xff] }
 0xa06   : > { %9528 = vmatmul.mubr.msk.f32.vlgmr.msra.gmra.mxu1 %vm781_vm3, %v10146_v19  ;;  %9541 = vmatprep.subr.mxu1 %v9913_v1 }
 0xa07   : > { %9542 = vmatpush3.msra.mxu1 %v8153_v10  ;;  %9549 = vmatprep.mubr.msk.f32.mxu1 %vm9914_vm1, %v9913_v1  ;;  %v2765_v10 = vld [vmem:[%s13060_s12 + $0x80] sm:$0xff] }
 0xa08   : > { %9543 = vmatprep.subr.mxu1 %v9913_v1 }
 0xa09   : > { %9544 = vmatpush3.msra.mxu1 %v8152_v11  ;;  %v2767_v11 = vld [vmem:[%s13060_s12 + $0x90] sm:$0xff] }
 0xa0a   : > { %9545 = vmatprep.subr.mxu1 %v9913_v1 }
 0xa0b   : > { %9546 = vmatpush3.msra.mxu1 %v8151_v12  ;;  %v2750_v12 = vld [vmem:[%s13060_s12 + $0x8] sm:$0xff] }
 0xa0c   : > { %9547 = vmatprep.subr.mxu1 %v9913_v1 }
 0xa0d   : > { %9548 = vmatpush3.msra.mxu1 %v8150_v13  ;;  %v2752_v13 = vld [vmem:[%s13060_s12 + $0x18] sm:$0xff] }
 0xa0e   : > { %9550 = vmatmul.mubr.msk.f32.vlgmr.msra.gmra.mxu1 %vm781_vm3, %v10146_v19  ;;  %9562 = vmatprep.subr.mxu1 %v9913_v1 }
 0xa0f   : > { %9564 = vmatprep.mubr.msk.f32.mxu1 %vm9914_vm1, %v9913_v1  ;;  %9563 = vmatpush3.msra.mxu1 %v8160_v46  ;;  %v2790_v46 = vld [vmem:[%s13060_s12 + $0x148] sm:$0xff] }
 0xa10   : > { %2995 = vmatprep.subr.mxu1 %v2800_v2  ;;  %v2795_v2 = vld [vmem:[%s13060_s12 + $0x170] sm:$0xff] }
 0xabe   : > { %v2144_v15 = vpop.f32.mrf.mxu1 }
 0xabf   : > { %9517 = vmatmul.mubr.msk.f32.vlgmr.msra.gmra.mxu0 %vm1018_vm4, %v2144_v15  ;;  %v2751_v15 = vld [vmem:[%s13060_s12 + $0x10] sm:$0xff] }
 0xac0   : > { %9531 = vmatpush3.msra.mxu0 %v8146_v14  ;;  %v9513_v17 = vpop.f32.mrf.mxu1  ;;  %9538 = vmatprep.mubr.msk.f32.mxu0 %vm9914_vm1, %v9913_v1  ;;  %v2749_v14 = vld [vmem:[%s13060_s12] sm:$0xff] }
 0xac1   : > { %9532 = vmatprep.subr.mxu0 %v9913_v1  ;;  %v2804_v17 = vld [vmem:[%s13060_s12 + $0x1b8] sm:$0xff] }
 0xac2   : > { %9533 = vmatpush3.msra.mxu0 %v8145_v16  ;;  %v2802_v16 = vld [vmem:[%s13060_s12 + $0x1a8] sm:$0xff] }
 0xac3   : > { %9534 = vmatprep.subr.mxu0 %v9913_v1 }
 0xac4   : > { %9535 = vmatpush3.msra.mxu0 %v8144_v18 }
 0xac5   : > { %9536 = vmatprep.subr.mxu0 %v9913_v1 }
 0xac6   : > { %v2303_v21 = vpop.f32.mrf.mxu1  ;;  %9537 = vmatpush3.msra.mxu0 %v8143_v20 }
 0xac7   : > { %9539 = vmatmul.mubr.msk.f32.vlgmr.msra.gmra.mxu0 %vm781_vm3, %v10146_v19  ;;  %9552 = vmatprep.subr.mxu0 %v9913_v1  ;;  %v2304_v31 = vadd.f32 %v8141_v29, %v2303_v21  ;;  %v2803_v29 = vld [vmem:[%s13060_s12 + $0x1b0] sm:$0xff] }
 0xac8   : > { %v9529_v22 = vpop.f32.mrf.mxu1  ;;  %9554 = vmatprep.mubr.msk.f32.mxu0 %vm9914_vm1, %v9913_v1 }
 0xac9   : > { %v2307_v35 = vmul.f32 0.35355338, %v2304_v31  ;;  %v2788_v31 = vld [vmem:[%s13060_s12 + $0x138] sm:$0xff] }
 0xace   : > { %v2470_v23 = vpop.f32.mrf.mxu1 }
 0xacf   : > { %v2471_v37 = vadd.f32 %v8155_v34, %v2470_v23  ;;  %v8163_v23 = vld [vmem:[%s13064_s16] ss:$0 sm:$0xff]  ;;  %v2770_v34 = vld [vmem:[%s13060_s12 + $0xa8] sm:$0xff] }
 0xad0   : > { %v9551_v24 = vpop.f32.mrf.mxu1 }
 0xb7f   : > { %v2219_v26 = vpop.f32.mrf.mxu0 }
 0xb80   : > { %v2223_v27 = vadd.f32 %v2219_v26, %v1735_v25  ;;  %v8164_v25 = vld [vmem:[%s13065_s17] ss:$0 sm:$0xff] }
 0xb81   : > { %v9518_v28 = vpop.f32.mrf.mxu0 }
 0xb82   : > { %v2801_v28 = vld [vmem:[%s13060_s12 + $0x1a0] sm:$0xff] }
 0xb87   : > { %v2387_v32 = vpop.f32.mrf.mxu0 }
 0xb88   : > { %v2388_v33 = vadd.f32 %v8148_v30, %v2387_v32  ;;  %v2786_v30 = vld [vmem:[%s13060_s12 + $0x128] sm:$0xff]  ;;  %v2785_v32 = vld [vmem:[%s13060_s12 + $0x120] sm:$0xff] }
 0xb89   : > { %v9540_v36 = vpop.f32.mrf.mxu0 }
 0xb8a   : > { %9553 = vmatpush3.xpose.msk.msra.mxu0 %vm1018_vm4, %v2388_v33  ;;  %v2787_v33 = vld [vmem:[%s13060_s12 + $0x130] sm:$0xff]  ;;  %v2772_v36 = vld [vmem:[%s13060_s12 + $0xb8] sm:$0xff] }
 0xb8b   : > { %9557 = vmatprep.subr.mxu0 %v9913_v1 }
 0xb8d   : > { %9555 = vmatmul.mubr.msk.f32.vlgmr.msra.gmra.mxu0 %vm1018_vm4, %v2307_v35  ;;  %v2769_v35 = vld [vmem:[%s13060_s12 + $0xa0] sm:$0xff] }
 0xb8e   : > { %9558 = vmatpush3.msra.mxu0 %v2471_v37  ;;  %9559 = vmatprep.mubr.msk.f32.mxu0 %vm9914_vm1, %v9913_v1  ;;  %v2771_v37 = vld [vmem:[%s13060_s12 + $0xb0] sm:$0xff] }
 0xb8f   : > { %2924 = vmatprep.subr.mxu0 %v2798_v0  ;;  %v2793_v0 = vld [vmem:[%s13060_s12 + $0x160] sm:$0xff] }
 0xc4d   : > { %v2546_v38 = vpop.f32.mrf.mxu0 }
 0xc4e   : > { %v2550_v39 = vsel %vm1018_vm4, %v2546_v38, -inf }
 0xc4f   : > { %2551 = vmax.xlane.f32.xlu0 %v2550_v39  ;;  %v9556_v40 = vpop.f32.mrf.mxu0  ;;  %v2756_v39 = vld [vmem:[%s13060_s12 + $0x38] sm:$0xff] }
 0xc50   : > { %v2753_v40 = vld [vmem:[%s13060_s12 + $0x20] sm:$0xff] }
 0xcd8   : > { %v2552_v41 = vpop.xlane.xlu0 %2551 }
 0xcd9   : > { %v2553_v42 = vsub.f32 %v2546_v38, %v2552_v41  ;;  %v2754_v38 = vld [vmem:[%s13060_s12 + $0x28] sm:$0xff]  ;;  %v2755_v41 = vld [vmem:[%s13060_s12 + $0x30] sm:$0xff] }
 0xcdb   : > { %v2554_v43 = vmul.f32 1.442695, %v2553_v42  ;;  %v2806_v42 = vld [vmem:[%s13060_s12 + $0x1c8] sm:$0xff] }
 0xcdd   : > { %9823 = vpow2.f32 %v2554_v43  ;;  %v2808_v43 = vld [vmem:[%s13060_s12 + $0x1d8] sm:$0xff] }
 0xcea   : > { %v9824_v44 = vpop.eup %9823 }
 0xceb   : > { %v2556_v45 = vsel %vm1018_vm4, %v9824_v44, 0.0 }
 0xcec   : > { %2557 = vadd.xlane.f32.xlu1 %v2556_v45  ;;  %v2807_v45 = vld [vmem:[%s13060_s12 + $0x1d0] sm:$0xff] }
 0xd75   : > { %v2558_v47 = vpop.xlane.xlu1 %2557 }
 0xd76   : > { %9825 = vrcp.f32 %v2558_v47  ;;  %v2792_v47 = vld [vmem:[%s13060_s12 + $0x158] sm:$0xff] }
 0xd83   : > { %v9826_v48 = vpop.eup %9825 }
 0xd84   : > { %v2560_v49 = vmul.f32 %v9826_v48, %v9824_v44  ;;  %v2805_v44 = vld [vmem:[%s13060_s12 + $0x1c0] sm:$0xff] }
 0xd85   : > { %v2789_v48 = vld [vmem:[%s13060_s12 + $0x140] sm:$0xff] }
 0xd86   : > { %9560 = vmatmul.mubr.msk.f32.vlgmr.msra.gmra.mxu0 %vm1018_vm4, %v2560_v49  ;;  %v2791_v49 = vld [vmem:[%s13060_s12 + $0x150] sm:$0xff] }
 0xd87   : > { %2964 = vmatprep.mubr.f32.mxu0 %v9913_v1 }
 0xe46   : > { %v2630_v50 = vpop.f32.mrf.mxu0 }
 0xe47   : > { %9565 = vmatmul.mubr.msk.f32.vlgmr.msra.gmra.mxu1 %vm1018_vm4, %v2630_v50  ;;  %v2774_v50 = vld [vmem:[%s13060_s12 + $0xc8] sm:$0xff] }
 0xe48   : > { %v9561_v51 = vpop.f32.mrf.mxu0  ;;  %3035 = vmatprep.mubr.f32.mxu1 %v9913_v1  ;;  %2996 = vmatpush1.msra.mxu1 %v2799_v3  ;;  %v2780_v3 = vld [vmem:[%s13060_s12 + $0xf8] sm:$0xff] }
 0xe49   : > { %2997 = vmatprep.subr.mxu1 %v2784_v5  ;;  %v2776_v51 = vld [vmem:[%s13060_s12 + $0xd8] sm:$0xff]  ;;  %v2779_v5 = vld [vmem:[%s13060_s12 + $0xf0] sm:$0xff] }
 0xe4a   : > { %2998 = vmatpush1.msra.mxu1 %v2783_v7  ;;  %v2764_v7 = vld [vmem:[%s13060_s12 + $0x78] sm:$0xff] }
 0xe4b   : > { %2999 = vmatprep.subr.mxu1 %v2768_v9  ;;  %v2763_v9 = vld [vmem:[%s13060_s12 + $0x70] sm:$0xff] }
 0xe4c   : > { %3000 = vmatpush1.msra.mxu1 %v2767_v11  ;;  %v3547_v11 = vld [vmem:[%s13062_s14 + $0x1f8] sm:$0xff] }
 0xe4d   : > { %3001 = vmatprep.subr.mxu1 %v2752_v13  ;;  %v3531_v13 = vld [vmem:[%s13062_s14 + $0x178] sm:$0xff] }
 0xe4e   : > { %3002 = vmatpush1.msra.mxu1 %v2751_v15  ;;  %v3546_v15 = vld [vmem:[%s13062_s14 + $0x1f0] sm:$0xff] }
 0xe4f   : > { %3137 = vmatprep.subr.mxu1 %v2804_v17  ;;  %v3530_v17 = vld [vmem:[%s13062_s14 + $0x170] sm:$0xff] }
 0xf07   : > { %v2705_v52 = vpop.f32.mrf.mxu1 }
 0xf08   : > { %v2709_v54 = vadd.f32 %v2705_v52, %v2223_v27  ;;  %v2773_v52 = vld [vmem:[%s13060_s12 + $0xc0] sm:$0xff] }
 0xf09   : > { %v9566_v55 = vpop.f32.mrf.mxu1 }
 0xf0a   : > { %v2717_v56 = vadd.f32 %v8162_v53, %v2709_v54  ;;  %v2775_v53 = vld [vmem:[%s13060_s12 + $0xd0] sm:$0xff]  ;;  %v2758_v54 = vld [vmem:[%s13060_s12 + $0x48] sm:$0xff]  ;;  %v2760_v55 = vld [vmem:[%s13060_s12 + $0x58] sm:$0xff] }
 0xf0c   : > { %v2718_v57 = vadd.f32 %v2717_v56, %v10146_v19  ;;  %v2797_v19 = vld [vmem:[%s13060_s12 + $0x180] sm:$0xff] }
 0xf0d   : > { %2925 = vmatpush1.msra.mxu0 %v2797_v19  ;;  %v2757_v56 = vld [vmem:[%s13060_s12 + $0x40] sm:$0xff]  ;;  %v2778_v19 = vld [vmem:[%s13060_s12 + $0xe8] sm:$0xff] }
 0xf0e   : > { %v2721_v58 = vsel %vm781_vm3, %v2718_v57, 0.0  ;;  %2926 = vmatprep.subr.mxu0 %v2782_v4  ;;  %v2777_v4 = vld [vmem:[%s13060_s12 + $0xe0] sm:$0xff] }
 0xf0f   : > { %2722 = vadd.xlane.f32.xlu0 %v2721_v58  ;;  %2927 = vmatpush1.msra.mxu0 %v2781_v6  ;;  %v2810_v58 = vld [vmem:[%s13060_s12 + $0x1e8] sm:$0xff] }
 0xf10   : > { %2928 = vmatprep.subr.mxu0 %v2766_v8  ;;  %v2762_v6 = vld [vmem:[%s13060_s12 + $0x68] sm:$0xff]  ;;  %v2761_v8 = vld [vmem:[%s13060_s12 + $0x60] sm:$0xff] }
 0xf11   : > { %2929 = vmatpush1.msra.mxu0 %v2765_v10  ;;  %v3515_v10 = vld [vmem:[%s13062_s14 + $0xf8] sm:$0xff] }
 0xf12   : > { %2930 = vmatprep.subr.mxu0 %v2750_v12  ;;  %v3499_v12 = vld [vmem:[%s13062_s14 + $0x78] sm:$0xff] }
 0xf13   : > { %2931 = vmatpush1.msra.mxu0 %v2749_v14  ;;  %v3514_v14 = vld [vmem:[%s13062_s14 + $0xf0] sm:$0xff] }
 0xf14   : > { %3066 = vmatprep.subr.mxu0 %v2802_v16  ;;  %v3498_v16 = vld [vmem:[%s13062_s14 + $0x70] sm:$0xff] }
 0xf98   : > { %v2723_v59 = vpop.xlane.xlu0 %2722 }
 0xf99   : > { %v2725_v60 = vmul.f32 0.03125, %v2723_v59  ;;  %v2812_v59 = vld [vmem:[%s13060_s12 + $0x1f8] sm:$0xff] }
 0xf9b   : > { %v2726_v61 = vsub.f32 %v2718_v57, %v2725_v60  ;;  %v2759_v57 = vld [vmem:[%s13060_s12 + $0x50] sm:$0xff]  ;;  %v2809_v60 = vld [vmem:[%s13060_s12 + $0x1e0] sm:$0xff] }
 0xf9d   : > { %v2727_v62 = vmul.f32 %v2726_v61, %v2726_v61 }
 0xf9f   : > { %v2728_v63 = vsel %vm781_vm3, %v2727_v62, 0.0  ;;  %v2794_v62 = vld [vmem:[%s13060_s12 + $0x168] sm:$0xff] }
 0xfa0   : > { %2729 = vadd.xlane.f32.xlu1 %v2728_v63  ;;  %v2796_v63 = vld [vmem:[%s13060_s12 + $0x178] sm:$0xff] }
0x1029   : > { %v2730_v18 = vpop.xlane.xlu1 %2729 }
0x102a   : > { %v2731_v20 = vmul.f32 0.03125, %v2730_v18  ;;  %v3513_v18 = vld [vmem:[%s13062_s14 + $0xe8] sm:$0xff] }
0x102c   : > { %v2732_v21 = vadd.f32 1e-05, %v2731_v20  ;;  %v3545_v20 = vld [vmem:[%s13062_s14 + $0x1e8] sm:$0xff] }
0x102e   : > { %9827 = vrsqrt.f32 %v2732_v21  ;;  %v3497_v21 = vld [vmem:[%s13062_s14 + $0x68] sm:$0xff] }
0x103b   : > { %v9828_v22 = vpop.eup %9827 }
0x103c   : > { %v2734_v24 = vmul.f32 %v9828_v22, %v2726_v61  ;;  %v2811_v61 = vld [vmem:[%s13060_s12 + $0x1f0] sm:$0xff]  ;;  %v3529_v22 = vld [vmem:[%s13062_s14 + $0x168] sm:$0xff] }
0x103e   : > { %v2741_v26 = vmul.f32 %v8163_v23, %v2734_v24  ;;  %v3512_v23 = vld [vmem:[%s13062_s14 + $0xe0] sm:$0xff] }
0x103f   : > { %v3544_v24 = vld [vmem:[%s13062_s14 + $0x1e0] sm:$0xff] }
0x1040   : > { %v10532_v27 = vadd.f32 %v8164_v25, %v2741_v26  ;;  %v3496_v25 = vld [vmem:[%s13062_s14 + $0x60] sm:$0xff] }
0x1041   : > { %v3528_v26 = vld [vmem:[%s13062_s14 + $0x160] sm:$0xff] }
0x1042   : > { %8165 = vmatmul.mubr.msk.f32.vlgmr.msra.gmra.mxu0 %vm781_vm3, %v10532_v27  ;;  %8166 = vmatmul.mubr.msk.f32.vlgmr.msra.gmra.mxu1 %vm781_vm3, %v10532_v27 }
0x1043   : > { %3067 = vmatpush1.msra.mxu0 %v2801_v28  ;;  %3138 = vmatpush1.msra.mxu1 %v2803_v29  ;;  %v3511_v28 = vld [vmem:[%s13062_s14 + $0xd8] sm:$0xff] }
0x1044   : > { %3068 = vmatprep.subr.mxu0 %v2786_v30  ;;  %3139 = vmatprep.subr.mxu1 %v2788_v31  ;;  %v3543_v29 = vld [vmem:[%s13062_s14 + $0x1d8] sm:$0xff] }
0x1045   : > { %3069 = vmatpush1.msra.mxu0 %v2785_v32  ;;  %3140 = vmatpush1.msra.mxu1 %v2787_v33  ;;  %v3495_v30 = vld [vmem:[%s13062_s14 + $0x58] sm:$0xff]  ;;  %v3510_v32 = vld [vmem:[%s13062_s14 + $0xd0] sm:$0xff] }
0x1046   : > { %3070 = vmatprep.subr.mxu0 %v2770_v34  ;;  %3141 = vmatprep.subr.mxu1 %v2772_v36  ;;  %v3527_v31 = vld [vmem:[%s13062_s14 + $0x158] sm:$0xff]  ;;  %v3542_v33 = vld [vmem:[%s13062_s14 + $0x1d0] sm:$0xff] }
0x1047   : > { %3071 = vmatpush1.msra.mxu0 %v2769_v35  ;;  %3142 = vmatpush1.msra.mxu1 %v2771_v37  ;;  %v3494_v34 = vld [vmem:[%s13062_s14 + $0x50] sm:$0xff]  ;;  %v3509_v35 = vld [vmem:[%s13062_s14 + $0xc8] sm:$0xff] }
0x1048   : > { %3072 = vmatprep.subr.mxu0 %v2754_v38  ;;  %3143 = vmatprep.subr.mxu1 %v2756_v39  ;;  %v3526_v36 = vld [vmem:[%s13062_s14 + $0x150] sm:$0xff]  ;;  %v3541_v37 = vld [vmem:[%s13062_s14 + $0x1c8] sm:$0xff] }
0x1049   : > { %3073 = vmatpush1.msra.mxu0 %v2753_v40  ;;  %3106 = vmatprep.mubr.f32.mxu0 %v9913_v1  ;;  %v3493_v38 = vld [vmem:[%s13062_s14 + $0x48] sm:$0xff]  ;;  %v3508_v40 = vld [vmem:[%s13062_s14 + $0xc0] sm:$0xff] }
0x104a   : > { %3144 = vmatpush1.msra.mxu1 %v2755_v41  ;;  %3177 = vmatprep.mubr.f32.mxu1 %v9913_v1  ;;  %v3525_v39 = vld [vmem:[%s13062_s14 + $0x148] sm:$0xff]  ;;  %v3540_v41 = vld [vmem:[%s13062_s14 + $0x1c0] sm:$0xff] }
0x104b   : > { %8167 = vmatmul.mubr.msk.f32.vlgmr.msra.gmra.mxu0 %vm781_vm3, %v10532_v27  ;;  %8168 = vmatmul.mubr.msk.f32.vlgmr.msra.gmra.mxu1 %vm781_vm3, %v10532_v27 }
0x104c   : > { %3208 = vmatprep.subr.mxu0 %v2806_v42  ;;  %3279 = vmatprep.subr.mxu1 %v2808_v43  ;;  %v3492_v42 = vld [vmem:[%s13062_s14 + $0x40] sm:$0xff] }
0x104d   : > { %3209 = vmatpush1.msra.mxu0 %v2805_v44  ;;  %3280 = vmatpush1.msra.mxu1 %v2807_v45  ;;  %v3524_v43 = vld [vmem:[%s13062_s14 + $0x140] sm:$0xff]  ;;  %v3507_v44 = vld [vmem:[%s13062_s14 + $0xb8] sm:$0xff] }
0x104e   : > { %3210 = vmatprep.subr.mxu0 %v2790_v46  ;;  %3281 = vmatprep.subr.mxu1 %v2792_v47  ;;  %v3539_v45 = vld [vmem:[%s13062_s14 + $0x1b8] sm:$0xff] }
0x104f   : > { %3211 = vmatpush1.msra.mxu0 %v2789_v48  ;;  %3282 = vmatpush1.msra.mxu1 %v2791_v49  ;;  %v3491_v46 = vld [vmem:[%s13062_s14 + $0x38] sm:$0xff]  ;;  %v3506_v48 = vld [vmem:[%s13062_s14 + $0xb0] sm:$0xff] }
0x1050   : > { %3212 = vmatprep.subr.mxu0 %v2774_v50  ;;  %3283 = vmatprep.subr.mxu1 %v2776_v51  ;;  %v3523_v47 = vld [vmem:[%s13062_s14 + $0x138] sm:$0xff]  ;;  %v3538_v49 = vld [vmem:[%s13062_s14 + $0x1b0] sm:$0xff] }
0x1051   : > { %3213 = vmatpush1.msra.mxu0 %v2773_v52  ;;  %3284 = vmatpush1.msra.mxu1 %v2775_v53  ;;  %v3490_v50 = vld [vmem:[%s13062_s14 + $0x30] sm:$0xff]  ;;  %v3505_v52 = vld [vmem:[%s13062_s14 + $0xa8] sm:$0xff] }
0x1052   : > { %3214 = vmatprep.subr.mxu0 %v2758_v54  ;;  %3285 = vmatprep.subr.mxu1 %v2760_v55  ;;  %v3522_v51 = vld [vmem:[%s13062_s14 + $0x130] sm:$0xff]  ;;  %v3537_v53 = vld [vmem:[%s13062_s14 + $0x1a8] sm:$0xff] }
0x1053   : > { %3215 = vmatpush1.msra.mxu0 %v2757_v56  ;;  %3248 = vmatprep.mubr.f32.mxu0 %v9913_v1  ;;  %v3489_v54 = vld [vmem:[%s13062_s14 + $0x28] sm:$0xff]  ;;  %v3504_v56 = vld [vmem:[%s13062_s14 + $0xa0] sm:$0xff] }
0x1054   : > { %3286 = vmatpush1.msra.mxu1 %v2759_v57  ;;  %3319 = vmatprep.mubr.f32.mxu1 %v9913_v1  ;;  %v3521_v55 = vld [vmem:[%s13062_s14 + $0x128] sm:$0xff]  ;;  %v3536_v57 = vld [vmem:[%s13062_s14 + $0x1a0] sm:$0xff] }
0x1055   : > { %8169 = vmatmul.mubr.msk.f32.vlgmr.msra.gmra.mxu0 %vm781_vm3, %v10532_v27  ;;  %8170 = vmatmul.mubr.msk.f32.vlgmr.msra.gmra.mxu1 %vm781_vm3, %v10532_v27 }
0x1056   : > { %3350 = vmatprep.subr.mxu0 %v2810_v58  ;;  %3421 = vmatprep.subr.mxu1 %v2812_v59  ;;  %v3488_v58 = vld [vmem:[%s13062_s14 + $0x20] sm:$0xff] }
0x1057   : > { %3351 = vmatpush1.msra.mxu0 %v2809_v60  ;;  %3422 = vmatpush1.msra.mxu1 %v2811_v61  ;;  %v3520_v59 = vld [vmem:[%s13062_s14 + $0x120] sm:$0xff]  ;;  %v3503_v60 = vld [vmem:[%s13062_s14 + $0x98] sm:$0xff] }
0x1058   : > { %3352 = vmatprep.subr.mxu0 %v2794_v62  ;;  %3423 = vmatprep.subr.mxu1 %v2796_v63  ;;  %v3535_v61 = vld [vmem:[%s13062_s14 + $0x198] sm:$0xff] }
0x1059   : > { %3353 = vmatpush1.msra.mxu0 %v2793_v0  ;;  %3424 = vmatpush1.msra.mxu1 %v2795_v2  ;;  %v3487_v62 = vld [vmem:[%s13062_s14 + $0x18] sm:$0xff]  ;;  %v3502_v0 = vld [vmem:[%s13062_s14 + $0x90] sm:$0xff] }
0x105a   : > { %3354 = vmatprep.subr.mxu0 %v2778_v19  ;;  %3425 = vmatprep.subr.mxu1 %v2780_v3  ;;  %v3519_v63 = vld [vmem:[%s13062_s14 + $0x118] sm:$0xff]  ;;  %v3534_v2 = vld [vmem:[%s13062_s14 + $0x190] sm:$0xff] }
0x105b   : > { %3355 = vmatpush1.msra.mxu0 %v2777_v4  ;;  %3426 = vmatpush1.msra.mxu1 %v2779_v5  ;;  %v3486_v19 = vld [vmem:[%s13062_s14 + $0x10] sm:$0xff]  ;;  %v3501_v4 = vld [vmem:[%s13062_s14 + $0x88] sm:$0xff] }
0x105c   : > { %3356 = vmatprep.subr.mxu0 %v2762_v6  ;;  %3427 = vmatprep.subr.mxu1 %v2764_v7  ;;  %v3518_v3 = vld [vmem:[%s13062_s14 + $0x110] sm:$0xff]  ;;  %v3533_v5 = vld [vmem:[%s13062_s14 + $0x188] sm:$0xff] }
0x105d   : > { %3357 = vmatpush1.msra.mxu0 %v2761_v8  ;;  %3390 = vmatprep.mubr.f32.mxu0 %v9913_v1  ;;  %v3485_v6 = vld [vmem:[%s13062_s14 + $0x8] sm:$0xff]  ;;  %v3500_v8 = vld [vmem:[%s13062_s14 + $0x80] sm:$0xff] }
0x105e   : > { %3428 = vmatpush1.msra.mxu1 %v2763_v9  ;;  %3461 = vmatprep.mubr.f32.mxu1 %v9913_v1  ;;  %v3517_v7 = vld [vmem:[%s13062_s14 + $0x108] sm:$0xff]  ;;  %v3532_v9 = vld [vmem:[%s13062_s14 + $0x180] sm:$0xff] }
0x105f   : > { %8171 = vmatmul.mubr.msk.f32.vlgmr.msra.gmra.mxu0 %vm781_vm3, %v10532_v27  ;;  %8172 = vmatmul.mubr.msk.f32.vlgmr.msra.gmra.mxu1 %vm781_vm3, %v10532_v27 }
0x1060   : > { %8715 = vmatprep.subr.mxu0 %v3515_v10  ;;  %8750 = vmatprep.subr.mxu1 %v3547_v11  ;;  %v3484_v10 = vld [vmem:[%s13062_s14] sm:$0xff] }
0x1061   : > { %8716 = vmatpush3.msra.mxu0 %v3499_v12  ;;  %8751 = vmatpush3.msra.mxu1 %v3531_v13  ;;  %v3516_v11 = vld [vmem:[%s13062_s14 + $0x100] sm:$0xff]  ;;  %v3579_v12 = vld [vmem:[%s13062_s14 + $0x2f8] sm:$0xff] }
0x1062   : > { %8717 = vmatprep.subr.mxu0 %v3514_v14  ;;  %8752 = vmatprep.subr.mxu1 %v3546_v15  ;;  %v3611_v13 = vld [vmem:[%s13062_s14 + $0x3f8] sm:$0xff]  ;;  %v2817_v14 = vlaneseq }
0x1063   : > { %8718 = vmatpush3.msra.mxu0 %v3498_v16  ;;  %8753 = vmatpush3.msra.mxu1 %v3530_v17 }
0x1064   : > { %8719 = vmatprep.subr.mxu0 %v3513_v18  ;;  %8754 = vmatprep.subr.mxu1 %v3545_v20  ;;  %v10892_v15 = vshrl.u32 %v2817_v14, 7  ;;  %v10903_v18 = vld [vmem:[%s13061_s13] sm:$0xff] }
0x1065   : > { %8720 = vmatpush3.msra.mxu0 %v3497_v21  ;;  %8755 = vmatpush3.msra.mxu1 %v3529_v22  ;;  %v3604_v14 = vld [vmem:[%s13062_s14 + $0x3c0] sm:$0xff] }
0x1066   : > { %8721 = vmatprep.subr.mxu0 %v3512_v23  ;;  %8756 = vmatprep.subr.mxu1 %v3544_v24  ;;  %v10895_v16 = vsub.s32 0, %v10892_v15  ;;  %v10898_v17 = vsub.s32 2, %v10892_v15  ;;  %v10906_v20 = vsub.s32 1, %v10892_v15  ;;  %v10909_v21 = vsub.s32 3, %v10892_v15 }
0x1067   : > { %8722 = vmatpush3.msra.mxu0 %v3496_v25  ;;  %8757 = vmatpush3.msra.mxu1 %v3528_v26 }
0x1068   : > { %8723 = vmatprep.subr.mxu0 %v3511_v28  ;;  %8758 = vmatprep.subr.mxu1 %v3543_v29  ;;  %v2820_v22 = vrot.slane %v10903_v18, %v10895_v16  ;;  %v2828_v23 = vrot.slane %v10903_v18, %v10898_v17  ;;  %v2824_v24 = vrot.slane %v10903_v18, %v10906_v20 }
0x1069   : > { %8724 = vmatpush3.msra.mxu0 %v3495_v30  ;;  %8759 = vmatpush3.msra.mxu1 %v3527_v31  ;;  %v2832_v25 = vrot.slane %v10903_v18, %v10909_v21 }
0x106a   : > { %8725 = vmatprep.subr.mxu0 %v3510_v32  ;;  %8760 = vmatprep.subr.mxu1 %v3542_v33 }
0x106b   : > { %8726 = vmatpush3.msra.mxu0 %v3494_v34  ;;  %8761 = vmatpush3.msra.mxu1 %v3526_v36  ;;  %v10920_v36 = vsub.s32 5, %v10892_v15 }
0x106c   : > { %8727 = vmatprep.subr.mxu0 %v3509_v35  ;;  %8762 = vmatprep.subr.mxu1 %v3541_v37  ;;  %v10923_v35 = vsub.s32 7, %v10892_v15 }
0x106d   : > { %8728 = vmatpush3.msra.mxu0 %v3493_v38  ;;  %8763 = vmatpush3.msra.mxu1 %v3525_v39 }
0x106e   : > { %8729 = vmatprep.subr.mxu0 %v3508_v40  ;;  %8764 = vmatprep.subr.mxu1 %v3540_v41  ;;  %v3563_v41 = vld [vmem:[%s13062_s14 + $0x278] sm:$0xff] }
0x106f   : > { %8730 = vmatpush3.msra.mxu0 %v3492_v42  ;;  %8765 = vmatpush3.msra.mxu1 %v3524_v43  ;;  %v3595_v42 = vld [vmem:[%s13062_s14 + $0x378] sm:$0xff]  ;;  %v3578_v43 = vld [vmem:[%s13062_s14 + $0x2f0] sm:$0xff] }
0x1070   : > { %8731 = vmatprep.subr.mxu0 %v3507_v44  ;;  %8766 = vmatprep.subr.mxu1 %v3539_v45  ;;  %v3610_v44 = vld [vmem:[%s13062_s14 + $0x3f0] sm:$0xff]  ;;  %v2840_v45 = vrot.slane %v10903_v18, %v10920_v36 }
0x1071   : > { %8732 = vmatpush3.msra.mxu0 %v3491_v46  ;;  %8767 = vmatpush3.msra.mxu1 %v3523_v47  ;;  %v2848_v46 = vrot.slane %v10903_v18, %v10923_v35  ;;  %v3562_v47 = vld [vmem:[%s13062_s14 + $0x270] sm:$0xff] }
0x1072   : > { %8733 = vmatprep.subr.mxu0 %v3506_v48  ;;  %8768 = vmatprep.subr.mxu1 %v3538_v49  ;;  %v3594_v48 = vld [vmem:[%s13062_s14 + $0x370] sm:$0xff] }
0x1073   : > { %8734 = vmatpush3.msra.mxu0 %v3490_v50  ;;  %8769 = vmatpush3.msra.mxu1 %v3522_v51  ;;  %v3577_v51 = vld [vmem:[%s13062_s14 + $0x2e8] sm:$0xff] }
0x1074   : > { %8735 = vmatprep.subr.mxu0 %v3505_v52  ;;  %8770 = vmatprep.subr.mxu1 %v3537_v53  ;;  %v3609_v52 = vld [vmem:[%s13062_s14 + $0x3e8] sm:$0xff] }
0x1075   : > { %8736 = vmatpush3.msra.mxu0 %v3489_v54  ;;  %8771 = vmatpush3.msra.mxu1 %v3521_v55  ;;  %v3561_v53 = vld [vmem:[%s13062_s14 + $0x268] sm:$0xff] }
0x1076   : > { %8737 = vmatprep.subr.mxu0 %v3504_v56  ;;  %8772 = vmatprep.subr.mxu1 %v3536_v57  ;;  %v3593_v54 = vld [vmem:[%s13062_s14 + $0x368] sm:$0xff]  ;;  %v3576_v57 = vld [vmem:[%s13062_s14 + $0x2e0] sm:$0xff] }
0x1077   : > { %8738 = vmatpush3.msra.mxu0 %v3488_v58  ;;  %8773 = vmatpush3.msra.mxu1 %v3520_v59  ;;  %v3608_v58 = vld [vmem:[%s13062_s14 + $0x3e0] sm:$0xff] }
0x1078   : > { %8739 = vmatprep.subr.mxu0 %v3503_v60  ;;  %8774 = vmatprep.subr.mxu1 %v3535_v61  ;;  %v3560_v61 = vld [vmem:[%s13062_s14 + $0x260] sm:$0xff] }
0x1079   : > { %8740 = vmatpush3.msra.mxu0 %v3487_v62  ;;  %8775 = vmatpush3.msra.mxu1 %v3519_v63  ;;  %v3592_v62 = vld [vmem:[%s13062_s14 + $0x360] sm:$0xff] }
0x107a   : > { %8741 = vmatprep.subr.mxu0 %v3502_v0  ;;  %8776 = vmatprep.subr.mxu1 %v3534_v2  ;;  %v3575_v2 = vld [vmem:[%s13062_s14 + $0x2d8] sm:$0xff] }
0x107b   : > { %8742 = vmatpush3.msra.mxu0 %v3486_v19  ;;  %8777 = vmatpush3.msra.mxu1 %v3518_v3  ;;  %v3607_v19 = vld [vmem:[%s13062_s14 + $0x3d8] sm:$0xff] }
0x107c   : > { %8743 = vmatprep.subr.mxu0 %v3501_v4  ;;  %8778 = vmatprep.subr.mxu1 %v3533_v5  ;;  %v3559_v3 = vld [vmem:[%s13062_s14 + $0x258] sm:$0xff]  ;;  %v3574_v5 = vld [vmem:[%s13062_s14 + $0x2d0] sm:$0xff] }
0x107d   : > { %8744 = vmatpush3.msra.mxu0 %v3485_v6  ;;  %8779 = vmatpush3.msra.mxu1 %v3517_v7  ;;  %v3591_v4 = vld [vmem:[%s13062_s14 + $0x358] sm:$0xff]  ;;  %v3606_v6 = vld [vmem:[%s13062_s14 + $0x3d0] sm:$0xff] }
0x107e   : > { %8745 = vmatprep.subr.mxu0 %v3500_v8  ;;  %8780 = vmatprep.subr.mxu1 %v3532_v9  ;;  %v3558_v7 = vld [vmem:[%s13062_s14 + $0x250] sm:$0xff]  ;;  %v3573_v9 = vld [vmem:[%s13062_s14 + $0x2c8] sm:$0xff] }
0x107f   : > { %8746 = vmatpush3.msra.mxu0 %v3484_v10  ;;  %8781 = vmatpush3.msra.mxu1 %v3516_v11  ;;  %v3590_v8 = vld [vmem:[%s13062_s14 + $0x350] sm:$0xff]  ;;  %v3605_v10 = vld [vmem:[%s13062_s14 + $0x3c8] sm:$0xff] }
0x1080   : > { %8785 = vmatprep.subr.mxu0 %v3579_v12  ;;  %8820 = vmatprep.subr.mxu1 %v3611_v13  ;;  %v3557_v11 = vld [vmem:[%s13062_s14 + $0x248] sm:$0xff]  ;;  %v3572_v13 = vld [vmem:[%s13062_s14 + $0x2c0] sm:$0xff] }
0x1081   : > { %v3589_v12 = vld [vmem:[%s13062_s14 + $0x348] sm:$0xff] }
0x1102   : > { %v2966_v26 = vpop.f32.mrf.mxu0  ;;  %v3037_v28 = vpop.f32.mrf.mxu1 }
0x1103   : > { %v2967_v29 = vadd.f32 %v2966_v26, %v2820_v22  ;;  %v3038_v30 = vadd.f32 %v3037_v28, %v2828_v23  ;;  %v3556_v22 = vld [vmem:[%s13062_s14 + $0x240] sm:$0xff]  ;;  %v3555_v26 = vld [vmem:[%s13062_s14 + $0x238] sm:$0xff] }
0x1104   : > { %v2968_v31 = vpop.f32.mrf.mxu0  ;;  %v3039_v32 = vpop.f32.mrf.mxu1  ;;  %v3588_v23 = vld [vmem:[%s13062_s14 + $0x340] sm:$0xff]  ;;  %v3587_v28 = vld [vmem:[%s13062_s14 + $0x338] sm:$0xff] }
0x1105   : > { %v2969_v33 = vadd.f32 %v2968_v31, %v2824_v24  ;;  %v3040_v34 = vadd.f32 %v3039_v32, %v2832_v25  ;;  %v3468_v39 = vmax.f32 %v2967_v29, 0.0  ;;  %v3470_v40 = vmax.f32 %v3038_v30, 0.0  ;;  %v3571_v24 = vld [vmem:[%s13062_s14 + $0x2b8] sm:$0xff]  ;;  %v3570_v29 = vld [vmem:[%s13062_s14 + $0x2b0] sm:$0xff] }
0x1106   : > { %v3603_v25 = vld [vmem:[%s13062_s14 + $0x3b8] sm:$0xff]  ;;  %v3602_v30 = vld [vmem:[%s13062_s14 + $0x3b0] sm:$0xff] }
0x1107   : > { %v3469_v37 = vmax.f32 %v2969_v33, 0.0  ;;  %v3471_v38 = vmax.f32 %v3040_v34, 0.0  ;;  %v3554_v31 = vld [vmem:[%s13062_s14 + $0x230] sm:$0xff]  ;;  %v3569_v33 = vld [vmem:[%s13062_s14 + $0x2a8] sm:$0xff] }
0x1108   : > { %v3586_v32 = vld [vmem:[%s13062_s14 + $0x330] sm:$0xff]  ;;  %v3601_v34 = vld [vmem:[%s13062_s14 + $0x3a8] sm:$0xff] }
0x1109   : > { %3811 = vmatprep.mubr.f32.mxu0 %v3469_v37  ;;  %3881 = vmatprep.mubr.f32.mxu1 %v3471_v38  ;;  %v11054_v37 = vsub.s32 4, %v10892_v15  ;;  %v11057_v38 = vsub.s32 6, %v10892_v15  ;;  %v3600_v15 = vld [vmem:[%s13062_s14 + $0x3a0] sm:$0xff] }
0x110a   : > { %3812 = vmatmul.mubr.f32.vlgmr.msra.gmra.mxu0 %v3468_v39  ;;  %3882 = vmatmul.mubr.f32.vlgmr.msra.gmra.mxu1 %v3470_v40  ;;  %v3553_v39 = vld [vmem:[%s13062_s14 + $0x228] sm:$0xff] }
0x110b   : > { %v10947_v49 = vpop.f32.mrf.mxu0  ;;  %v10949_v50 = vpop.f32.mrf.mxu1  ;;  %8786 = vmatpush3.msra.mxu0 %v3563_v41  ;;  %8821 = vmatpush3.msra.mxu1 %v3595_v42  ;;  %v3585_v40 = vld [vmem:[%s13062_s14 + $0x328] sm:$0xff]  ;;  %v3568_v41 = vld [vmem:[%s13062_s14 + $0x2a0] sm:$0xff] }
0x110c   : > { %8787 = vmatprep.subr.mxu0 %v3578_v43  ;;  %8822 = vmatprep.subr.mxu1 %v3610_v44  ;;  %v3552_v42 = vld [vmem:[%s13062_s14 + $0x220] sm:$0xff] }
0x110d   : > { %v3110_v55 = vpop.f32.mrf.mxu0  ;;  %v3181_v56 = vpop.f32.mrf.mxu1  ;;  %8788 = vmatpush3.msra.mxu0 %v3562_v47  ;;  %8823 = vmatpush3.msra.mxu1 %v3594_v48  ;;  %v3584_v43 = vld [vmem:[%s13062_s14 + $0x320] sm:$0xff]  ;;  %v2836_v47 = vrot.slane %v10903_v18, %v11054_v37  ;;  %v2844_v48 = vrot.slane %v10903_v18, %v11057_v38  ;;  %v3566_v18 = vld [vmem:[%s13062_s14 + $0x290] sm:$0xff] }
0x110e   : > { %v3111_v59 = vadd.f32 %v3110_v55, %v2840_v45  ;;  %v3182_v60 = vadd.f32 %v3181_v56, %v2848_v46  ;;  %8789 = vmatprep.subr.mxu0 %v3577_v51  ;;  %8824 = vmatprep.subr.mxu1 %v3609_v52  ;;  %v3567_v45 = vld [vmem:[%s13062_s14 + $0x298] sm:$0xff]  ;;  %v3598_v55 = vld [vmem:[%s13062_s14 + $0x390] sm:$0xff] }
0x110f   : > { %8790 = vmatpush3.msra.mxu0 %v3561_v53  ;;  %8825 = vmatpush3.msra.mxu1 %v3593_v54  ;;  %v3599_v46 = vld [vmem:[%s13062_s14 + $0x398] sm:$0xff]  ;;  %v11100_v54 = vld [vmem:[%s13061_s13 + $0x8] sm:$0xff] }
0x1110   : > { %v3473_v63 = vmax.f32 %v3111_v59, 0.0  ;;  %v3475_v0 = vmax.f32 %v3182_v60, 0.0  ;;  %8791 = vmatprep.subr.mxu0 %v3576_v57  ;;  %8826 = vmatprep.subr.mxu1 %v3608_v58  ;;  %v3551_v52 = vld [vmem:[%s13062_s14 + $0x218] sm:$0xff]  ;;  %v2856_v56 = vrot.slane %v11100_v54, %v10906_v20  ;;  %v3550_v57 = vld [vmem:[%s13062_s14 + $0x210] sm:$0xff]  ;;  %v2864_v60 = vrot.slane %v11100_v54, %v10909_v21 }
0x1111   : > { %8792 = vmatpush3.msra.mxu0 %v3560_v61  ;;  %8827 = vmatpush3.msra.mxu1 %v3592_v62  ;;  %v3583_v53 = vld [vmem:[%s13062_s14 + $0x318] sm:$0xff]  ;;  %v3582_v58 = vld [vmem:[%s13062_s14 + $0x310] sm:$0xff]  ;;  %v3565_v61 = vld [vmem:[%s13062_s14 + $0x288] sm:$0xff] }
0x1112   : > { %3951 = vmatprep.mubr.f32.mxu0 %v3473_v63  ;;  %4021 = vmatprep.mubr.f32.mxu1 %v3475_v0  ;;  %v3597_v62 = vld [vmem:[%s13062_s14 + $0x388] sm:$0xff]  ;;  %v3109_v63 = vadd.f32 %v10947_v49, %v2836_v47  ;;  %v3180_v0 = vadd.f32 %v10949_v50, %v2844_v48  ;;  %v3596_v49 = vld [vmem:[%s13062_s14 + $0x380] sm:$0xff]  ;;  %v3654_v47 = vld [vmem:[%s13062_s14 + $0x550] sm:$0xff] }
0x1113   : > { %8793 = vmatprep.subr.mxu0 %v3575_v2  ;;  %8828 = vmatprep.subr.mxu1 %v3607_v19  ;;  %v3549_v19 = vld [vmem:[%s13062_s14 + $0x208] sm:$0xff] }
0x1114   : > { %8794 = vmatpush3.msra.mxu0 %v3559_v3  ;;  %8829 = vmatpush3.msra.mxu1 %v3591_v4  ;;  %v3581_v3 = vld [vmem:[%s13062_s14 + $0x308] sm:$0xff]  ;;  %v3564_v4 = vld [vmem:[%s13062_s14 + $0x280] sm:$0xff] }
0x1115   : > { %8795 = vmatprep.subr.mxu0 %v3574_v5  ;;  %8830 = vmatprep.subr.mxu1 %v3606_v6  ;;  %v11077_v44 = vpop.f32.mrf.mxu0  ;;  %v11089_v51 = vpop.f32.mrf.mxu1  ;;  %v3548_v5 = vld [vmem:[%s13062_s14 + $0x200] sm:$0xff]  ;;  %v3637_v48 = vld [vmem:[%s13062_s14 + $0x4c8] sm:$0xff] }
0x1116   : > { %8796 = vmatpush3.msra.mxu0 %v3558_v7  ;;  %8831 = vmatpush3.msra.mxu1 %v3590_v8  ;;  %v3580_v6 = vld [vmem:[%s13062_s14 + $0x300] sm:$0xff]  ;;  %v3472_v8 = vmax.f32 %v3109_v63, 0.0  ;;  %v3634_v63 = vld [vmem:[%s13062_s14 + $0x4b0] sm:$0xff] }
0x1117   : > { %8797 = vmatprep.subr.mxu0 %v3573_v9  ;;  %8832 = vmatprep.subr.mxu1 %v3605_v10  ;;  %v3252_v59 = vpop.f32.mrf.mxu0  ;;  %v3323_v2 = vpop.f32.mrf.mxu1  ;;  %v3474_v9 = vmax.f32 %v3180_v0, 0.0  ;;  %v3643_v10 = vld [vmem:[%s13062_s14 + $0x4f8] sm:$0xff]  ;;  %v3666_v0 = vld [vmem:[%s13062_s14 + $0x5b0] sm:$0xff] }
0x1118   : > { %8798 = vmatpush3.msra.mxu0 %v3557_v11  ;;  %8833 = vmatpush3.msra.mxu1 %v3589_v12  ;;  %v3253_v50 = vadd.f32 %v3252_v59, %v2856_v56  ;;  %v3324_v7 = vadd.f32 %v3323_v2, %v2864_v60  ;;  %v3675_v11 = vld [vmem:[%s13062_s14 + $0x5f8] sm:$0xff]  ;;  %v3668_v56 = vld [vmem:[%s13062_s14 + $0x5c0] sm:$0xff]  ;;  %v3618_v2 = vld [vmem:[%s13062_s14 + $0x430] sm:$0xff] }
0x1119   : > { %8799 = vmatprep.subr.mxu0 %v3572_v13  ;;  %8834 = vmatprep.subr.mxu1 %v3604_v14  ;;  %v3627_v12 = vld [vmem:[%s13062_s14 + $0x478] sm:$0xff] }
0x111a   : > { %8800 = vmatpush3.msra.mxu0 %v3556_v22  ;;  %8835 = vmatpush3.msra.mxu1 %v3588_v23  ;;  %v3477_v13 = vmax.f32 %v3253_v50, 0.0  ;;  %v3659_v14 = vld [vmem:[%s13062_s14 + $0x578] sm:$0xff]  ;;  %v3479_v22 = vmax.f32 %v3324_v7, 0.0  ;;  %v3642_v23 = vld [vmem:[%s13062_s14 + $0x4f0] sm:$0xff]  ;;  %v3649_v50 = vld [vmem:[%s13062_s14 + $0x528] sm:$0xff] }
0x111b   : > { %8801 = vmatprep.subr.mxu0 %v3571_v24  ;;  %8836 = vmatprep.subr.mxu1 %v3603_v25  ;;  %v3674_v24 = vld [vmem:[%s13062_s14 + $0x5f0] sm:$0xff]  ;;  %v3635_v59 = vld [vmem:[%s13062_s14 + $0x4b8] sm:$0xff]  ;;  %v3616_v7 = vld [vmem:[%s13062_s14 + $0x420] sm:$0xff] }
0x111c   : > { %8802 = vmatpush3.msra.mxu0 %v3555_v26  ;;  %8837 = vmatpush3.msra.mxu1 %v3587_v28  ;;  %v3626_v25 = vld [vmem:[%s13062_s14 + $0x470] sm:$0xff]  ;;  %v3641_v28 = vld [vmem:[%s13062_s14 + $0x4e8] sm:$0xff]  ;;  %v3667_v60 = vld [vmem:[%s13062_s14 + $0x5b8] sm:$0xff] }
0x111d   : > { %8803 = vmatprep.subr.mxu0 %v3570_v29  ;;  %8838 = vmatprep.subr.mxu1 %v3602_v30  ;;  %v3658_v26 = vld [vmem:[%s13062_s14 + $0x570] sm:$0xff]  ;;  %v3673_v29 = vld [vmem:[%s13062_s14 + $0x5e8] sm:$0xff] }
0x111e   : > { %8804 = vmatpush3.msra.mxu0 %v3554_v31  ;;  %8839 = vmatpush3.msra.mxu1 %v3586_v32  ;;  %v3625_v30 = vld [vmem:[%s13062_s14 + $0x468] sm:$0xff]  ;;  %v3640_v32 = vld [vmem:[%s13062_s14 + $0x4e0] sm:$0xff] }
0x111f   : > { %8805 = vmatprep.subr.mxu0 %v3569_v33  ;;  %8840 = vmatprep.subr.mxu1 %v3601_v34  ;;  %v3657_v31 = vld [vmem:[%s13062_s14 + $0x568] sm:$0xff]  ;;  %v3672_v33 = vld [vmem:[%s13062_s14 + $0x5e0] sm:$0xff] }
0x1120   : > { %8806 = vmatpush3.msra.mxu0 %v3553_v39  ;;  %8841 = vmatpush3.msra.mxu1 %v3585_v40  ;;  %v3624_v34 = vld [vmem:[%s13062_s14 + $0x460] sm:$0xff]  ;;  %v3639_v40 = vld [vmem:[%s13062_s14 + $0x4d8] sm:$0xff] }
0x1121   : > { %8807 = vmatprep.subr.mxu0 %v3568_v41  ;;  %8842 = vmatprep.subr.mxu1 %v3600_v15  ;;  %v3656_v39 = vld [vmem:[%s13062_s14 + $0x560] sm:$0xff]  ;;  %v3671_v41 = vld [vmem:[%s13062_s14 + $0x5d8] sm:$0xff] }
0x1122   : > { %8808 = vmatpush3.msra.mxu0 %v3552_v42  ;;  %8843 = vmatpush3.msra.mxu1 %v3584_v43  ;;  %v3623_v15 = vld [vmem:[%s13062_s14 + $0x458] sm:$0xff]  ;;  %v3638_v43 = vld [vmem:[%s13062_s14 + $0x4d0] sm:$0xff] }
0x1123   : > { %8809 = vmatprep.subr.mxu0 %v3567_v45  ;;  %8844 = vmatprep.subr.mxu1 %v3599_v46  ;;  %v3655_v42 = vld [vmem:[%s13062_s14 + $0x558] sm:$0xff]  ;;  %v3670_v45 = vld [vmem:[%s13062_s14 + $0x5d0] sm:$0xff] }
0x1124   : > { %8810 = vmatpush3.msra.mxu0 %v3551_v52  ;;  %8845 = vmatpush3.msra.mxu1 %v3583_v53  ;;  %v3622_v46 = vld [vmem:[%s13062_s14 + $0x450] sm:$0xff]  ;;  %v3669_v52 = vld [vmem:[%s13062_s14 + $0x5c8] sm:$0xff] }
0x1125   : > { %8811 = vmatprep.subr.mxu0 %v3566_v18  ;;  %8846 = vmatprep.subr.mxu1 %v3598_v55  ;;  %v3621_v53 = vld [vmem:[%s13062_s14 + $0x448] sm:$0xff]  ;;  %v3636_v55 = vld [vmem:[%s13062_s14 + $0x4c0] sm:$0xff] }
0x1126   : > { %8812 = vmatpush3.msra.mxu0 %v3550_v57  ;;  %8847 = vmatpush3.msra.mxu1 %v3582_v58  ;;  %v3653_v18 = vld [vmem:[%s13062_s14 + $0x548] sm:$0xff]  ;;  %v3620_v57 = vld [vmem:[%s13062_s14 + $0x440] sm:$0xff] }
0x1127   : > { %8813 = vmatprep.subr.mxu0 %v3565_v61  ;;  %8848 = vmatprep.subr.mxu1 %v3597_v62  ;;  %v3652_v58 = vld [vmem:[%s13062_s14 + $0x540] sm:$0xff]  ;;  %v3619_v61 = vld [vmem:[%s13062_s14 + $0x438] sm:$0xff] }
0x1128   : > { %8814 = vmatpush3.msra.mxu0 %v3549_v19  ;;  %8849 = vmatpush3.msra.mxu1 %v3581_v3  ;;  %v3651_v62 = vld [vmem:[%s13062_s14 + $0x538] sm:$0xff]  ;;  %v3650_v19 = vld [vmem:[%s13062_s14 + $0x530] sm:$0xff]  ;;  %v3633_v3 = vld [vmem:[%s13062_s14 + $0x4a8] sm:$0xff] }
0x1129   : > { %8815 = vmatprep.subr.mxu0 %v3564_v4  ;;  %8850 = vmatprep.subr.mxu1 %v3596_v49  ;;  %v3665_v4 = vld [vmem:[%s13062_s14 + $0x5a8] sm:$0xff] }
0x112a   : > { %8816 = vmatpush3.msra.mxu0 %v3548_v5  ;;  %8851 = vmatpush3.msra.mxu1 %v3580_v6  ;;  %v3617_v49 = vld [vmem:[%s13062_s14 + $0x428] sm:$0xff]  ;;  %v3632_v5 = vld [vmem:[%s13062_s14 + $0x4a0] sm:$0xff] }
0x112b   : > { %3952 = vmatmul.mubr.f32.vlgmr.msra.gmra.mxu0 %v3472_v8  ;;  %4022 = vmatmul.mubr.f32.vlgmr.msra.gmra.mxu1 %v3474_v9  ;;  %v3664_v6 = vld [vmem:[%s13062_s14 + $0x5a0] sm:$0xff]  ;;  %v11288_v9 = vpop.f32.mrf.mxu0 }
0x112c   : > { %8855 = vmatprep.subr.mxu0 %v3643_v10  ;;  %8890 = vmatprep.subr.mxu1 %v3675_v11  ;;  %v3648_v8 = vld [vmem:[%s13062_s14 + $0x520] sm:$0xff]  ;;  %v3631_v10 = vld [vmem:[%s13062_s14 + $0x498] sm:$0xff] }
0x112d   : > { %8856 = vmatpush3.msra.mxu0 %v3627_v12  ;;  %4091 = vmatprep.mubr.f32.mxu0 %v3477_v13  ;;  %v3663_v11 = vld [vmem:[%s13062_s14 + $0x598] sm:$0xff]  ;;  %v2852_v12 = vrot.slane %v11100_v54, %v10895_v16  ;;  %v2860_v13 = vrot.slane %v11100_v54, %v10898_v17 }
0x112e   : > { %8891 = vmatpush3.msra.mxu1 %v3659_v14  ;;  %4161 = vmatprep.mubr.f32.mxu1 %v3479_v22  ;;  %v11300_v14 = vpop.f32.mrf.mxu1  ;;  %v3615_v22 = vld [vmem:[%s13062_s14 + $0x418] sm:$0xff] }
0x112f   : > { %8857 = vmatprep.subr.mxu0 %v3642_v23  ;;  %8892 = vmatprep.subr.mxu1 %v3674_v24  ;;  %v3647_v23 = vld [vmem:[%s13062_s14 + $0x518] sm:$0xff]  ;;  %v3630_v24 = vld [vmem:[%s13062_s14 + $0x490] sm:$0xff] }
0x1130   : > { %8858 = vmatpush3.msra.mxu0 %v3626_v25  ;;  %8893 = vmatpush3.msra.mxu1 %v3658_v26  ;;  %v3662_v25 = vld [vmem:[%s13062_s14 + $0x590] sm:$0xff]  ;;  %v2872_v26 = vrot.slane %v11100_v54, %v10920_v36 }
0x1131   : > { %8859 = vmatprep.subr.mxu0 %v3641_v28  ;;  %8894 = vmatprep.subr.mxu1 %v3673_v29  ;;  %v3614_v28 = vld [vmem:[%s13062_s14 + $0x410] sm:$0xff] }
0x1132   : > { %8860 = vmatpush3.msra.mxu0 %v3625_v30  ;;  %8895 = vmatpush3.msra.mxu1 %v3657_v31  ;;  %v3646_v29 = vld [vmem:[%s13062_s14 + $0x510] sm:$0xff]  ;;  %v3394_v30 = vpop.f32.mrf.mxu0  ;;  %v2880_v31 = vrot.slane %v11100_v54, %v10923_v35 }
0x1133   : > { %8861 = vmatprep.subr.mxu0 %v3640_v32  ;;  %8896 = vmatprep.subr.mxu1 %v3672_v33  ;;  %v3629_v32 = vld [vmem:[%s13062_s14 + $0x488] sm:$0xff] }
0x1134   : > { %8862 = vmatpush3.msra.mxu0 %v3624_v34  ;;  %8897 = vmatpush3.msra.mxu1 %v3656_v39  ;;  %v3661_v33 = vld [vmem:[%s13062_s14 + $0x588] sm:$0xff]  ;;  %v3251_v34 = vadd.f32 %v11077_v44, %v2852_v12  ;;  %v3322_v39 = vadd.f32 %v11089_v51, %v2860_v13  ;;  %v3660_v44 = vld [vmem:[%s13062_s14 + $0x580] sm:$0xff]  ;;  %v3395_v51 = vadd.f32 %v3394_v30, %v2872_v26  ;;  %v3718_v12 = vld [vmem:[%s13062_s14 + $0x750] sm:$0xff] }
0x1135   : > { %8863 = vmatprep.subr.mxu0 %v3639_v40  ;;  %8898 = vmatprep.subr.mxu1 %v3671_v41  ;;  %v3465_v40 = vpop.f32.mrf.mxu1  ;;  %v3613_v41 = vld [vmem:[%s13062_s14 + $0x408] sm:$0xff]  ;;  %v3732_v26 = vld [vmem:[%s13062_s14 + $0x7c0] sm:$0xff]  ;;  %v3699_v30 = vld [vmem:[%s13062_s14 + $0x6b8] sm:$0xff] }
0x1136   : > { %8864 = vmatpush3.msra.mxu0 %v3623_v15  ;;  %8899 = vmatpush3.msra.mxu1 %v3655_v42  ;;  %v3645_v15 = vld [vmem:[%s13062_s14 + $0x508] sm:$0xff]  ;;  %v3628_v42 = vld [vmem:[%s13062_s14 + $0x480] sm:$0xff] }
0x1137   : > { %8865 = vmatprep.subr.mxu0 %v3638_v43  ;;  %8900 = vmatprep.subr.mxu1 %v3670_v45  ;;  %v3612_v43 = vld [vmem:[%s13062_s14 + $0x400] sm:$0xff]  ;;  %v3701_v13 = vld [vmem:[%s13062_s14 + $0x6c8] sm:$0xff] }
0x1138   : > { %8866 = vmatpush3.msra.mxu0 %v3622_v46  ;;  %8901 = vmatpush3.msra.mxu1 %v3654_v47  ;;  %v3644_v45 = vld [vmem:[%s13062_s14 + $0x500] sm:$0xff]  ;;  %v3466_v46 = vadd.f32 %v3465_v40, %v2880_v31  ;;  %v3476_v47 = vmax.f32 %v3251_v34, 0.0  ;;  %v3731_v31 = vld [vmem:[%s13062_s14 + $0x7b8] sm:$0xff]  ;;  %v3698_v34 = vld [vmem:[%s13062_s14 + $0x6b0] sm:$0xff] }
0x1139   : > { %8867 = vmatprep.subr.mxu0 %v3637_v48  ;;  %8902 = vmatprep.subr.mxu1 %v3669_v52  ;;  %v3478_v48 = vmax.f32 %v3322_v39, 0.0  ;;  %v3707_v52 = vld [vmem:[%s13062_s14 + $0x6f8] sm:$0xff]  ;;  %v3730_v39 = vld [vmem:[%s13062_s14 + $0x7b0] sm:$0xff] }
0x113a   : > { %8868 = vmatpush3.msra.mxu0 %v3621_v53  ;;  %8903 = vmatpush3.msra.mxu1 %v3653_v18  ;;  %v3739_v53 = vld [vmem:[%s13062_s14 + $0x7f8] sm:$0xff]  ;;  %v3682_v40 = vld [vmem:[%s13062_s14 + $0x630] sm:$0xff] }
0x113b   : > { %8869 = vmatprep.subr.mxu0 %v3636_v55  ;;  %8904 = vmatprep.subr.mxu1 %v3668_v56  ;;  %v3691_v18 = vld [vmem:[%s13062_s14 + $0x678] sm:$0xff]  ;;  %v3481_v55 = vmax.f32 %v3395_v51, 0.0  ;;  %v3713_v51 = vld [vmem:[%s13062_s14 + $0x728] sm:$0xff] }
0x113c   : > { %8870 = vmatpush3.msra.mxu0 %v3620_v57  ;;  %8905 = vmatpush3.msra.mxu1 %v3652_v58  ;;  %v3723_v56 = vld [vmem:[%s13062_s14 + $0x778] sm:$0xff]  ;;  %v3483_v57 = vmax.f32 %v3466_v46, 0.0  ;;  %v3706_v58 = vld [vmem:[%s13062_s14 + $0x6f0] sm:$0xff]  ;;  %v3680_v46 = vld [vmem:[%s13062_s14 + $0x620] sm:$0xff] }
0x113d   : > { %8871 = vmatprep.subr.mxu0 %v3635_v59  ;;  %8906 = vmatprep.subr.mxu1 %v3667_v60  ;;  %v3738_v59 = vld [vmem:[%s13062_s14 + $0x7f0] sm:$0xff] }
0x113e   : > { %8872 = vmatpush3.msra.mxu0 %v3619_v61  ;;  %8907 = vmatpush3.msra.mxu1 %v3651_v62  ;;  %v3690_v60 = vld [vmem:[%s13062_s14 + $0x670] sm:$0xff]  ;;  %v3705_v62 = vld [vmem:[%s13062_s14 + $0x6e8] sm:$0xff] }
0x113f   : > { %8873 = vmatprep.subr.mxu0 %v3634_v63  ;;  %8908 = vmatprep.subr.mxu1 %v3666_v0  ;;  %v3722_v61 = vld [vmem:[%s13062_s14 + $0x770] sm:$0xff]  ;;  %v3737_v63 = vld [vmem:[%s13062_s14 + $0x7e8] sm:$0xff] }
0x1140   : > { %8874 = vmatpush3.msra.mxu0 %v3618_v2  ;;  %8909 = vmatpush3.msra.mxu1 %v3650_v19  ;;  %v3689_v0 = vld [vmem:[%s13062_s14 + $0x668] sm:$0xff]  ;;  %v3704_v19 = vld [vmem:[%s13062_s14 + $0x6e0] sm:$0xff] }
0x1141   : > { %8875 = vmatprep.subr.mxu0 %v3633_v3  ;;  %8910 = vmatprep.subr.mxu1 %v3665_v4  ;;  %v3721_v2 = vld [vmem:[%s13062_s14 + $0x768] sm:$0xff]  ;;  %v3736_v3 = vld [vmem:[%s13062_s14 + $0x7e0] sm:$0xff] }
0x1142   : > { %8876 = vmatpush3.msra.mxu0 %v3617_v49  ;;  %8911 = vmatpush3.msra.mxu1 %v3649_v50  ;;  %v3688_v4 = vld [vmem:[%s13062_s14 + $0x660] sm:$0xff]  ;;  %v3703_v50 = vld [vmem:[%s13062_s14 + $0x6d8] sm:$0xff] }
0x1143   : > { %8877 = vmatprep.subr.mxu0 %v3632_v5  ;;  %8912 = vmatprep.subr.mxu1 %v3664_v6  ;;  %v3720_v49 = vld [vmem:[%s13062_s14 + $0x760] sm:$0xff]  ;;  %v3735_v5 = vld [vmem:[%s13062_s14 + $0x7d8] sm:$0xff] }
0x1144   : > { %8878 = vmatpush3.msra.mxu0 %v3616_v7  ;;  %8913 = vmatpush3.msra.mxu1 %v3648_v8  ;;  %v3687_v6 = vld [vmem:[%s13062_s14 + $0x658] sm:$0xff]  ;;  %v3702_v8 = vld [vmem:[%s13062_s14 + $0x6d0] sm:$0xff] }
0x1145   : > { %8879 = vmatprep.subr.mxu0 %v3631_v10  ;;  %8914 = vmatprep.subr.mxu1 %v3663_v11  ;;  %v3719_v7 = vld [vmem:[%s13062_s14 + $0x758] sm:$0xff]  ;;  %v3734_v10 = vld [vmem:[%s13062_s14 + $0x7d0] sm:$0xff] }
0x1146   : > { %8880 = vmatpush3.msra.mxu0 %v3615_v22  ;;  %8915 = vmatpush3.msra.mxu1 %v3647_v23  ;;  %v3686_v11 = vld [vmem:[%s13062_s14 + $0x650] sm:$0xff]  ;;  %v3733_v22 = vld [vmem:[%s13062_s14 + $0x7c8] sm:$0xff] }
0x1147   : > { %8881 = vmatprep.subr.mxu0 %v3630_v24  ;;  %8916 = vmatprep.subr.mxu1 %v3662_v25  ;;  %v3685_v23 = vld [vmem:[%s13062_s14 + $0x648] sm:$0xff]  ;;  %v3700_v25 = vld [vmem:[%s13062_s14 + $0x6c0] sm:$0xff] }
0x1148   : > { %8882 = vmatpush3.msra.mxu0 %v3614_v28  ;;  %8917 = vmatpush3.msra.mxu1 %v3646_v29  ;;  %v3717_v24 = vld [vmem:[%s13062_s14 + $0x748] sm:$0xff]  ;;  %v3684_v28 = vld [vmem:[%s13062_s14 + $0x640] sm:$0xff] }
0x1149   : > { %8883 = vmatprep.subr.mxu0 %v3629_v32  ;;  %8918 = vmatprep.subr.mxu1 %v3661_v33  ;;  %v3716_v29 = vld [vmem:[%s13062_s14 + $0x740] sm:$0xff]  ;;  %v3683_v32 = vld [vmem:[%s13062_s14 + $0x638] sm:$0xff] }
0x114a   : > { %8884 = vmatpush3.msra.mxu0 %v3613_v41  ;;  %8919 = vmatpush3.msra.mxu1 %v3645_v15  ;;  %v3715_v33 = vld [vmem:[%s13062_s14 + $0x738] sm:$0xff]  ;;  %v3714_v41 = vld [vmem:[%s13062_s14 + $0x730] sm:$0xff]  ;;  %v3697_v15 = vld [vmem:[%s13062_s14 + $0x6a8] sm:$0xff] }
0x114b   : > { %8885 = vmatprep.subr.mxu0 %v3628_v42  ;;  %8920 = vmatprep.subr.mxu1 %v3660_v44  ;;  %v3729_v42 = vld [vmem:[%s13062_s14 + $0x7a8] sm:$0xff] }
0x114c   : > { %8886 = vmatpush3.msra.mxu0 %v3612_v43  ;;  %8921 = vmatpush3.msra.mxu1 %v3644_v45  ;;  %v3681_v44 = vld [vmem:[%s13062_s14 + $0x628] sm:$0xff]  ;;  %v3696_v43 = vld [vmem:[%s13062_s14 + $0x6a0] sm:$0xff] }
0x114d   : > { %4092 = vmatmul.mubr.f32.vlgmr.msra.gmra.mxu0 %v3476_v47  ;;  %4162 = vmatmul.mubr.f32.vlgmr.msra.gmra.mxu1 %v3478_v48  ;;  %v3728_v45 = vld [vmem:[%s13062_s14 + $0x7a0] sm:$0xff]  ;;  %v3695_v48 = vld [vmem:[%s13062_s14 + $0x698] sm:$0xff] }
0x114e   : > { %8925 = vmatprep.subr.mxu0 %v3707_v52  ;;  %8960 = vmatprep.subr.mxu1 %v3739_v53  ;;  %v3712_v47 = vld [vmem:[%s13062_s14 + $0x720] sm:$0xff]  ;;  %v3727_v52 = vld [vmem:[%s13062_s14 + $0x798] sm:$0xff]  ;;  %v2868_v53 = vrot.slane %v11100_v54, %v11054_v37 }
0x114f   : > { %8926 = vmatpush3.msra.mxu0 %v3691_v18  ;;  %4231 = vmatprep.mubr.f32.mxu0 %v3481_v55  ;;  %v2876_v18 = vrot.slane %v11100_v54, %v11057_v38  ;;  %v3679_v55 = vld [vmem:[%s13062_s14 + $0x618] sm:$0xff]  ;;  %v3726_v54 = vld [vmem:[%s13062_s14 + $0x790] sm:$0xff] }
0x1150   : > { %8961 = vmatpush3.msra.mxu1 %v3723_v56  ;;  %4301 = vmatprep.mubr.f32.mxu1 %v3483_v57  ;;  %v3711_v56 = vld [vmem:[%s13062_s14 + $0x718] sm:$0xff]  ;;  %v3694_v57 = vld [vmem:[%s13062_s14 + $0x690] sm:$0xff] }
0x1151   : > { %8927 = vmatprep.subr.mxu0 %v3706_v58  ;;  %8962 = vmatprep.subr.mxu1 %v3738_v59  ;;  %v3678_v58 = vld [vmem:[%s13062_s14 + $0x610] sm:$0xff] }
0x1152   : > { %8928 = vmatpush3.msra.mxu0 %v3690_v60  ;;  %8963 = vmatpush3.msra.mxu1 %v3722_v61  ;;  %v3710_v59 = vld [vmem:[%s13062_s14 + $0x710] sm:$0xff]  ;;  %v3693_v60 = vld [vmem:[%s13062_s14 + $0x688] sm:$0xff] }
0x1153   : > { %8929 = vmatprep.subr.mxu0 %v3705_v62  ;;  %8964 = vmatprep.subr.mxu1 %v3737_v63  ;;  %v3725_v61 = vld [vmem:[%s13062_s14 + $0x788] sm:$0xff]  ;;  %v3393_v62 = vadd.f32 %v11288_v9, %v2868_v53  ;;  %v3464_v63 = vadd.f32 %v11300_v14, %v2876_v18  ;;  %v3724_v9 = vld [vmem:[%s13062_s14 + $0x780] sm:$0xff] }
0x1154   : > { %8930 = vmatpush3.msra.mxu0 %v3689_v0  ;;  %8965 = vmatpush3.msra.mxu1 %v3721_v2  ;;  %v3677_v0 = vld [vmem:[%s13062_s14 + $0x608] sm:$0xff]  ;;  %v3676_v14 = vld [vmem:[%s13062_s14 + $0x600] sm:$0xff] }
0x1155   : > { %8931 = vmatprep.subr.mxu0 %v3704_v19  ;;  %8966 = vmatprep.subr.mxu1 %v3736_v3  ;;  %v3709_v2 = vld [vmem:[%s13062_s14 + $0x708] sm:$0xff]  ;;  %v3692_v19 = vld [vmem:[%s13062_s14 + $0x680] sm:$0xff] }
0x1156   : > { %8932 = vmatpush3.msra.mxu0 %v3688_v4  ;;  %8967 = vmatpush3.msra.mxu1 %v3720_v49  ;;  %v3708_v3 = vld [vmem:[%s13062_s14 + $0x700] sm:$0xff]  ;;  %v3480_v4 = vmax.f32 %v3393_v62, 0.0  ;;  %v3482_v49 = vmax.f32 %v3464_v63, 0.0  ;;  %v8184_v62 = vld [vmem:[%s13106_s22 + $0x88] sm:$0xff] }
0x1157   : > { %8933 = vmatprep.subr.mxu0 %v3703_v50  ;;  %8968 = vmatprep.subr.mxu1 %v3735_v5  ;;  %v8176_v63 = vld [vmem:[%s13104_s23 + $0x80] sm:$0xff] }
0x1158   : > { %8934 = vmatpush3.msra.mxu0 %v3687_v6  ;;  %8969 = vmatpush3.msra.mxu1 %v3719_v7 }
0x1159   : > { %8935 = vmatprep.subr.mxu0 %v3702_v8  ;;  %8970 = vmatprep.subr.mxu1 %v3734_v10  ;;  %v8173_v10 = vld [vmem:[%s13063_s15] ss:$0 sm:$0xff] }
0x115a   : > { %8936 = vmatpush3.msra.mxu0 %v3686_v11  ;;  %8971 = vmatpush3.msra.mxu1 %v3718_v12 }
0x115b   : > { %8937 = vmatprep.subr.mxu0 %v3701_v13  ;;  %8972 = vmatprep.subr.mxu1 %v3733_v22 }
0x115c   : > { %8938 = vmatpush3.msra.mxu0 %v3685_v23  ;;  %8973 = vmatpush3.msra.mxu1 %v3717_v24 }
0x115d   : > { %8939 = vmatprep.subr.mxu0 %v3700_v25  ;;  %8974 = vmatprep.subr.mxu1 %v3732_v26 }
0x115e   : > { %8940 = vmatpush3.msra.mxu0 %v3684_v28  ;;  %8975 = vmatpush3.msra.mxu1 %v3716_v29 }
0x115f   : > { %8941 = vmatprep.subr.mxu0 %v3699_v30  ;;  %8976 = vmatprep.subr.mxu1 %v3731_v31 }
0x1160   : > { %8942 = vmatpush3.msra.mxu0 %v3683_v32  ;;  %8977 = vmatpush3.msra.mxu1 %v3715_v33 }
0x1161   : > { %8943 = vmatprep.subr.mxu0 %v3698_v34  ;;  %8978 = vmatprep.subr.mxu1 %v3730_v39 }
0x1162   : > { %8944 = vmatpush3.msra.mxu0 %v3682_v40  ;;  %8979 = vmatpush3.msra.mxu1 %v3714_v41 }
0x1163   : > { %8945 = vmatprep.subr.mxu0 %v3697_v15  ;;  %8980 = vmatprep.subr.mxu1 %v3729_v42 }
0x1164   : > { %8946 = vmatpush3.msra.mxu0 %v3681_v44  ;;  %8981 = vmatpush3.msra.mxu1 %v3713_v51 }
0x1165   : > { %8947 = vmatprep.subr.mxu0 %v3696_v43  ;;  %8982 = vmatprep.subr.mxu1 %v3728_v45 }
0x1166   : > { %8948 = vmatpush3.msra.mxu0 %v3680_v46  ;;  %8983 = vmatpush3.msra.mxu1 %v3712_v47 }
0x1167   : > { %8949 = vmatprep.subr.mxu0 %v3695_v48  ;;  %8984 = vmatprep.subr.mxu1 %v3727_v52 }
0x1168   : > { %8950 = vmatpush3.msra.mxu0 %v3679_v55  ;;  %8985 = vmatpush3.msra.mxu1 %v3711_v56 }
0x1169   : > { %8951 = vmatprep.subr.mxu0 %v3694_v57  ;;  %8986 = vmatprep.subr.mxu1 %v3726_v54 }
0x116a   : > { %8952 = vmatpush3.msra.mxu0 %v3678_v58  ;;  %8987 = vmatpush3.msra.mxu1 %v3710_v59  ;;  %v8179_v58 = vld [vmem:[%s13104_s23 + $0x98] sm:$0xff] }
0x116b   : > { %8953 = vmatprep.subr.mxu0 %v3693_v60  ;;  %8988 = vmatprep.subr.mxu1 %v3725_v61  ;;  %v8186_v59 = vld [vmem:[%s13106_s22 + $0x98] sm:$0xff]  ;;  %v8185_v60 = vld [vmem:[%s13106_s22 + $0x90] sm:$0xff]  ;;  %v8177_v61 = vld [vmem:[%s13104_s23 + $0x88] sm:$0xff] }
0x116c   : > { %8954 = vmatpush3.msra.mxu0 %v3677_v0  ;;  %8989 = vmatpush3.msra.mxu1 %v3709_v2  ;;  %v8183_v0 = vld [vmem:[%s13106_s22 + $0x80] sm:$0xff] }
0x116d   : > { %8955 = vmatprep.subr.mxu0 %v3692_v19  ;;  %8990 = vmatprep.subr.mxu1 %v3724_v9 }
0x116e   : > { %8956 = vmatpush3.msra.mxu0 %v3676_v14  ;;  %8991 = vmatpush3.msra.mxu1 %v3708_v3  ;;  %v8174_v3 = vld [vmem:[%s13066_s18] ss:$0 sm:$0xff] }
0x116f   : > { %4232 = vmatmul.mubr.f32.vlgmr.msra.gmra.mxu0 %v3480_v4  ;;  %4302 = vmatmul.mubr.f32.vlgmr.msra.gmra.mxu1 %v3482_v49  ;;  %v8175_v49 = vld [vmem:[%s13067_s19] ss:$0 sm:$0xff] }
0x1170   : > { %9567 = vmatprep.subr.mxu0 %v9913_v1  ;;  %9578 = vmatprep.subr.mxu1 %v9913_v1 }
0x1171   : > { %9575 = vmatprep.mubr.msk.f32.mxu0 %vm9914_vm1, %v9913_v1  ;;  %9586 = vmatprep.mubr.msk.f32.mxu1 %vm9914_vm1, %v9913_v1 }
0x1172   : > { %9568 = vmatpush3.msra.mxu0 %v8179_v58  ;;  %9579 = vmatpush3.msra.mxu1 %v8186_v59 }
0x1173   : > { %9569 = vmatprep.subr.mxu0 %v9913_v1  ;;  %9580 = vmatprep.subr.mxu1 %v9913_v1 }
0x1174   : > { %9581 = vmatpush3.msra.mxu1 %v8185_v60  ;;  %v8210_v60 = vld [vmem:[%s13106_s22 + $0xb0] sm:$0xff] }
0x1175   : > { %9582 = vmatprep.subr.mxu1 %v9913_v1 }
0x1176   : > { %9583 = vmatpush3.msra.mxu1 %v8184_v62  ;;  %v8208_v62 = vld [vmem:[%s13106_s22 + $0xa0] sm:$0xff] }
0x1177   : > { %9584 = vmatprep.subr.mxu1 %v9913_v1 }
0x1178   : > { %9585 = vmatpush3.msra.mxu1 %v8183_v0 }
0x1179   : > { %9600 = vmatprep.subr.mxu1 %v9913_v1 }
0x11ca   : > { %v8747_v50 = vpop.f32.mrf.mxu0  ;;  %v8782_v6 = vpop.f32.mrf.mxu1 }
0x11cc   : > { %v8748_v5 = vpop.f32.mrf.mxu0  ;;  %v8783_v11 = vpop.f32.mrf.mxu1 }
0x11cd   : > { %v8749_v8 = vadd.f32 %v8748_v5, %v8747_v50  ;;  %v8784_v24 = vadd.f32 %v8783_v11, %v8782_v6  ;;  %v8193_v6 = vld [vmem:[%s13109_s8 + $0x98] sm:$0xff] }
0x11ce   : > { %v8204_v11 = vld [vmem:[%s13104_s23 + $0xb8] sm:$0xff] }
0x11cf   : > { %v3814_v13 = vadd.f32 %v8749_v8, %v8173_v10  ;;  %v8191_v8 = vld [vmem:[%s13109_s8 + $0x88] sm:$0xff]  ;;  %v8190_v10 = vld [vmem:[%s13109_s8 + $0x80] sm:$0xff] }
0x11d1   : > { %v3884_v26 = vadd.f32 %v8784_v24, %v3814_v13  ;;  %v8202_v13 = vld [vmem:[%s13104_s23 + $0xa8] sm:$0xff]  ;;  %v8217_v24 = vld [vmem:[%s13109_s8 + $0xb0] sm:$0xff] }
0x11eb   : > { %v8817_v7 = vpop.f32.mrf.mxu0  ;;  %v8852_v22 = vpop.f32.mrf.mxu1 }
0x11ed   : > { %v8818_v12 = vpop.f32.mrf.mxu0  ;;  %v8853_v28 = vpop.f32.mrf.mxu1 }
0x11ee   : > { %v8819_v25 = vadd.f32 %v8818_v12, %v8817_v7  ;;  %v8854_v32 = vadd.f32 %v8853_v28, %v8852_v22  ;;  %v8192_v7 = vld [vmem:[%s13109_s8 + $0x90] sm:$0xff]  ;;  %v8201_v22 = vld [vmem:[%s13104_s23 + $0xa0] sm:$0xff] }
0x11ef   : > { %v8203_v12 = vld [vmem:[%s13104_s23 + $0xb0] sm:$0xff]  ;;  %v8181_v28 = vld [vmem:[%s13111_s24 + $0x4] ss:$0 sm:$0xff] }
0x11f0   : > { %v3954_v30 = vadd.f32 %v8819_v25, %v3884_v26  ;;  %v8216_v25 = vld [vmem:[%s13109_s8 + $0xa8] sm:$0xff]  ;;  %v8215_v26 = vld [vmem:[%s13109_s8 + $0xa0] sm:$0xff] }
0x11f2   : > { %v4024_v34 = vadd.f32 %v8854_v32, %v3954_v30 }
0x120d   : > { %v8887_v23 = vpop.f32.mrf.mxu0  ;;  %v8922_v31 = vpop.f32.mrf.mxu1 }
0x120f   : > { %v8888_v29 = vpop.f32.mrf.mxu0  ;;  %v8923_v39 = vpop.f32.mrf.mxu1 }
0x1210   : > { %v8889_v33 = vadd.f32 %v8888_v29, %v8887_v23  ;;  %v8924_v42 = vadd.f32 %v8923_v39, %v8922_v31  ;;  %v8218_v23 = vld [vmem:[%s13109_s8 + $0xb8] sm:$0xff]  ;;  %v8188_v29 = vld [vmem:[%s13112_s7 + $0x4] ss:$0 sm:$0xff] }
0x1212   : > { %v4094_v40 = vadd.f32 %v8889_v33, %v4024_v34 }
0x1214   : > { %v4164_v43 = vadd.f32 %v8924_v42, %v4094_v40 }
0x122f   : > { %v8957_v41 = vpop.f32.mrf.mxu0  ;;  %v8992_v15 = vpop.f32.mrf.mxu1 }
0x1231   : > { %v8958_v44 = vpop.f32.mrf.mxu0  ;;  %v8993_v51 = vpop.f32.mrf.mxu1 }
0x1232   : > { %v8959_v45 = vadd.f32 %v8958_v44, %v8957_v41  ;;  %v8994_v47 = vadd.f32 %v8993_v51, %v8992_v15  ;;  %v8195_v41 = vld [vmem:[%s13113_s9 + $0x4] ss:$0 sm:$0xff] }
0x1234   : > { %v4234_v46 = vadd.f32 %v8959_v45, %v4164_v43 }
0x1236   : > { %v4304_v48 = vadd.f32 %v8994_v47, %v4234_v46 }
0x1238   : > { %v4307_v52 = vadd.f32 %v4304_v48, %v10532_v27  ;;  %v8178_v27 = vld [vmem:[%s13104_s23 + $0x90] sm:$0xff] }
0x1239   : > { %9570 = vmatpush3.msra.mxu0 %v8178_v27  ;;  %v8211_v27 = vld [vmem:[%s13106_s22 + $0xb8] sm:$0xff] }
0x123a   : > { %v4310_v53 = vsel %vm781_vm3, %v4307_v52, 0.0  ;;  %9571 = vmatprep.subr.mxu0 %v9913_v1 }
0x123b   : > { %4311 = vadd.xlane.f32.xlu0 %v4310_v53  ;;  %9572 = vmatpush3.msra.mxu0 %v8177_v61  ;;  %v8209_v61 = vld [vmem:[%s13106_s22 + $0xa8] sm:$0xff] }
0x123c   : > { %9573 = vmatprep.subr.mxu0 %v9913_v1 }
0x123d   : > { %9574 = vmatpush3.msra.mxu0 %v8176_v63 }
0x123e   : > { %9589 = vmatprep.subr.mxu0 %v9913_v1 }
0x12c4   : > { %v4312_v18 = vpop.xlane.xlu0 %4311 }
0x12c5   : > { %v4313_v55 = vmul.f32 0.03125, %v4312_v18 }
0x12c7   : > { %v4314_v56 = vsub.f32 %v4307_v52, %v4313_v55 }
0x12c9   : > { %v4315_v57 = vmul.f32 %v4314_v56, %v4314_v56 }
0x12cb   : > { %v4316_v54 = vsel %vm781_vm3, %v4315_v57, 0.0 }
0x12cc   : > { %4317 = vadd.xlane.f32.xlu1 %v4316_v54 }
0x1355   : > { %v4318_v2 = vpop.xlane.xlu1 %4317 }
0x1356   : > { %v4319_v19 = vmul.f32 0.03125, %v4318_v2  ;;  %v8206_v2 = vld [vmem:[%s13111_s24 + $0x5] ss:$0 sm:$0xff] }
0x1358   : > { %v4320_v9 = vadd.f32 1e-05, %v4319_v19  ;;  %v8213_v19 = vld [vmem:[%s13112_s7 + $0x5] ss:$0 sm:$0xff] }
0x135a   : > { %9829 = vrsqrt.f32 %v4320_v9 }
0x1367   : > { %v9830_v14 = vpop.eup %9829 }
0x1368   : > { %v4322_v4 = vmul.f32 %v9830_v14, %v4314_v56 }
0x136a   : > { %v4329_v50 = vmul.f32 %v8174_v3, %v4322_v4  ;;  %v8220_v4 = vld [vmem:[%s13113_s9 + $0x5] ss:$0 sm:$0xff] }
0x136c   : > { %v11598_v5 = vadd.f32 %v8175_v49, %v4329_v50 }
0x136e   : > { %9576 = vmatmul.mubr.msk.f32.vlgmr.msra.gmra.mxu0 %vm781_vm3, %v11598_v5  ;;  %9587 = vmatmul.mubr.msk.f32.vlgmr.msra.gmra.mxu1 %vm781_vm3, %v11598_v5 }
0x136f   : > { %9590 = vmatpush3.msra.mxu0 %v8193_v6  ;;  %9597 = vmatprep.mubr.msk.f32.mxu0 %vm9914_vm1, %v9913_v1 }
0x1370   : > { %9591 = vmatprep.subr.mxu0 %v9913_v1  ;;  %9602 = vmatprep.mubr.msk.f32.mxu1 %vm9914_vm1, %v9913_v1 }
0x1371   : > { %9592 = vmatpush3.msra.mxu0 %v8192_v7 }
0x1372   : > { %9593 = vmatprep.subr.mxu0 %v9913_v1 }
0x1373   : > { %9594 = vmatpush3.msra.mxu0 %v8191_v8 }
0x1374   : > { %9595 = vmatprep.subr.mxu0 %v9913_v1 }
0x1375   : > { %9596 = vmatpush3.msra.mxu0 %v8190_v10 }
0x1376   : > { %9598 = vmatmul.mubr.msk.f32.vlgmr.msra.gmra.mxu0 %vm781_vm3, %v11598_v5  ;;  %9610 = vmatprep.subr.mxu0 %v9913_v1 }
0x1377   : > { %9611 = vmatpush3.msra.mxu0 %v8204_v11  ;;  %9618 = vmatprep.mubr.msk.f32.mxu0 %vm9914_vm1, %v9913_v1 }
0x1378   : > { %9612 = vmatprep.subr.mxu0 %v9913_v1 }
0x1379   : > { %9613 = vmatpush3.msra.mxu0 %v8203_v12 }
0x137a   : > { %9614 = vmatprep.subr.mxu0 %v9913_v1 }
0x137b   : > { %9615 = vmatpush3.msra.mxu0 %v8202_v13 }
0x137c   : > { %9616 = vmatprep.subr.mxu0 %v9913_v1 }
0x137d   : > { %9617 = vmatpush3.msra.mxu0 %v8201_v22 }
0x137e   : > { %9619 = vmatmul.mubr.msk.f32.vlgmr.msra.gmra.mxu0 %vm781_vm3, %v11598_v5  ;;  %9632 = vmatprep.subr.mxu0 %v9913_v1 }
0x137f   : > { %9633 = vmatpush3.msra.mxu0 %v8218_v23  ;;  %9640 = vmatprep.mubr.msk.f32.mxu0 %vm9914_vm1, %v9913_v1 }
0x1380   : > { %9634 = vmatprep.subr.mxu0 %v9913_v1 }
0x1381   : > { %9635 = vmatpush3.msra.mxu0 %v8217_v24  ;;  %v8225_v24 = vld [vmem:[%s13058_s10 + $0x28] sm:$0xff] }
0x1382   : > { %9636 = vmatprep.subr.mxu0 %v9913_v1 }
0x1383   : > { %9637 = vmatpush3.msra.mxu0 %v8216_v25 }
0x1384   : > { %9638 = vmatprep.subr.mxu0 %v9913_v1 }
0x1385   : > { %9639 = vmatpush3.msra.mxu0 %v8215_v26 }
0x1386   : > { %9641 = vmatmul.mubr.msk.f32.vlgmr.msra.gmra.mxu0 %vm781_vm3, %v11598_v5  ;;  %9653 = vmatprep.subr.mxu0 %v9913_v1 }
0x1387   : > { %9655 = vmatprep.mubr.msk.f32.mxu0 %vm9914_vm1, %v9913_v1  ;;  %9654 = vmatpush3.msra.mxu0 %v8225_v24  ;;  %v8269_v24 = vld [vmem:[%s13109_s8 + $0xe8] sm:$0xff] }
0x1388   : > { %9663 = vmatprep.subr.mxu0 %v9913_v1 }
0x142e   : > { %v4419_v30 = vpop.f32.mrf.mxu0  ;;  %v4503_v31 = vpop.f32.mrf.mxu1 }
0x142f   : > { %v4420_v32 = vadd.f32 %v8181_v28, %v4419_v30  ;;  %v4504_v33 = vadd.f32 %v8188_v29, %v4503_v31  ;;  %v8200_v29 = vld [vmem:[%s13058_s10 + $0x20] sm:$0xff]  ;;  %v8238_v30 = vld [vmem:[%s13106_s22 + $0xd8] sm:$0xff]  ;;  %v8237_v31 = vld [vmem:[%s13106_s22 + $0xd0] sm:$0xff] }
0x1430   : > { %v9577_v34 = vpop.f32.mrf.mxu0  ;;  %v9588_v39 = vpop.f32.mrf.mxu1 }
0x1431   : > { %v4423_v40 = vmul.f32 0.35355338, %v4420_v32  ;;  %9601 = vmatpush3.xpose.msk.msra.mxu1 %vm1018_vm4, %v4504_v33  ;;  %v8236_v32 = vld [vmem:[%s13106_s22 + $0xc8] sm:$0xff]  ;;  %v8235_v33 = vld [vmem:[%s13106_s22 + $0xc0] sm:$0xff]  ;;  %v8231_v34 = vld [vmem:[%s13104_s23 + $0xd8] sm:$0xff] }
0x1432   : > { %9605 = vmatprep.subr.mxu1 %v9913_v1 }
0x1434   : > { %9603 = vmatmul.mubr.msk.f32.vlgmr.msra.gmra.mxu1 %vm1018_vm4, %v4423_v40  ;;  %v8230_v40 = vld [vmem:[%s13104_s23 + $0xd0] sm:$0xff] }
0x1435   : > { %9607 = vmatprep.mubr.msk.f32.mxu1 %vm9914_vm1, %v9913_v1 }
0x1436   : > { %v4586_v15 = vpop.f32.mrf.mxu0 }
0x1437   : > { %v4587_v42 = vadd.f32 %v8195_v41, %v4586_v15  ;;  %v8229_v15 = vld [vmem:[%s13104_s23 + $0xc8] sm:$0xff] }
0x1438   : > { %v9599_v44 = vpop.f32.mrf.mxu0 }
0x1439   : > { %9606 = vmatpush3.msra.mxu1 %v4587_v42  ;;  %v8228_v44 = vld [vmem:[%s13104_s23 + $0xc0] sm:$0xff] }
0x143a   : > { %9621 = vmatprep.subr.mxu1 %v9913_v1 }
0x143e   : > { %v4831_v51 = vpop.f32.mrf.mxu0 }
0x143f   : > { %v4832_v9 = vadd.f32 %v8206_v2, %v4831_v51 }
0x1440   : > { %v9620_v43 = vpop.f32.mrf.mxu0 }
0x1441   : > { %v4835_v50 = vmul.f32 0.35355338, %v4832_v9  ;;  %v8245_v43 = vld [vmem:[%s13109_s8 + $0xd8] sm:$0xff] }
0x1446   : > { %v4998_v45 = vpop.f32.mrf.mxu0 }
0x1447   : > { %v4999_v6 = vadd.f32 %v8220_v4, %v4998_v45  ;;  %v8244_v45 = vld [vmem:[%s13109_s8 + $0xd0] sm:$0xff] }
0x1448   : > { %v9642_v46 = vpop.f32.mrf.mxu0 }
0x1449   : > { %v8240_v46 = vld [vmem:[%s13112_s7 + $0x6] ss:$0 sm:$0xff] }
0x14f4   : > { %v4662_v47 = vpop.f32.mrf.mxu1 }
0x14f5   : > { %v4666_v48 = vsel %vm1018_vm4, %v4662_v47, -inf }
0x14f6   : > { %4667 = vmax.xlane.f32.xlu0 %v4666_v48  ;;  %v9604_v52 = vpop.f32.mrf.mxu1 }
0x157f   : > { %v4668_v53 = vpop.xlane.xlu0 %4667 }
0x1580   : > { %v4669_v18 = vsub.f32 %v4662_v47, %v4668_v53  ;;  %v8243_v47 = vld [vmem:[%s13109_s8 + $0xc8] sm:$0xff]  ;;  %v8242_v53 = vld [vmem:[%s13109_s8 + $0xc0] sm:$0xff] }
0x1582   : > { %v4670_v55 = vmul.f32 1.442695, %v4669_v18 }
0x1584   : > { %9831 = vpow2.f32 %v4670_v55 }
0x1591   : > { %v9832_v56 = vpop.eup %9831 }
0x1592   : > { %v4672_v57 = vsel %vm1018_vm4, %v9832_v56, 0.0 }
0x1593   : > { %4673 = vadd.xlane.f32.xlu1 %v4672_v57  ;;  %v8233_v57 = vld [vmem:[%s13111_s24 + $0x6] ss:$0 sm:$0xff] }
0x161c   : > { %v4674_v54 = vpop.xlane.xlu1 %4673 }
0x161d   : > { %9833 = vrcp.f32 %v4674_v54 }
0x162a   : > { %v9834_v58 = vpop.eup %9833 }
0x162b   : > { %v4676_v59 = vmul.f32 %v9834_v58, %v9832_v56 }
0x162d   : > { %9608 = vmatmul.mubr.msk.f32.vlgmr.msra.gmra.mxu1 %vm1018_vm4, %v4676_v59 }
0x162e   : > { %9622 = vmatpush3.msra.mxu1 %v8211_v27  ;;  %9629 = vmatprep.mubr.msk.f32.mxu1 %vm9914_vm1, %v9913_v1 }
0x162f   : > { %9623 = vmatprep.subr.mxu1 %v9913_v1 }
0x1630   : > { %9624 = vmatpush3.msra.mxu1 %v8210_v60  ;;  %v8247_v60 = vld [vmem:[%s13113_s9 + $0x6] ss:$0 sm:$0xff] }
0x1631   : > { %9625 = vmatprep.subr.mxu1 %v9913_v1 }
0x1632   : > { %9626 = vmatpush3.msra.mxu1 %v8209_v61 }
0x1633   : > { %9627 = vmatprep.subr.mxu1 %v9913_v1 }
0x1634   : > { %9628 = vmatpush3.msra.mxu1 %v8208_v62 }
0x1635   : > { %9630 = vmatmul.mubr.msk.f32.vlgmr.msra.gmra.mxu1 %vm781_vm3, %v11598_v5  ;;  %9643 = vmatprep.subr.mxu1 %v9913_v1 }
0x1636   : > { %9645 = vmatprep.mubr.msk.f32.mxu1 %vm9914_vm1, %v9913_v1 }
0x16ed   : > { %v4746_v63 = vpop.f32.mrf.mxu1 }
0x16ef   : > { %v9609_v0 = vpop.f32.mrf.mxu1 }
0x16f5   : > { %v4915_v14 = vpop.f32.mrf.mxu1 }
0x16f6   : > { %v4916_v3 = vadd.f32 %v8213_v19, %v4915_v14 }
0x16f7   : > { %v9631_v49 = vpop.f32.mrf.mxu1 }
0x16f8   : > { %9644 = vmatpush3.xpose.msk.msra.mxu1 %vm1018_vm4, %v4916_v3 }
0x16f9   : > { %9648 = vmatprep.subr.mxu1 %v9913_v1 }
0x16fb   : > { %9646 = vmatmul.mubr.msk.f32.vlgmr.msra.gmra.mxu1 %vm1018_vm4, %v4835_v50  ;;  %v8252_v50 = vld [vmem:[%s13058_s10 + $0x30] sm:$0xff] }
0x16fc   : > { %9649 = vmatpush3.msra.mxu1 %v4999_v6  ;;  %9650 = vmatprep.mubr.msk.f32.mxu1 %vm9914_vm1, %v9913_v1 }
0x16fd   : > { %9658 = vmatprep.subr.mxu1 %v9913_v1 }
0x17bb   : > { %v5074_v7 = vpop.f32.mrf.mxu1 }
0x17bc   : > { %v5078_v8 = vsel %vm1018_vm4, %v5074_v7, -inf }
0x17bd   : > { %5079 = vmax.xlane.f32.xlu0 %v5078_v8  ;;  %v9647_v10 = vpop.f32.mrf.mxu1 }
0x17be   : > { %v8257_v10 = vld [vmem:[%s13104_s23 + $0xf8] sm:$0xff] }
0x1846   : > { %v5080_v11 = vpop.xlane.xlu0 %5079 }
0x1847   : > { %v5081_v12 = vsub.f32 %v5074_v7, %v5080_v11  ;;  %v8256_v11 = vld [vmem:[%s13104_s23 + $0xf0] sm:$0xff] }
0x1849   : > { %v5082_v13 = vmul.f32 1.442695, %v5081_v12  ;;  %v8255_v12 = vld [vmem:[%s13104_s23 + $0xe8] sm:$0xff] }
0x184b   : > { %9835 = vpow2.f32 %v5082_v13  ;;  %v8254_v13 = vld [vmem:[%s13104_s23 + $0xe0] sm:$0xff] }
0x1858   : > { %v9836_v22 = vpop.eup %9835 }
0x1859   : > { %v5084_v23 = vsel %vm1018_vm4, %v9836_v22, 0.0 }
0x185a   : > { %5085 = vadd.xlane.f32.xlu1 %v5084_v23  ;;  %v8270_v23 = vld [vmem:[%s13109_s8 + $0xf0] sm:$0xff] }
0x18e3   : > { %v5086_v25 = vpop.xlane.xlu1 %5085 }
0x18e4   : > { %9837 = vrcp.f32 %v5086_v25  ;;  %v8268_v25 = vld [vmem:[%s13109_s8 + $0xe0] sm:$0xff] }
0x18f1   : > { %v9838_v26 = vpop.eup %9837 }
0x18f2   : > { %v5088_v28 = vmul.f32 %v9838_v26, %v9836_v22  ;;  %v8271_v22 = vld [vmem:[%s13109_s8 + $0xf8] sm:$0xff]  ;;  %s9851_s8 = scalar_lea.vmem %s8012_s3, 16 }
0x18f3   : > { %v8264_v26 = vld [vmem:[%s13106_s22 + $0xf8] sm:$0xff]  ;;  %p9852_p11 = scmp.ne.s32.totalorder %s8012_s3, %s9851_s8  ;;  %p9859_p1 = scmp.lt.s32.totalorder %s9857_s27, %s9851_s8 }
0x18f4   : > { %9651 = vmatmul.mubr.msk.f32.vlgmr.msra.gmra.mxu1 %vm1018_vm4, %v5088_v28 }
0x18f5   : > { %9659 = vmatpush3.msra.mxu1 %v8200_v29  ;;  %9660 = vmatprep.mubr.msk.f32.mxu1 %vm9914_vm1, %v9913_v1  ;;  %v8263_v29 = vld [vmem:[%s13106_s22 + $0xf0] sm:$0xff]  ;;  %p9853_p12 = pnand %p9852_p11, %p10069_p5  ;;  %p9860_p2 = por %p9859_p1, %p9858_p0 }
0x18f6   : > { %9674 = vmatprep.subr.mxu1 %v9913_v1 }
0x18f7   : > { %p9854_p13 = pneg %p9853_p12 }
0x18f8   : > { %9661 = vmatmul.mubr.msk.f32.vlgmr.msra.gmra.mxu1 %vm1018_vm4, %v4746_v63 }
0x18f9   : > { %9675 = vmatpush3.msra.mxu1 %v8238_v30  ;;  %9682 = vmatprep.mubr.msk.f32.mxu1 %vm9914_vm1, %v9913_v1  ;;  %p9861_p3 = pnand %p9860_p2, %p9854_p13 }
0x18fa   : > { %9676 = vmatprep.subr.mxu1 %v9913_v1 }
0x18fb   : > { %9677 = vmatpush3.msra.mxu1 %v8237_v31  ;;  %v8262_v31 = vld [vmem:[%s13106_s22 + $0xe8] sm:$0xff] }
0x18fc   : > { %9678 = vmatprep.subr.mxu1 %v9913_v1 }
0x18fd   : > { %9679 = vmatpush3.msra.mxu1 %v8236_v32  ;;  %v8261_v32 = vld [vmem:[%s13106_s22 + $0xe0] sm:$0xff] }
0x18fe   : > { %9680 = vmatprep.subr.mxu1 %v9913_v1 }
0x18ff   : > { %9681 = vmatpush3.msra.mxu1 %v8235_v33 }
0x1900   : > { %9683 = vmatmul.mubr.msk.f32.vlgmr.msra.gmra.mxu1 %vm781_vm3, %v11598_v5  ;;  %9696 = vmatprep.subr.mxu1 %v9913_v1 }
0x1901   : > { %9698 = vmatprep.mubr.msk.f32.mxu1 %vm9914_vm1, %v9913_v1 }
0x19b4   : > { %v5158_v39 = vpop.f32.mrf.mxu1 }
0x19b5   : > { %9656 = vmatmul.mubr.msk.f32.vlgmr.msra.gmra.mxu0 %vm1018_vm4, %v5158_v39 }
0x19b6   : > { %9664 = vmatpush3.msra.mxu0 %v8231_v34  ;;  %v9652_v41 = vpop.f32.mrf.mxu1  ;;  %9671 = vmatprep.mubr.msk.f32.mxu0 %vm9914_vm1, %v9913_v1 }
0x19b7   : > { %9665 = vmatprep.subr.mxu0 %v9913_v1 }
0x19b8   : > { %9666 = vmatpush3.msra.mxu0 %v8230_v40  ;;  %v11772_v42 = vpop.f32.mrf.mxu1 }
0x19b9   : > { %9667 = vmatprep.subr.mxu0 %v9913_v1 }
0x19ba   : > { %9668 = vmatpush3.msra.mxu0 %v8229_v15  ;;  %v9662_v51 = vpop.f32.mrf.mxu1 }
0x19bb   : > { %9669 = vmatprep.subr.mxu0 %v9913_v1 }
0x19bc   : > { %9670 = vmatpush3.msra.mxu0 %v8228_v44 }
0x19bd   : > { %9672 = vmatmul.mubr.msk.f32.vlgmr.msra.gmra.mxu0 %vm781_vm3, %v11598_v5  ;;  %9685 = vmatprep.subr.mxu0 %v9913_v1 }
0x19be   : > { %9686 = vmatpush3.msra.mxu0 %v8245_v43  ;;  %9693 = vmatprep.mubr.msk.f32.mxu0 %vm9914_vm1, %v9913_v1  ;;  %v8259_v43 = vld [vmem:[%s13111_s24 + $0x7] ss:$0 sm:$0xff] }
0x19bf   : > { %9687 = vmatprep.subr.mxu0 %v9913_v1 }
0x19c0   : > { %v5473_v48 = vpop.f32.mrf.mxu1  ;;  %9688 = vmatpush3.msra.mxu0 %v8244_v45  ;;  %v8266_v45 = vld [vmem:[%s13112_s7 + $0x7] ss:$0 sm:$0xff]  ;;  %s7999_s7 = scalar_lea.sflag [#allocation3], %s672_s0 }
0x19c1   : > { %v5474_v52 = vadd.f32 %v8240_v46, %v5473_v48  ;;  %9689 = vmatprep.subr.mxu0 %v9913_v1 }
0x19c2   : > { %v9684_v18 = vpop.f32.mrf.mxu1  ;;  %9690 = vmatpush3.msra.mxu0 %v8243_v47 }
0x19c3   : > { %9691 = vmatprep.subr.mxu0 %v9913_v1  ;;  %9697 = vmatpush3.xpose.msk.msra.mxu1 %vm1018_vm4, %v5474_v52  ;;  %v8273_v52 = vld [vmem:[%s13113_s9 + $0x7] ss:$0 sm:$0xff] }
0x19c4   : > { %9692 = vmatpush3.msra.mxu0 %v8242_v53  ;;  %9701 = vmatprep.subr.mxu1 %v9913_v1 }
0x19c5   : > { %9694 = vmatmul.mubr.msk.f32.vlgmr.msra.gmra.mxu0 %vm781_vm3, %v11598_v5  ;;  %9706 = vmatprep.subr.mxu0 %v9913_v1 }
0x19c6   : > { %9708 = vmatprep.mubr.msk.f32.mxu0 %vm9914_vm1, %v9913_v1  ;;  %9707 = vmatpush3.msra.mxu0 %v8252_v50 }
0x19c7   : > { %9722 = vmatprep.subr.mxu0 %v9913_v1 }
0x1a75   : > { %v11809_v55 = vpop.f32.mrf.mxu0 }
0x1a76   : > { %v5307_v41 = vadd.f32 %v11772_v42, %v11809_v55 }
0x1a77   : > { %v9657_v56 = vpop.f32.mrf.mxu0 }
0x1a7d   : > { %v5389_v54 = vpop.f32.mrf.mxu0 }
0x1a7e   : > { %v5390_v58 = vadd.f32 %v8233_v57, %v5389_v54 }
0x1a7f   : > { %v9673_v59 = vpop.f32.mrf.mxu0 }
0x1a80   : > { %v5393_v27 = vmul.f32 0.35355338, %v5390_v58 }
0x1a82   : > { %9699 = vmatmul.mubr.msk.f32.vlgmr.msra.gmra.mxu1 %vm1018_vm4, %v5393_v27 }
0x1a83   : > { %9703 = vmatprep.mubr.msk.f32.mxu1 %vm9914_vm1, %v9913_v1 }
0x1a85   : > { %v5556_v61 = vpop.f32.mrf.mxu0 }
0x1a86   : > { %v5557_v62 = vadd.f32 %v8247_v60, %v5556_v61  ;;  %v8278_v61 = vld [vmem:[%s13058_s10 + $0x38] sm:$0xff] }
0x1a87   : > { %v9695_v63 = vpop.f32.mrf.mxu0 }
0x1a88   : > { %9702 = vmatpush3.msra.mxu1 %v5557_v62 }
0x1a89   : > { %9711 = vmatprep.subr.mxu1 %v9913_v1 }
0x1b42   : > { %v5632_v0 = vpop.f32.mrf.mxu1 }
0x1b43   : > { %v5636_v2 = vsel %vm1018_vm4, %v5632_v0, -inf }
0x1b44   : > { %5637 = vmax.xlane.f32.xlu0 %v5636_v2  ;;  %v9700_v19 = vpop.f32.mrf.mxu1 }
0x1bcd   : > { %v5638_v9 = vpop.xlane.xlu0 %5637 }
0x1bce   : > { %v5639_v14 = vsub.f32 %v5632_v0, %v5638_v9 }
0x1bd0   : > { %v5640_v3 = vmul.f32 1.442695, %v5639_v14  ;;  %v8281_v14 = vld [vmem:[%s13059_s11 + $0x1] ss:$0 sm:$0xff] }
0x1bd2   : > { %9839 = vpow2.f32 %v5640_v3 }
0x1bdf   : > { %v9840_v4 = vpop.eup %9839 }
0x1be0   : > { %v5642_v49 = vsel %vm1018_vm4, %v9840_v4, 0.0 }
0x1be1   : > { %5643 = vadd.xlane.f32.xlu1 %v5642_v49 }
0x1c6a   : > { %v5644_v6 = vpop.xlane.xlu1 %5643 }
0x1c6b   : > { %9841 = vrcp.f32 %v5644_v6 }
0x1c78   : > { %v9842_v7 = vpop.eup %9841 }
0x1c79   : > { %v5646_v8 = vmul.f32 %v9842_v7, %v9840_v4 }
0x1c7b   : > { %9704 = vmatmul.mubr.msk.f32.vlgmr.msra.gmra.mxu1 %vm1018_vm4, %v5646_v8 }
0x1c7c   : > { %9712 = vmatpush3.msra.mxu1 %v8257_v10  ;;  %9719 = vmatprep.mubr.msk.f32.mxu1 %vm9914_vm1, %v9913_v1 }
0x1c7d   : > { %9713 = vmatprep.subr.mxu1 %v9913_v1 }
0x1c7e   : > { %9714 = vmatpush3.msra.mxu1 %v8256_v11 }
0x1c7f   : > { %9715 = vmatprep.subr.mxu1 %v9913_v1 }
0x1c80   : > { %9716 = vmatpush3.msra.mxu1 %v8255_v12 }
0x1c81   : > { %9717 = vmatprep.subr.mxu1 %v9913_v1 }
0x1c82   : > { %9718 = vmatpush3.msra.mxu1 %v8254_v13  ;;  %v8335_v13 = vld [vmem:[%s13060_s12 + $0x388] sm:$0xff] }
0x1c83   : > { %9720 = vmatmul.mubr.msk.f32.vlgmr.msra.gmra.mxu1 %vm781_vm3, %v11598_v5  ;;  %9733 = vmatprep.subr.mxu1 %v9913_v1 }
0x1c84   : > { %9734 = vmatpush3.msra.mxu1 %v8271_v22  ;;  %9741 = vmatprep.mubr.msk.f32.mxu1 %vm9914_vm1, %v9913_v1  ;;  %v8337_v22 = vld [vmem:[%s13060_s12 + $0x398] sm:$0xff] }
0x1c85   : > { %9735 = vmatprep.subr.mxu1 %v9913_v1 }
0x1c86   : > { %9736 = vmatpush3.msra.mxu1 %v8270_v23  ;;  %v8336_v23 = vld [vmem:[%s13060_s12 + $0x390] sm:$0xff] }
0x1c87   : > { %9737 = vmatprep.subr.mxu1 %v9913_v1 }
0x1c88   : > { %9738 = vmatpush3.msra.mxu1 %v8269_v24  ;;  %v8319_v24 = vld [vmem:[%s13060_s12 + $0x308] sm:$0xff] }
0x1c89   : > { %9739 = vmatprep.subr.mxu1 %v9913_v1 }
0x1c8a   : > { %9740 = vmatpush3.msra.mxu1 %v8268_v25  ;;  %v8321_v25 = vld [vmem:[%s13060_s12 + $0x318] sm:$0xff] }
0x1c8b   : > { %9742 = vmatmul.mubr.msk.f32.vlgmr.msra.gmra.mxu1 %vm781_vm3, %v11598_v5  ;;  %9754 = vmatprep.subr.mxu1 %v9913_v1 }
0x1c8c   : > { %9756 = vmatprep.mubr.msk.f32.mxu1 %vm9914_vm1, %v9913_v1  ;;  %9755 = vmatpush3.msra.mxu1 %v8278_v61  ;;  %v8291_v61 = vld [vmem:[%s13060_s12 + $0x228] sm:$0xff] }
0x1c8d   : > { %6571 = vmatprep.subr.mxu1 %v8337_v22  ;;  %v8296_v22 = vld [vmem:[%s13060_s12 + $0x250] sm:$0xff] }
0x1d3b   : > { %v5716_v28 = vpop.f32.mrf.mxu1 }
0x1d3c   : > { %9709 = vmatmul.mubr.msk.f32.vlgmr.msra.gmra.mxu0 %vm1018_vm4, %v5716_v28  ;;  %v8320_v28 = vld [vmem:[%s13060_s12 + $0x310] sm:$0xff] }
0x1d3d   : > { %9723 = vmatpush3.msra.mxu0 %v8264_v26  ;;  %v9705_v30 = vpop.f32.mrf.mxu1  ;;  %9730 = vmatprep.mubr.msk.f32.mxu0 %vm9914_vm1, %v9913_v1  ;;  %v8318_v26 = vld [vmem:[%s13060_s12 + $0x300] sm:$0xff] }
0x1d3e   : > { %9724 = vmatprep.subr.mxu0 %v9913_v1  ;;  %v8305_v30 = vld [vmem:[%s13060_s12 + $0x298] sm:$0xff] }
0x1d3f   : > { %9725 = vmatpush3.msra.mxu0 %v8263_v29  ;;  %v8303_v29 = vld [vmem:[%s13060_s12 + $0x288] sm:$0xff] }
0x1d40   : > { %9726 = vmatprep.subr.mxu0 %v9913_v1 }
0x1d41   : > { %9727 = vmatpush3.msra.mxu0 %v8262_v31  ;;  %v8302_v31 = vld [vmem:[%s13060_s12 + $0x280] sm:$0xff] }
0x1d42   : > { %9728 = vmatprep.subr.mxu0 %v9913_v1 }
0x1d43   : > { %v5875_v33 = vpop.f32.mrf.mxu1  ;;  %9729 = vmatpush3.msra.mxu0 %v8261_v32  ;;  %v8304_v32 = vld [vmem:[%s13060_s12 + $0x290] sm:$0xff] }
0x1d44   : > { %9731 = vmatmul.mubr.msk.f32.vlgmr.msra.gmra.mxu0 %vm781_vm3, %v11598_v5  ;;  %9744 = vmatprep.subr.mxu0 %v9913_v1  ;;  %v5876_v46 = vadd.f32 %v8259_v43, %v5875_v33  ;;  %v8287_v33 = vld [vmem:[%s13060_s12 + $0x208] sm:$0xff] }
0x1d45   : > { %v9721_v34 = vpop.f32.mrf.mxu1  ;;  %9746 = vmatprep.mubr.msk.f32.mxu0 %vm9914_vm1, %v9913_v1 }
0x1d46   : > { %v5879_v42 = vmul.f32 0.35355338, %v5876_v46  ;;  %v8289_v34 = vld [vmem:[%s13060_s12 + $0x218] sm:$0xff]  ;;  %v8284_v46 = vld [vmem:[%s13064_s16 + $0x1] ss:$0 sm:$0xff] }
0x1d4b   : > { %v6042_v39 = vpop.f32.mrf.mxu1 }
0x1d4c   : > { %v6043_v18 = vadd.f32 %v8273_v52, %v6042_v39  ;;  %v8286_v39 = vld [vmem:[%s13060_s12 + $0x200] sm:$0xff] }
0x1d4d   : > { %v9743_v40 = vpop.f32.mrf.mxu1 }
0x1d4e   : > { %v8288_v40 = vld [vmem:[%s13060_s12 + $0x210] sm:$0xff] }
0x1dfc   : > { %v5791_v15 = vpop.f32.mrf.mxu0 }
0x1dfd   : > { %v5795_v44 = vadd.f32 %v5791_v15, %v5307_v41  ;;  %v8339_v41 = vld [vmem:[%s13060_s12 + $0x3a8] sm:$0xff]  ;;  %v8341_v15 = vld [vmem:[%s13060_s12 + $0x3b8] sm:$0xff] }
0x1dfe   : > { %v9710_v51 = vpop.f32.mrf.mxu0 }
0x1e04   : > { %v5959_v47 = vpop.f32.mrf.mxu0 }
0x1e05   : > { %v5960_v48 = vadd.f32 %v8266_v45, %v5959_v47 }
0x1e06   : > { %v9732_v53 = vpop.f32.mrf.mxu0 }
0x1e07   : > { %9745 = vmatpush3.xpose.msk.msra.mxu0 %vm1018_vm4, %v5960_v48  ;;  %v8285_v48 = vld [vmem:[%s13065_s17 + $0x1] ss:$0 sm:$0xff] }
0x1e08   : > { %9749 = vmatprep.subr.mxu0 %v9913_v1 }
0x1e0a   : > { %9747 = vmatmul.mubr.msk.f32.vlgmr.msra.gmra.mxu0 %vm1018_vm4, %v5879_v42  ;;  %v8338_v42 = vld [vmem:[%s13060_s12 + $0x3a0] sm:$0xff] }
0x1e0b   : > { %9750 = vmatpush3.msra.mxu0 %v6043_v18  ;;  %9751 = vmatprep.mubr.msk.f32.mxu0 %vm9914_vm1, %v9913_v1  ;;  %v8340_v18 = vld [vmem:[%s13060_s12 + $0x3b0] sm:$0xff] }
0x1e0c   : > { %6500 = vmatprep.subr.mxu0 %v8335_v13  ;;  %v8294_v13 = vld [vmem:[%s13060_s12 + $0x240] sm:$0xff] }
0x1eca   : > { %v6118_v55 = vpop.f32.mrf.mxu0 }
0x1ecb   : > { %v6122_v56 = vsel %vm1018_vm4, %v6118_v55, -inf }
0x1ecc   : > { %6123 = vmax.xlane.f32.xlu0 %v6122_v56  ;;  %v9748_v57 = vpop.f32.mrf.mxu0  ;;  %v8325_v56 = vld [vmem:[%s13060_s12 + $0x338] sm:$0xff] }
0x1ecd   : > { %v8322_v57 = vld [vmem:[%s13060_s12 + $0x320] sm:$0xff] }
0x1f55   : > { %v6124_v54 = vpop.xlane.xlu0 %6123 }
0x1f56   : > { %v6125_v58 = vsub.f32 %v6118_v55, %v6124_v54  ;;  %v8323_v55 = vld [vmem:[%s13060_s12 + $0x328] sm:$0xff]  ;;  %v8324_v54 = vld [vmem:[%s13060_s12 + $0x330] sm:$0xff] }
0x1f58   : > { %v6126_v59 = vmul.f32 1.442695, %v6125_v58  ;;  %v8307_v58 = vld [vmem:[%s13060_s12 + $0x2a8] sm:$0xff] }
0x1f5a   : > { %9843 = vpow2.f32 %v6126_v59  ;;  %v8309_v59 = vld [vmem:[%s13060_s12 + $0x2b8] sm:$0xff] }
0x1f67   : > { %v9844_v27 = vpop.eup %9843 }
0x1f68   : > { %v6128_v60 = vsel %vm1018_vm4, %v9844_v27, 0.0 }
0x1f69   : > { %6129 = vadd.xlane.f32.xlu1 %v6128_v60  ;;  %v8308_v60 = vld [vmem:[%s13060_s12 + $0x2b0] sm:$0xff] }
0x1ff2   : > { %v6130_v62 = vpop.xlane.xlu1 %6129 }
0x1ff3   : > { %9845 = vrcp.f32 %v6130_v62  ;;  %v8293_v62 = vld [vmem:[%s13060_s12 + $0x238] sm:$0xff] }
0x2000   : > { %v9846_v63 = vpop.eup %9845 }
0x2001   : > { %v6132_v0 = vmul.f32 %v9846_v63, %v9844_v27  ;;  %v8306_v27 = vld [vmem:[%s13060_s12 + $0x2a0] sm:$0xff] }
0x2002   : > { %v8290_v63 = vld [vmem:[%s13060_s12 + $0x220] sm:$0xff] }
0x2003   : > { %9752 = vmatmul.mubr.msk.f32.vlgmr.msra.gmra.mxu0 %vm1018_vm4, %v6132_v0  ;;  %v8292_v0 = vld [vmem:[%s13060_s12 + $0x230] sm:$0xff] }
0x2004   : > { %6540 = vmatprep.mubr.f32.mxu0 %v9913_v1 }
0x20c3   : > { %v6202_v2 = vpop.f32.mrf.mxu0 }
0x20c4   : > { %9757 = vmatmul.mubr.msk.f32.vlgmr.msra.gmra.mxu1 %vm1018_vm4, %v6202_v2  ;;  %v8343_v2 = vld [vmem:[%s13060_s12 + $0x3c8] sm:$0xff] }
0x20c5   : > { %v9753_v19 = vpop.f32.mrf.mxu0  ;;  %6611 = vmatprep.mubr.f32.mxu1 %v9913_v1  ;;  %6572 = vmatpush1.msra.mxu1 %v8336_v23  ;;  %v8349_v23 = vld [vmem:[%s13060_s12 + $0x3f8] sm:$0xff] }
0x20c6   : > { %6573 = vmatprep.subr.mxu1 %v8321_v25  ;;  %v8345_v19 = vld [vmem:[%s13060_s12 + $0x3d8] sm:$0xff]  ;;  %v8348_v25 = vld [vmem:[%s13060_s12 + $0x3f0] sm:$0xff] }
0x20c7   : > { %6574 = vmatpush1.msra.mxu1 %v8320_v28  ;;  %v8333_v28 = vld [vmem:[%s13060_s12 + $0x378] sm:$0xff] }
0x20c8   : > { %6575 = vmatprep.subr.mxu1 %v8305_v30  ;;  %v8332_v30 = vld [vmem:[%s13060_s12 + $0x370] sm:$0xff] }
0x20c9   : > { %6576 = vmatpush1.msra.mxu1 %v8304_v32  ;;  %v8317_v32 = vld [vmem:[%s13060_s12 + $0x2f8] sm:$0xff] }
0x20ca   : > { %6577 = vmatprep.subr.mxu1 %v8289_v34  ;;  %v8316_v34 = vld [vmem:[%s13060_s12 + $0x2f0] sm:$0xff] }
0x20cb   : > { %6578 = vmatpush1.msra.mxu1 %v8288_v40  ;;  %v8301_v40 = vld [vmem:[%s13060_s12 + $0x278] sm:$0xff] }
0x20cc   : > { %6713 = vmatprep.subr.mxu1 %v8341_v15  ;;  %v8300_v15 = vld [vmem:[%s13060_s12 + $0x270] sm:$0xff] }
0x2184   : > { %v6277_v9 = vpop.f32.mrf.mxu1 }
0x2185   : > { %v6281_v3 = vadd.f32 %v6277_v9, %v5795_v44  ;;  %v8342_v9 = vld [vmem:[%s13060_s12 + $0x3c0] sm:$0xff] }
0x2186   : > { %v9758_v4 = vpop.f32.mrf.mxu1 }
0x2187   : > { %v6290_v49 = vadd.f32 %v8281_v14, %v6281_v3  ;;  %v8344_v14 = vld [vmem:[%s13060_s12 + $0x3d0] sm:$0xff]  ;;  %v8327_v3 = vld [vmem:[%s13060_s12 + $0x348] sm:$0xff]  ;;  %v8329_v4 = vld [vmem:[%s13060_s12 + $0x358] sm:$0xff] }
0x2189   : > { %v6291_v50 = vadd.f32 %v6290_v49, %v11598_v5  ;;  %v8334_v5 = vld [vmem:[%s13060_s12 + $0x380] sm:$0xff] }
0x218a   : > { %6501 = vmatpush1.msra.mxu0 %v8334_v5  ;;  %v8326_v49 = vld [vmem:[%s13060_s12 + $0x340] sm:$0xff]  ;;  %v8347_v5 = vld [vmem:[%s13060_s12 + $0x3e8] sm:$0xff] }
0x218b   : > { %v6296_v6 = vsel %vm781_vm3, %v6291_v50, 0.0  ;;  %6502 = vmatprep.subr.mxu0 %v8319_v24  ;;  %v8346_v24 = vld [vmem:[%s13060_s12 + $0x3e0] sm:$0xff] }
0x218c   : > { %6297 = vadd.xlane.f32.xlu0 %v6296_v6  ;;  %6503 = vmatpush1.msra.mxu0 %v8318_v26  ;;  %v8311_v6 = vld [vmem:[%s13060_s12 + $0x2c8] sm:$0xff] }
0x218d   : > { %6504 = vmatprep.subr.mxu0 %v8303_v29  ;;  %v8331_v26 = vld [vmem:[%s13060_s12 + $0x368] sm:$0xff]  ;;  %v8330_v29 = vld [vmem:[%s13060_s12 + $0x360] sm:$0xff] }
0x218e   : > { %6505 = vmatpush1.msra.mxu0 %v8302_v31  ;;  %v8315_v31 = vld [vmem:[%s13060_s12 + $0x2e8] sm:$0xff] }
0x218f   : > { %6506 = vmatprep.subr.mxu0 %v8287_v33  ;;  %v8314_v33 = vld [vmem:[%s13060_s12 + $0x2e0] sm:$0xff] }
0x2190   : > { %6507 = vmatpush1.msra.mxu0 %v8286_v39  ;;  %v8299_v39 = vld [vmem:[%s13060_s12 + $0x268] sm:$0xff] }
0x2191   : > { %6642 = vmatprep.subr.mxu0 %v8339_v41  ;;  %v8298_v41 = vld [vmem:[%s13060_s12 + $0x260] sm:$0xff] }
0x2215   : > { %v6298_v7 = vpop.xlane.xlu0 %6297 }
0x2216   : > { %v6299_v8 = vmul.f32 0.03125, %v6298_v7  ;;  %v8313_v7 = vld [vmem:[%s13060_s12 + $0x2d8] sm:$0xff] }
0x2218   : > { %v6300_v10 = vsub.f32 %v6291_v50, %v6299_v8  ;;  %v8328_v50 = vld [vmem:[%s13060_s12 + $0x350] sm:$0xff]  ;;  %v8310_v8 = vld [vmem:[%s13060_s12 + $0x2c0] sm:$0xff] }
0x221a   : > { %v6301_v11 = vmul.f32 %v6300_v10, %v6300_v10 }
0x221c   : > { %v6302_v12 = vsel %vm781_vm3, %v6301_v11, 0.0  ;;  %v8295_v11 = vld [vmem:[%s13060_s12 + $0x248] sm:$0xff] }
0x221d   : > { %6303 = vadd.xlane.f32.xlu1 %v6302_v12  ;;  %v8297_v12 = vld [vmem:[%s13060_s12 + $0x258] sm:$0xff] }
0x22a6   : > { %v6304_v44 = vpop.xlane.xlu1 %6303 }
0x22a7   : > { %v6305_v51 = vmul.f32 0.03125, %v6304_v44  ;;  %v8391_v44 = vld [vmem:[%s13062_s14 + $0x8f8] sm:$0xff] }
0x22a9   : > { %v6306_v43 = vadd.f32 1e-05, %v6305_v51  ;;  %v8423_v51 = vld [vmem:[%s13062_s14 + $0x9f8] sm:$0xff] }
0x22ab   : > { %9847 = vrsqrt.f32 %v6306_v43  ;;  %v8375_v43 = vld [vmem:[%s13062_s14 + $0x878] sm:$0xff] }
0x22b8   : > { %v9848_v45 = vpop.eup %9847 }
0x22b9   : > { %v6308_v47 = vmul.f32 %v9848_v45, %v6300_v10  ;;  %v8312_v10 = vld [vmem:[%s13060_s12 + $0x2d0] sm:$0xff]  ;;  %v8407_v45 = vld [vmem:[%s13062_s14 + $0x978] sm:$0xff] }
0x22bb   : > { %v6315_v52 = vmul.f32 %v8284_v46, %v6308_v47  ;;  %v8390_v46 = vld [vmem:[%s13062_s14 + $0x8f0] sm:$0xff] }
0x22bc   : > { %v8422_v47 = vld [vmem:[%s13062_s14 + $0x9f0] sm:$0xff] }
0x22bd   : > { %v11984_v53 = vadd.f32 %v8285_v48, %v6315_v52  ;;  %v8374_v48 = vld [vmem:[%s13062_s14 + $0x870] sm:$0xff] }
0x22be   : > { %v8406_v52 = vld [vmem:[%s13062_s14 + $0x970] sm:$0xff] }
0x22bf   : > { %8352 = vmatmul.mubr.msk.f32.vlgmr.msra.gmra.mxu0 %vm781_vm3, %v11984_v53  ;;  %8353 = vmatmul.mubr.msk.f32.vlgmr.msra.gmra.mxu1 %vm781_vm3, %v11984_v53 }
0x22c0   : > { %6643 = vmatpush1.msra.mxu0 %v8338_v42  ;;  %6714 = vmatpush1.msra.mxu1 %v8340_v18  ;;  %v8389_v42 = vld [vmem:[%s13062_s14 + $0x8e8] sm:$0xff] }
0x22c1   : > { %6644 = vmatprep.subr.mxu0 %v8323_v55  ;;  %6715 = vmatprep.subr.mxu1 %v8325_v56  ;;  %v8421_v18 = vld [vmem:[%s13062_s14 + $0x9e8] sm:$0xff] }
0x22c2   : > { %6645 = vmatpush1.msra.mxu0 %v8322_v57  ;;  %6716 = vmatpush1.msra.mxu1 %v8324_v54  ;;  %v8373_v55 = vld [vmem:[%s13062_s14 + $0x868] sm:$0xff]  ;;  %v8388_v57 = vld [vmem:[%s13062_s14 + $0x8e0] sm:$0xff] }
0x22c3   : > { %6646 = vmatprep.subr.mxu0 %v8307_v58  ;;  %6717 = vmatprep.subr.mxu1 %v8309_v59  ;;  %v8405_v56 = vld [vmem:[%s13062_s14 + $0x968] sm:$0xff]  ;;  %v8420_v54 = vld [vmem:[%s13062_s14 + $0x9e0] sm:$0xff] }
0x22c4   : > { %6647 = vmatpush1.msra.mxu0 %v8306_v27  ;;  %6718 = vmatpush1.msra.mxu1 %v8308_v60  ;;  %v8372_v58 = vld [vmem:[%s13062_s14 + $0x860] sm:$0xff]  ;;  %v8387_v27 = vld [vmem:[%s13062_s14 + $0x8d8] sm:$0xff] }
0x22c5   : > { %6648 = vmatprep.subr.mxu0 %v8291_v61  ;;  %6719 = vmatprep.subr.mxu1 %v8293_v62  ;;  %v8404_v59 = vld [vmem:[%s13062_s14 + $0x960] sm:$0xff]  ;;  %v8419_v60 = vld [vmem:[%s13062_s14 + $0x9d8] sm:$0xff] }
0x22c6   : > { %6649 = vmatpush1.msra.mxu0 %v8290_v63  ;;  %6682 = vmatprep.mubr.f32.mxu0 %v9913_v1  ;;  %v8371_v61 = vld [vmem:[%s13062_s14 + $0x858] sm:$0xff]  ;;  %v8386_v63 = vld [vmem:[%s13062_s14 + $0x8d0] sm:$0xff] }
0x22c7   : > { %6720 = vmatpush1.msra.mxu1 %v8292_v0  ;;  %6753 = vmatprep.mubr.f32.mxu1 %v9913_v1  ;;  %v8403_v62 = vld [vmem:[%s13062_s14 + $0x958] sm:$0xff]  ;;  %v8418_v0 = vld [vmem:[%s13062_s14 + $0x9d0] sm:$0xff] }
0x22c8   : > { %8354 = vmatmul.mubr.msk.f32.vlgmr.msra.gmra.mxu0 %vm781_vm3, %v11984_v53  ;;  %8355 = vmatmul.mubr.msk.f32.vlgmr.msra.gmra.mxu1 %vm781_vm3, %v11984_v53 }
0x22c9   : > { %6784 = vmatprep.subr.mxu0 %v8343_v2  ;;  %6855 = vmatprep.subr.mxu1 %v8345_v19  ;;  %v8370_v2 = vld [vmem:[%s13062_s14 + $0x850] sm:$0xff] }
0x22ca   : > { %6785 = vmatpush1.msra.mxu0 %v8342_v9  ;;  %6856 = vmatpush1.msra.mxu1 %v8344_v14  ;;  %v8402_v19 = vld [vmem:[%s13062_s14 + $0x950] sm:$0xff]  ;;  %v8385_v9 = vld [vmem:[%s13062_s14 + $0x8c8] sm:$0xff] }
0x22cb   : > { %6786 = vmatprep.subr.mxu0 %v8327_v3  ;;  %6857 = vmatprep.subr.mxu1 %v8329_v4  ;;  %v8417_v14 = vld [vmem:[%s13062_s14 + $0x9c8] sm:$0xff] }
0x22cc   : > { %6787 = vmatpush1.msra.mxu0 %v8326_v49  ;;  %6858 = vmatpush1.msra.mxu1 %v8328_v50  ;;  %v8369_v3 = vld [vmem:[%s13062_s14 + $0x848] sm:$0xff]  ;;  %v8384_v49 = vld [vmem:[%s13062_s14 + $0x8c0] sm:$0xff] }
0x22cd   : > { %6788 = vmatprep.subr.mxu0 %v8311_v6  ;;  %6859 = vmatprep.subr.mxu1 %v8313_v7  ;;  %v8401_v4 = vld [vmem:[%s13062_s14 + $0x948] sm:$0xff]  ;;  %v8416_v50 = vld [vmem:[%s13062_s14 + $0x9c0] sm:$0xff] }
0x22ce   : > { %6789 = vmatpush1.msra.mxu0 %v8310_v8  ;;  %6860 = vmatpush1.msra.mxu1 %v8312_v10  ;;  %v8368_v6 = vld [vmem:[%s13062_s14 + $0x840] sm:$0xff]  ;;  %v8383_v8 = vld [vmem:[%s13062_s14 + $0x8b8] sm:$0xff] }
0x22cf   : > { %6790 = vmatprep.subr.mxu0 %v8295_v11  ;;  %6861 = vmatprep.subr.mxu1 %v8297_v12  ;;  %v8400_v7 = vld [vmem:[%s13062_s14 + $0x940] sm:$0xff]  ;;  %v8415_v10 = vld [vmem:[%s13062_s14 + $0x9b8] sm:$0xff] }
0x22d0   : > { %6791 = vmatpush1.msra.mxu0 %v8294_v13  ;;  %6824 = vmatprep.mubr.f32.mxu0 %v9913_v1  ;;  %v8367_v11 = vld [vmem:[%s13062_s14 + $0x838] sm:$0xff]  ;;  %v8382_v13 = vld [vmem:[%s13062_s14 + $0x8b0] sm:$0xff] }
0x22d1   : > { %6862 = vmatpush1.msra.mxu1 %v8296_v22  ;;  %6895 = vmatprep.mubr.f32.mxu1 %v9913_v1  ;;  %v8399_v12 = vld [vmem:[%s13062_s14 + $0x938] sm:$0xff]  ;;  %v8414_v22 = vld [vmem:[%s13062_s14 + $0x9b0] sm:$0xff] }
0x22d2   : > { %8356 = vmatmul.mubr.msk.f32.vlgmr.msra.gmra.mxu0 %vm781_vm3, %v11984_v53  ;;  %8357 = vmatmul.mubr.msk.f32.vlgmr.msra.gmra.mxu1 %vm781_vm3, %v11984_v53 }
0x22d3   : > { %6926 = vmatprep.subr.mxu0 %v8347_v5  ;;  %6997 = vmatprep.subr.mxu1 %v8349_v23  ;;  %v8366_v5 = vld [vmem:[%s13062_s14 + $0x830] sm:$0xff] }
0x22d4   : > { %6927 = vmatpush1.msra.mxu0 %v8346_v24  ;;  %6998 = vmatpush1.msra.mxu1 %v8348_v25  ;;  %v8398_v23 = vld [vmem:[%s13062_s14 + $0x930] sm:$0xff]  ;;  %v8381_v24 = vld [vmem:[%s13062_s14 + $0x8a8] sm:$0xff] }
0x22d5   : > { %6928 = vmatprep.subr.mxu0 %v8331_v26  ;;  %6999 = vmatprep.subr.mxu1 %v8333_v28  ;;  %v8413_v25 = vld [vmem:[%s13062_s14 + $0x9a8] sm:$0xff] }
0x22d6   : > { %6929 = vmatpush1.msra.mxu0 %v8330_v29  ;;  %7000 = vmatpush1.msra.mxu1 %v8332_v30  ;;  %v8365_v26 = vld [vmem:[%s13062_s14 + $0x828] sm:$0xff]  ;;  %v8380_v29 = vld [vmem:[%s13062_s14 + $0x8a0] sm:$0xff] }
0x22d7   : > { %6930 = vmatprep.subr.mxu0 %v8315_v31  ;;  %7001 = vmatprep.subr.mxu1 %v8317_v32  ;;  %v8397_v28 = vld [vmem:[%s13062_s14 + $0x928] sm:$0xff]  ;;  %v8412_v30 = vld [vmem:[%s13062_s14 + $0x9a0] sm:$0xff] }
0x22d8   : > { %6931 = vmatpush1.msra.mxu0 %v8314_v33  ;;  %7002 = vmatpush1.msra.mxu1 %v8316_v34  ;;  %v8364_v31 = vld [vmem:[%s13062_s14 + $0x820] sm:$0xff]  ;;  %v8379_v33 = vld [vmem:[%s13062_s14 + $0x898] sm:$0xff] }
0x22d9   : > { %6932 = vmatprep.subr.mxu0 %v8299_v39  ;;  %7003 = vmatprep.subr.mxu1 %v8301_v40  ;;  %v8396_v32 = vld [vmem:[%s13062_s14 + $0x920] sm:$0xff]  ;;  %v8411_v34 = vld [vmem:[%s13062_s14 + $0x998] sm:$0xff] }
0x22da   : > { %6933 = vmatpush1.msra.mxu0 %v8298_v41  ;;  %6966 = vmatprep.mubr.f32.mxu0 %v9913_v1  ;;  %v8363_v39 = vld [vmem:[%s13062_s14 + $0x818] sm:$0xff]  ;;  %v8378_v41 = vld [vmem:[%s13062_s14 + $0x890] sm:$0xff] }
0x22db   : > { %7004 = vmatpush1.msra.mxu1 %v8300_v15  ;;  %7037 = vmatprep.mubr.f32.mxu1 %v9913_v1  ;;  %v8395_v40 = vld [vmem:[%s13062_s14 + $0x918] sm:$0xff]  ;;  %v8410_v15 = vld [vmem:[%s13062_s14 + $0x990] sm:$0xff] }
0x22dc   : > { %8358 = vmatmul.mubr.msk.f32.vlgmr.msra.gmra.mxu0 %vm781_vm3, %v11984_v53  ;;  %8359 = vmatmul.mubr.msk.f32.vlgmr.msra.gmra.mxu1 %vm781_vm3, %v11984_v53 }
0x22dd   : > { %9079 = vmatprep.subr.mxu0 %v8391_v44  ;;  %9114 = vmatprep.subr.mxu1 %v8423_v51  ;;  %v8362_v44 = vld [vmem:[%s13062_s14 + $0x810] sm:$0xff] }
0x22de   : > { %9080 = vmatpush3.msra.mxu0 %v8375_v43  ;;  %9115 = vmatpush3.msra.mxu1 %v8407_v45  ;;  %v8394_v51 = vld [vmem:[%s13062_s14 + $0x910] sm:$0xff]  ;;  %v8377_v43 = vld [vmem:[%s13062_s14 + $0x888] sm:$0xff] }
0x22df   : > { %9081 = vmatprep.subr.mxu0 %v8390_v46  ;;  %9116 = vmatprep.subr.mxu1 %v8422_v47  ;;  %v8409_v45 = vld [vmem:[%s13062_s14 + $0x988] sm:$0xff] }
0x22e0   : > { %9082 = vmatpush3.msra.mxu0 %v8374_v48  ;;  %9117 = vmatpush3.msra.mxu1 %v8406_v52  ;;  %v8361_v46 = vld [vmem:[%s13062_s14 + $0x808] sm:$0xff]  ;;  %v8376_v48 = vld [vmem:[%s13062_s14 + $0x880] sm:$0xff] }
0x22e1   : > { %9083 = vmatprep.subr.mxu0 %v8389_v42  ;;  %9118 = vmatprep.subr.mxu1 %v8421_v18  ;;  %v8393_v47 = vld [vmem:[%s13062_s14 + $0x908] sm:$0xff]  ;;  %v8408_v52 = vld [vmem:[%s13062_s14 + $0x980] sm:$0xff] }
0x22e2   : > { %9084 = vmatpush3.msra.mxu0 %v8373_v55  ;;  %9119 = vmatpush3.msra.mxu1 %v8405_v56  ;;  %v8360_v42 = vld [vmem:[%s13062_s14 + $0x800] sm:$0xff]  ;;  %v8455_v55 = vld [vmem:[%s13062_s14 + $0xaf8] sm:$0xff] }
0x22e3   : > { %9085 = vmatprep.subr.mxu0 %v8388_v57  ;;  %9120 = vmatprep.subr.mxu1 %v8420_v54  ;;  %v8392_v18 = vld [vmem:[%s13062_s14 + $0x900] sm:$0xff]  ;;  %v8487_v56 = vld [vmem:[%s13062_s14 + $0xbf8] sm:$0xff]  ;;  %v12347_v57 = vld [vmem:[%s13061_s13 + $0x10] sm:$0xff] }
0x22e4   : > { %9086 = vmatpush3.msra.mxu0 %v8372_v58  ;;  %9121 = vmatpush3.msra.mxu1 %v8404_v59  ;;  %v6396_v54 = vrot.slane %v12347_v57, %v10895_v16  ;;  %v6404_v58 = vrot.slane %v12347_v57, %v10898_v17  ;;  %v6400_v59 = vrot.slane %v12347_v57, %v10906_v20 }
0x22e5   : > { %9087 = vmatprep.subr.mxu0 %v8387_v27  ;;  %9122 = vmatprep.subr.mxu1 %v8419_v60  ;;  %v6408_v27 = vrot.slane %v12347_v57, %v10909_v21 }
0x22e6   : > { %9088 = vmatpush3.msra.mxu0 %v8371_v61  ;;  %9123 = vmatpush3.msra.mxu1 %v8403_v62 }
0x22e7   : > { %9089 = vmatprep.subr.mxu0 %v8386_v63  ;;  %9124 = vmatprep.subr.mxu1 %v8418_v0 }
0x22e8   : > { %9090 = vmatpush3.msra.mxu0 %v8370_v2  ;;  %9125 = vmatpush3.msra.mxu1 %v8402_v19 }
0x22e9   : > { %9091 = vmatprep.subr.mxu0 %v8385_v9  ;;  %9126 = vmatprep.subr.mxu1 %v8417_v14 }
0x22ea   : > { %9092 = vmatpush3.msra.mxu0 %v8369_v3  ;;  %9127 = vmatpush3.msra.mxu1 %v8401_v4 }
0x22eb   : > { %9093 = vmatprep.subr.mxu0 %v8384_v49  ;;  %9128 = vmatprep.subr.mxu1 %v8416_v50  ;;  %v8439_v50 = vld [vmem:[%s13062_s14 + $0xa78] sm:$0xff] }
0x22ec   : > { %9094 = vmatpush3.msra.mxu0 %v8368_v6  ;;  %9129 = vmatpush3.msra.mxu1 %v8400_v7  ;;  %v8471_v6 = vld [vmem:[%s13062_s14 + $0xb78] sm:$0xff]  ;;  %v8454_v7 = vld [vmem:[%s13062_s14 + $0xaf0] sm:$0xff] }
0x22ed   : > { %9095 = vmatprep.subr.mxu0 %v8383_v8  ;;  %9130 = vmatprep.subr.mxu1 %v8415_v10  ;;  %v8486_v8 = vld [vmem:[%s13062_s14 + $0xbf0] sm:$0xff]  ;;  %v6416_v10 = vrot.slane %v12347_v57, %v10920_v36 }
0x22ee   : > { %9096 = vmatpush3.msra.mxu0 %v8367_v11  ;;  %9131 = vmatpush3.msra.mxu1 %v8399_v12  ;;  %v6424_v11 = vrot.slane %v12347_v57, %v10923_v35  ;;  %v8438_v12 = vld [vmem:[%s13062_s14 + $0xa70] sm:$0xff] }
0x22ef   : > { %9097 = vmatprep.subr.mxu0 %v8382_v13  ;;  %9132 = vmatprep.subr.mxu1 %v8414_v22  ;;  %v8470_v13 = vld [vmem:[%s13062_s14 + $0xb70] sm:$0xff] }
0x22f0   : > { %9098 = vmatpush3.msra.mxu0 %v8366_v5  ;;  %9133 = vmatpush3.msra.mxu1 %v8398_v23  ;;  %v8453_v23 = vld [vmem:[%s13062_s14 + $0xae8] sm:$0xff] }
0x22f1   : > { %9099 = vmatprep.subr.mxu0 %v8381_v24  ;;  %9134 = vmatprep.subr.mxu1 %v8413_v25  ;;  %v8485_v24 = vld [vmem:[%s13062_s14 + $0xbe8] sm:$0xff] }
0x22f2   : > { %9100 = vmatpush3.msra.mxu0 %v8365_v26  ;;  %9135 = vmatpush3.msra.mxu1 %v8397_v28  ;;  %v8437_v25 = vld [vmem:[%s13062_s14 + $0xa68] sm:$0xff] }
0x22f3   : > { %9101 = vmatprep.subr.mxu0 %v8380_v29  ;;  %9136 = vmatprep.subr.mxu1 %v8412_v30  ;;  %v8469_v26 = vld [vmem:[%s13062_s14 + $0xb68] sm:$0xff]  ;;  %v8452_v30 = vld [vmem:[%s13062_s14 + $0xae0] sm:$0xff] }
0x22f4   : > { %9102 = vmatpush3.msra.mxu0 %v8364_v31  ;;  %9137 = vmatpush3.msra.mxu1 %v8396_v32  ;;  %v8484_v31 = vld [vmem:[%s13062_s14 + $0xbe0] sm:$0xff] }
0x22f5   : > { %9103 = vmatprep.subr.mxu0 %v8379_v33  ;;  %9138 = vmatprep.subr.mxu1 %v8411_v34  ;;  %v8436_v34 = vld [vmem:[%s13062_s14 + $0xa60] sm:$0xff] }
0x22f6   : > { %9104 = vmatpush3.msra.mxu0 %v8363_v39  ;;  %9139 = vmatpush3.msra.mxu1 %v8395_v40  ;;  %v8468_v39 = vld [vmem:[%s13062_s14 + $0xb60] sm:$0xff] }
0x22f7   : > { %9105 = vmatprep.subr.mxu0 %v8378_v41  ;;  %9140 = vmatprep.subr.mxu1 %v8410_v15  ;;  %v8451_v15 = vld [vmem:[%s13062_s14 + $0xad8] sm:$0xff] }
0x22f8   : > { %9106 = vmatpush3.msra.mxu0 %v8362_v44  ;;  %9141 = vmatpush3.msra.mxu1 %v8394_v51  ;;  %v8483_v44 = vld [vmem:[%s13062_s14 + $0xbd8] sm:$0xff] }
0x22f9   : > { %9107 = vmatprep.subr.mxu0 %v8377_v43  ;;  %9142 = vmatprep.subr.mxu1 %v8409_v45  ;;  %v8435_v51 = vld [vmem:[%s13062_s14 + $0xa58] sm:$0xff]  ;;  %v8450_v45 = vld [vmem:[%s13062_s14 + $0xad0] sm:$0xff] }
0x22fa   : > { %9108 = vmatpush3.msra.mxu0 %v8361_v46  ;;  %9143 = vmatpush3.msra.mxu1 %v8393_v47  ;;  %v8467_v43 = vld [vmem:[%s13062_s14 + $0xb58] sm:$0xff]  ;;  %v8482_v46 = vld [vmem:[%s13062_s14 + $0xbd0] sm:$0xff] }
0x22fb   : > { %9109 = vmatprep.subr.mxu0 %v8376_v48  ;;  %9144 = vmatprep.subr.mxu1 %v8408_v52  ;;  %v8434_v47 = vld [vmem:[%s13062_s14 + $0xa50] sm:$0xff]  ;;  %v8449_v52 = vld [vmem:[%s13062_s14 + $0xac8] sm:$0xff] }
0x22fc   : > { %9110 = vmatpush3.msra.mxu0 %v8360_v42  ;;  %9145 = vmatpush3.msra.mxu1 %v8392_v18  ;;  %v8466_v48 = vld [vmem:[%s13062_s14 + $0xb50] sm:$0xff]  ;;  %v8481_v42 = vld [vmem:[%s13062_s14 + $0xbc8] sm:$0xff] }
0x22fd   : > { %9149 = vmatprep.subr.mxu0 %v8455_v55  ;;  %9184 = vmatprep.subr.mxu1 %v8487_v56  ;;  %v8433_v18 = vld [vmem:[%s13062_s14 + $0xa48] sm:$0xff]  ;;  %v8448_v56 = vld [vmem:[%s13062_s14 + $0xac0] sm:$0xff] }
0x22fe   : > { %v8465_v55 = vld [vmem:[%s13062_s14 + $0xb48] sm:$0xff] }
0x237f   : > { %v6542_v60 = vpop.f32.mrf.mxu0  ;;  %v6613_v61 = vpop.f32.mrf.mxu1 }
0x2380   : > { %v6543_v62 = vadd.f32 %v6542_v60, %v6396_v54  ;;  %v6614_v63 = vadd.f32 %v6613_v61, %v6404_v58  ;;  %v8480_v54 = vld [vmem:[%s13062_s14 + $0xbc0] sm:$0xff]  ;;  %v8479_v60 = vld [vmem:[%s13062_s14 + $0xbb8] sm:$0xff] }
0x2381   : > { %v6544_v0 = vpop.f32.mrf.mxu0  ;;  %v6615_v2 = vpop.f32.mrf.mxu1  ;;  %v8432_v58 = vld [vmem:[%s13062_s14 + $0xa40] sm:$0xff]  ;;  %v8431_v61 = vld [vmem:[%s13062_s14 + $0xa38] sm:$0xff] }
0x2382   : > { %v6545_v19 = vadd.f32 %v6544_v0, %v6400_v59  ;;  %v6616_v9 = vadd.f32 %v6615_v2, %v6408_v27  ;;  %v7044_v4 = vmax.f32 %v6543_v62, 0.0  ;;  %v7046_v49 = vmax.f32 %v6614_v63, 0.0  ;;  %v8464_v59 = vld [vmem:[%s13062_s14 + $0xb40] sm:$0xff]  ;;  %v8447_v27 = vld [vmem:[%s13062_s14 + $0xab8] sm:$0xff]  ;;  %v8446_v63 = vld [vmem:[%s13062_s14 + $0xab0] sm:$0xff] }
0x2383   : > { %v8463_v62 = vld [vmem:[%s13062_s14 + $0xb38] sm:$0xff]  ;;  %v8478_v0 = vld [vmem:[%s13062_s14 + $0xbb0] sm:$0xff] }
0x2384   : > { %v7045_v14 = vmax.f32 %v6545_v19, 0.0  ;;  %v7047_v3 = vmax.f32 %v6616_v9, 0.0  ;;  %v8430_v2 = vld [vmem:[%s13062_s14 + $0xa30] sm:$0xff]  ;;  %v8445_v9 = vld [vmem:[%s13062_s14 + $0xaa8] sm:$0xff] }
0x2385   : > { %v8462_v19 = vld [vmem:[%s13062_s14 + $0xb30] sm:$0xff] }
0x2386   : > { %7389 = vmatprep.mubr.f32.mxu0 %v7045_v14  ;;  %7459 = vmatprep.mubr.f32.mxu1 %v7047_v3  ;;  %v8477_v14 = vld [vmem:[%s13062_s14 + $0xba8] sm:$0xff] }
0x2387   : > { %7390 = vmatmul.mubr.f32.vlgmr.msra.gmra.mxu0 %v7044_v4  ;;  %7460 = vmatmul.mubr.f32.vlgmr.msra.gmra.mxu1 %v7046_v49  ;;  %v8429_v3 = vld [vmem:[%s13062_s14 + $0xa28] sm:$0xff]  ;;  %v8444_v49 = vld [vmem:[%s13062_s14 + $0xaa0] sm:$0xff] }
0x2388   : > { %v12379_v22 = vpop.f32.mrf.mxu0  ;;  %v12381_v5 = vpop.f32.mrf.mxu1  ;;  %9150 = vmatpush3.msra.mxu0 %v8439_v50  ;;  %9185 = vmatpush3.msra.mxu1 %v8471_v6  ;;  %v8461_v4 = vld [vmem:[%s13062_s14 + $0xb28] sm:$0xff]  ;;  %v8476_v50 = vld [vmem:[%s13062_s14 + $0xba0] sm:$0xff] }
0x2389   : > { %9151 = vmatprep.subr.mxu0 %v8454_v7  ;;  %9186 = vmatprep.subr.mxu1 %v8486_v8  ;;  %v8428_v6 = vld [vmem:[%s13062_s14 + $0xa20] sm:$0xff] }
0x238a   : > { %v6686_v28 = vpop.f32.mrf.mxu0  ;;  %v6757_v29 = vpop.f32.mrf.mxu1  ;;  %9152 = vmatpush3.msra.mxu0 %v8438_v12  ;;  %9187 = vmatpush3.msra.mxu1 %v8470_v13  ;;  %v8460_v7 = vld [vmem:[%s13062_s14 + $0xb20] sm:$0xff]  ;;  %v6412_v12 = vrot.slane %v12347_v57, %v11054_v37  ;;  %v6420_v13 = vrot.slane %v12347_v57, %v11057_v38  ;;  %v8442_v57 = vld [vmem:[%s13062_s14 + $0xa90] sm:$0xff] }
0x238b   : > { %v6687_v32 = vadd.f32 %v6686_v28, %v6416_v10  ;;  %v6758_v33 = vadd.f32 %v6757_v29, %v6424_v11  ;;  %9153 = vmatprep.subr.mxu0 %v8453_v23  ;;  %9188 = vmatprep.subr.mxu1 %v8485_v24  ;;  %v8443_v10 = vld [vmem:[%s13062_s14 + $0xa98] sm:$0xff]  ;;  %v8474_v28 = vld [vmem:[%s13062_s14 + $0xb90] sm:$0xff] }
0x238c   : > { %9154 = vmatpush3.msra.mxu0 %v8437_v25  ;;  %9189 = vmatpush3.msra.mxu1 %v8469_v26  ;;  %v8475_v11 = vld [vmem:[%s13062_s14 + $0xb98] sm:$0xff] }
0x238d   : > { %v7049_v40 = vmax.f32 %v6687_v32, 0.0  ;;  %v7051_v41 = vmax.f32 %v6758_v33, 0.0  ;;  %9155 = vmatprep.subr.mxu0 %v8452_v30  ;;  %9190 = vmatprep.subr.mxu1 %v8484_v31  ;;  %v8427_v24 = vld [vmem:[%s13062_s14 + $0xa18] sm:$0xff]  ;;  %v8426_v30 = vld [vmem:[%s13062_s14 + $0xa10] sm:$0xff] }
0x238e   : > { %9156 = vmatpush3.msra.mxu0 %v8436_v34  ;;  %9191 = vmatpush3.msra.mxu1 %v8468_v39  ;;  %v8459_v25 = vld [vmem:[%s13062_s14 + $0xb18] sm:$0xff]  ;;  %v8458_v31 = vld [vmem:[%s13062_s14 + $0xb10] sm:$0xff]  ;;  %v8473_v34 = vld [vmem:[%s13062_s14 + $0xb88] sm:$0xff]  ;;  %v6685_v39 = vadd.f32 %v12379_v22, %v6412_v12 }
0x238f   : > { %7529 = vmatprep.mubr.f32.mxu0 %v7049_v40  ;;  %7599 = vmatprep.mubr.f32.mxu1 %v7051_v41  ;;  %v12526_v26 = vld [vmem:[%s13061_s13 + $0x18] sm:$0xff]  ;;  %v6756_v40 = vadd.f32 %v12381_v5, %v6420_v13  ;;  %v8472_v22 = vld [vmem:[%s13062_s14 + $0xb80] sm:$0xff]  ;;  %v8545_v12 = vld [vmem:[%s13062_s14 + $0xdc8] sm:$0xff] }
0x2390   : > { %9157 = vmatprep.subr.mxu0 %v8451_v15  ;;  %9192 = vmatprep.subr.mxu1 %v8483_v44  ;;  %v6432_v29 = vrot.slane %v12526_v26, %v10906_v20  ;;  %v6440_v33 = vrot.slane %v12526_v26, %v10909_v21  ;;  %v8441_v20 = vld [vmem:[%s13062_s14 + $0xa88] sm:$0xff]  ;;  %v8440_v44 = vld [vmem:[%s13062_s14 + $0xa80] sm:$0xff] }
0x2391   : > { %9158 = vmatpush3.msra.mxu0 %v8435_v51  ;;  %9193 = vmatpush3.msra.mxu1 %v8467_v43  ;;  %v8425_v21 = vld [vmem:[%s13062_s14 + $0xa08] sm:$0xff]  ;;  %v8424_v51 = vld [vmem:[%s13062_s14 + $0xa00] sm:$0xff] }
0x2392   : > { %9159 = vmatprep.subr.mxu0 %v8450_v45  ;;  %9194 = vmatprep.subr.mxu1 %v8482_v46  ;;  %v12503_v8 = vpop.f32.mrf.mxu0  ;;  %v12515_v23 = vpop.f32.mrf.mxu1  ;;  %v8457_v15 = vld [vmem:[%s13062_s14 + $0xb08] sm:$0xff]  ;;  %v8456_v43 = vld [vmem:[%s13062_s14 + $0xb00] sm:$0xff]  ;;  %v7048_v46 = vmax.f32 %v6685_v39, 0.0  ;;  %v8494_v39 = vld [vmem:[%s13062_s14 + $0xc30] sm:$0xff] }
0x2393   : > { %9160 = vmatpush3.msra.mxu0 %v8434_v47  ;;  %9195 = vmatpush3.msra.mxu1 %v8466_v48  ;;  %v7050_v47 = vmax.f32 %v6756_v40, 0.0  ;;  %v8519_v48 = vld [vmem:[%s13062_s14 + $0xcf8] sm:$0xff]  ;;  %v8497_v13 = vld [vmem:[%s13062_s14 + $0xc48] sm:$0xff]  ;;  %v8526_v40 = vld [vmem:[%s13062_s14 + $0xd30] sm:$0xff] }
0x2394   : > { %9161 = vmatprep.subr.mxu0 %v8449_v52  ;;  %9196 = vmatprep.subr.mxu1 %v8481_v42  ;;  %v6828_v32 = vpop.f32.mrf.mxu0  ;;  %v6899_v41 = vpop.f32.mrf.mxu1  ;;  %v8551_v52 = vld [vmem:[%s13062_s14 + $0xdf8] sm:$0xff] }
0x2395   : > { %9162 = vmatpush3.msra.mxu0 %v8433_v18  ;;  %9197 = vmatpush3.msra.mxu1 %v8465_v55  ;;  %v6829_v5 = vadd.f32 %v6828_v32, %v6432_v29  ;;  %v6900_v45 = vadd.f32 %v6899_v41, %v6440_v33  ;;  %v8503_v42 = vld [vmem:[%s13062_s14 + $0xc78] sm:$0xff]  ;;  %v8528_v29 = vld [vmem:[%s13062_s14 + $0xd40] sm:$0xff]  ;;  %v8509_v41 = vld [vmem:[%s13062_s14 + $0xca8] sm:$0xff] }
0x2396   : > { %9163 = vmatprep.subr.mxu0 %v8448_v56  ;;  %9198 = vmatprep.subr.mxu1 %v8480_v54  ;;  %v8535_v55 = vld [vmem:[%s13062_s14 + $0xd78] sm:$0xff]  ;;  %v8518_v54 = vld [vmem:[%s13062_s14 + $0xcf0] sm:$0xff] }
0x2397   : > { %9164 = vmatpush3.msra.mxu0 %v8432_v58  ;;  %9199 = vmatpush3.msra.mxu1 %v8464_v59  ;;  %v7053_v18 = vmax.f32 %v6829_v5, 0.0  ;;  %v7055_v56 = vmax.f32 %v6900_v45, 0.0  ;;  %v8550_v58 = vld [vmem:[%s13062_s14 + $0xdf0] sm:$0xff]  ;;  %v8495_v32 = vld [vmem:[%s13062_s14 + $0xc38] sm:$0xff]  ;;  %v8540_v5 = vld [vmem:[%s13062_s14 + $0xda0] sm:$0xff] }
0x2398   : > { %9165 = vmatprep.subr.mxu0 %v8447_v27  ;;  %9200 = vmatprep.subr.mxu1 %v8479_v60  ;;  %v8502_v59 = vld [vmem:[%s13062_s14 + $0xc70] sm:$0xff]  ;;  %v8517_v60 = vld [vmem:[%s13062_s14 + $0xce8] sm:$0xff]  ;;  %v8527_v33 = vld [vmem:[%s13062_s14 + $0xd38] sm:$0xff] }
0x2399   : > { %9166 = vmatpush3.msra.mxu0 %v8431_v61  ;;  %9201 = vmatpush3.msra.mxu1 %v8463_v62  ;;  %v8534_v27 = vld [vmem:[%s13062_s14 + $0xd70] sm:$0xff]  ;;  %v8549_v61 = vld [vmem:[%s13062_s14 + $0xde8] sm:$0xff] }
0x239a   : > { %9167 = vmatprep.subr.mxu0 %v8446_v63  ;;  %9202 = vmatprep.subr.mxu1 %v8478_v0  ;;  %v8501_v62 = vld [vmem:[%s13062_s14 + $0xc68] sm:$0xff]  ;;  %v8516_v0 = vld [vmem:[%s13062_s14 + $0xce0] sm:$0xff] }
0x239b   : > { %9168 = vmatpush3.msra.mxu0 %v8430_v2  ;;  %9203 = vmatpush3.msra.mxu1 %v8462_v19  ;;  %v8533_v63 = vld [vmem:[%s13062_s14 + $0xd68] sm:$0xff]  ;;  %v8548_v2 = vld [vmem:[%s13062_s14 + $0xde0] sm:$0xff] }
0x239c   : > { %9169 = vmatprep.subr.mxu0 %v8445_v9  ;;  %9204 = vmatprep.subr.mxu1 %v8477_v14  ;;  %v8500_v19 = vld [vmem:[%s13062_s14 + $0xc60] sm:$0xff]  ;;  %v8515_v14 = vld [vmem:[%s13062_s14 + $0xcd8] sm:$0xff]  ;;  %v12714_v45 = vpop.f32.mrf.mxu0 }
0x239d   : > { %9170 = vmatpush3.msra.mxu0 %v8429_v3  ;;  %9205 = vmatpush3.msra.mxu1 %v8461_v4  ;;  %v8532_v9 = vld [vmem:[%s13062_s14 + $0xd60] sm:$0xff]  ;;  %v8547_v3 = vld [vmem:[%s13062_s14 + $0xdd8] sm:$0xff] }
0x239e   : > { %9171 = vmatprep.subr.mxu0 %v8444_v49  ;;  %9206 = vmatprep.subr.mxu1 %v8476_v50  ;;  %v8499_v4 = vld [vmem:[%s13062_s14 + $0xc58] sm:$0xff]  ;;  %v8514_v50 = vld [vmem:[%s13062_s14 + $0xcd0] sm:$0xff] }
0x239f   : > { %9172 = vmatpush3.msra.mxu0 %v8428_v6  ;;  %9207 = vmatpush3.msra.mxu1 %v8460_v7  ;;  %v8531_v49 = vld [vmem:[%s13062_s14 + $0xd58] sm:$0xff]  ;;  %v8546_v6 = vld [vmem:[%s13062_s14 + $0xdd0] sm:$0xff] }
0x23a0   : > { %9173 = vmatprep.subr.mxu0 %v8443_v10  ;;  %9208 = vmatprep.subr.mxu1 %v8475_v11  ;;  %v8498_v7 = vld [vmem:[%s13062_s14 + $0xc50] sm:$0xff]  ;;  %v8513_v11 = vld [vmem:[%s13062_s14 + $0xcc8] sm:$0xff] }
0x23a1   : > { %9174 = vmatpush3.msra.mxu0 %v8427_v24  ;;  %9209 = vmatpush3.msra.mxu1 %v8459_v25  ;;  %v8530_v10 = vld [vmem:[%s13062_s14 + $0xd50] sm:$0xff]  ;;  %v8529_v24 = vld [vmem:[%s13062_s14 + $0xd48] sm:$0xff]  ;;  %v8512_v25 = vld [vmem:[%s13062_s14 + $0xcc0] sm:$0xff] }
0x23a2   : > { %9175 = vmatprep.subr.mxu0 %v8442_v57  ;;  %9210 = vmatprep.subr.mxu1 %v8474_v28  ;;  %v8544_v57 = vld [vmem:[%s13062_s14 + $0xdc0] sm:$0xff] }
0x23a3   : > { %9176 = vmatpush3.msra.mxu0 %v8426_v30  ;;  %9211 = vmatpush3.msra.mxu1 %v8458_v31  ;;  %v8496_v28 = vld [vmem:[%s13062_s14 + $0xc40] sm:$0xff]  ;;  %v8511_v30 = vld [vmem:[%s13062_s14 + $0xcb8] sm:$0xff] }
0x23a4   : > { %9177 = vmatprep.subr.mxu0 %v8441_v20  ;;  %9212 = vmatprep.subr.mxu1 %v8473_v34  ;;  %v8543_v31 = vld [vmem:[%s13062_s14 + $0xdb8] sm:$0xff]  ;;  %v8510_v20 = vld [vmem:[%s13062_s14 + $0xcb0] sm:$0xff] }
0x23a5   : > { %9178 = vmatpush3.msra.mxu0 %v8425_v21  ;;  %9213 = vmatpush3.msra.mxu1 %v8457_v15  ;;  %v8542_v34 = vld [vmem:[%s13062_s14 + $0xdb0] sm:$0xff]  ;;  %v8541_v21 = vld [vmem:[%s13062_s14 + $0xda8] sm:$0xff] }
0x23a6   : > { %9179 = vmatprep.subr.mxu0 %v8440_v44  ;;  %9214 = vmatprep.subr.mxu1 %v8472_v22  ;;  %v8493_v15 = vld [vmem:[%s13062_s14 + $0xc28] sm:$0xff]  ;;  %v8508_v22 = vld [vmem:[%s13062_s14 + $0xca0] sm:$0xff] }
0x23a7   : > { %9180 = vmatpush3.msra.mxu0 %v8424_v51  ;;  %9215 = vmatpush3.msra.mxu1 %v8456_v43  ;;  %v8525_v44 = vld [vmem:[%s13062_s14 + $0xd28] sm:$0xff]  ;;  %v8492_v51 = vld [vmem:[%s13062_s14 + $0xc20] sm:$0xff] }
0x23a8   : > { %7530 = vmatmul.mubr.f32.vlgmr.msra.gmra.mxu0 %v7048_v46  ;;  %7600 = vmatmul.mubr.f32.vlgmr.msra.gmra.mxu1 %v7050_v47  ;;  %v8524_v43 = vld [vmem:[%s13062_s14 + $0xd20] sm:$0xff]  ;;  %v8507_v46 = vld [vmem:[%s13062_s14 + $0xc98] sm:$0xff] }
0x23a9   : > { %9219 = vmatprep.subr.mxu0 %v8519_v48  ;;  %9254 = vmatprep.subr.mxu1 %v8551_v52  ;;  %v8539_v47 = vld [vmem:[%s13062_s14 + $0xd98] sm:$0xff]  ;;  %v6428_v48 = vrot.slane %v12526_v26, %v10895_v16  ;;  %v6436_v52 = vrot.slane %v12526_v26, %v10898_v17  ;;  %v8506_v16 = vld [vmem:[%s13062_s14 + $0xc90] sm:$0xff] }
0x23aa   : > { %9220 = vmatpush3.msra.mxu0 %v8503_v42  ;;  %7669 = vmatprep.mubr.f32.mxu0 %v7053_v18  ;;  %v12726_v42 = vpop.f32.mrf.mxu1  ;;  %v8491_v18 = vld [vmem:[%s13062_s14 + $0xc18] sm:$0xff]  ;;  %v8538_v17 = vld [vmem:[%s13062_s14 + $0xd90] sm:$0xff] }
0x23ab   : > { %9255 = vmatpush3.msra.mxu1 %v8535_v55  ;;  %7739 = vmatprep.mubr.f32.mxu1 %v7055_v56  ;;  %v8523_v55 = vld [vmem:[%s13062_s14 + $0xd18] sm:$0xff]  ;;  %v6448_v56 = vrot.slane %v12526_v26, %v10920_v36  ;;  %v8505_v36 = vld [vmem:[%s13062_s14 + $0xc88] sm:$0xff] }
0x23ac   : > { %9221 = vmatprep.subr.mxu0 %v8518_v54  ;;  %9256 = vmatprep.subr.mxu1 %v8550_v58  ;;  %v8490_v54 = vld [vmem:[%s13062_s14 + $0xc10] sm:$0xff] }
0x23ad   : > { %9222 = vmatpush3.msra.mxu0 %v8502_v59  ;;  %9257 = vmatpush3.msra.mxu1 %v8534_v27  ;;  %v8522_v58 = vld [vmem:[%s13062_s14 + $0xd10] sm:$0xff]  ;;  %v6970_v59 = vpop.f32.mrf.mxu0  ;;  %v6456_v27 = vrot.slane %v12526_v26, %v10923_v35  ;;  %v8489_v35 = vld [vmem:[%s13062_s14 + $0xc08] sm:$0xff] }
0x23ae   : > { %9223 = vmatprep.subr.mxu0 %v8517_v60  ;;  %9258 = vmatprep.subr.mxu1 %v8549_v61  ;;  %v8537_v60 = vld [vmem:[%s13062_s14 + $0xd88] sm:$0xff]  ;;  %v6827_v61 = vadd.f32 %v12503_v8, %v6428_v48  ;;  %v8536_v8 = vld [vmem:[%s13062_s14 + $0xd80] sm:$0xff] }
0x23af   : > { %9224 = vmatpush3.msra.mxu0 %v8501_v62  ;;  %9259 = vmatpush3.msra.mxu1 %v8533_v63  ;;  %v6898_v62 = vadd.f32 %v12515_v23, %v6436_v52  ;;  %v7041_v63 = vpop.f32.mrf.mxu1  ;;  %v6971_v23 = vadd.f32 %v6970_v59, %v6448_v56  ;;  %v8608_v48 = vld [vmem:[%s13062_s14 + $0xfc0] sm:$0xff]  ;;  %v8591_v56 = vld [vmem:[%s13062_s14 + $0xf38] sm:$0xff]  ;;  %v8558_v59 = vld [vmem:[%s13062_s14 + $0xe30] sm:$0xff] }
0x23b0   : > { %9225 = vmatprep.subr.mxu0 %v8516_v0  ;;  %9260 = vmatprep.subr.mxu1 %v8548_v2  ;;  %v8521_v0 = vld [vmem:[%s13062_s14 + $0xd08] sm:$0xff]  ;;  %v8504_v2 = vld [vmem:[%s13062_s14 + $0xc80] sm:$0xff] }
0x23b1   : > { %9226 = vmatpush3.msra.mxu0 %v8500_v19  ;;  %9261 = vmatpush3.msra.mxu1 %v8532_v9  ;;  %v8488_v19 = vld [vmem:[%s13062_s14 + $0xc00] sm:$0xff] }
0x23b2   : > { %9227 = vmatprep.subr.mxu0 %v8515_v14  ;;  %9262 = vmatprep.subr.mxu1 %v8547_v3  ;;  %v8520_v9 = vld [vmem:[%s13062_s14 + $0xd00] sm:$0xff]  ;;  %v7042_v14 = vadd.f32 %v7041_v63, %v6456_v27  ;;  %v7052_v3 = vmax.f32 %v6827_v61, 0.0  ;;  %v8590_v27 = vld [vmem:[%s13062_s14 + $0xf30] sm:$0xff]  ;;  %v8557_v61 = vld [vmem:[%s13062_s14 + $0xe28] sm:$0xff] }
0x23b3   : > { %9228 = vmatpush3.msra.mxu0 %v8499_v4  ;;  %9263 = vmatpush3.msra.mxu1 %v8531_v49  ;;  %v7054_v4 = vmax.f32 %v6898_v62, 0.0  ;;  %v8583_v49 = vld [vmem:[%s13062_s14 + $0xef8] sm:$0xff]  ;;  %v8560_v52 = vld [vmem:[%s13062_s14 + $0xe40] sm:$0xff]  ;;  %v8589_v62 = vld [vmem:[%s13062_s14 + $0xf28] sm:$0xff] }
0x23b4   : > { %9229 = vmatprep.subr.mxu0 %v8514_v50  ;;  %9264 = vmatprep.subr.mxu1 %v8546_v6  ;;  %v8615_v50 = vld [vmem:[%s13062_s14 + $0xff8] sm:$0xff]  ;;  %v8572_v63 = vld [vmem:[%s13062_s14 + $0xea0] sm:$0xff] }
0x23b5   : > { %9230 = vmatpush3.msra.mxu0 %v8498_v7  ;;  %9265 = vmatpush3.msra.mxu1 %v8530_v10  ;;  %v8567_v6 = vld [vmem:[%s13062_s14 + $0xe78] sm:$0xff]  ;;  %v7057_v7 = vmax.f32 %v6971_v23, 0.0 }
0x23b6   : > { %9231 = vmatprep.subr.mxu0 %v8513_v11  ;;  %9266 = vmatprep.subr.mxu1 %v8545_v12  ;;  %v8599_v10 = vld [vmem:[%s13062_s14 + $0xf78] sm:$0xff]  ;;  %v7059_v11 = vmax.f32 %v7042_v14, 0.0  ;;  %v8582_v12 = vld [vmem:[%s13062_s14 + $0xef0] sm:$0xff] }
0x23b7   : > { %9232 = vmatpush3.msra.mxu0 %v8497_v13  ;;  %9267 = vmatpush3.msra.mxu1 %v8529_v24  ;;  %v8614_v13 = vld [vmem:[%s13062_s14 + $0xff0] sm:$0xff]  ;;  %v8603_v23 = vld [vmem:[%s13062_s14 + $0xf98] sm:$0xff] }
0x23b8   : > { %9233 = vmatprep.subr.mxu0 %v8512_v25  ;;  %9268 = vmatprep.subr.mxu1 %v8544_v57  ;;  %v8566_v24 = vld [vmem:[%s13062_s14 + $0xe70] sm:$0xff]  ;;  %v8581_v57 = vld [vmem:[%s13062_s14 + $0xee8] sm:$0xff]  ;;  %v8555_v14 = vld [vmem:[%s13062_s14 + $0xe18] sm:$0xff] }
0x23b9   : > { %9234 = vmatpush3.msra.mxu0 %v8496_v28  ;;  %9269 = vmatpush3.msra.mxu1 %v8528_v29  ;;  %v8598_v25 = vld [vmem:[%s13062_s14 + $0xf70] sm:$0xff]  ;;  %v8613_v28 = vld [vmem:[%s13062_s14 + $0xfe8] sm:$0xff] }
0x23ba   : > { %9235 = vmatprep.subr.mxu0 %v8511_v30  ;;  %9270 = vmatprep.subr.mxu1 %v8543_v31  ;;  %v8565_v29 = vld [vmem:[%s13062_s14 + $0xe68] sm:$0xff]  ;;  %v8580_v31 = vld [vmem:[%s13062_s14 + $0xee0] sm:$0xff] }
0x23bb   : > { %9236 = vmatpush3.msra.mxu0 %v8495_v32  ;;  %9271 = vmatpush3.msra.mxu1 %v8527_v33  ;;  %v8597_v30 = vld [vmem:[%s13062_s14 + $0xf68] sm:$0xff]  ;;  %v8612_v32 = vld [vmem:[%s13062_s14 + $0xfe0] sm:$0xff] }
0x23bc   : > { %9237 = vmatprep.subr.mxu0 %v8510_v20  ;;  %9272 = vmatprep.subr.mxu1 %v8542_v34  ;;  %v8564_v33 = vld [vmem:[%s13062_s14 + $0xe60] sm:$0xff]  ;;  %v8579_v34 = vld [vmem:[%s13062_s14 + $0xed8] sm:$0xff] }
0x23bd   : > { %9238 = vmatpush3.msra.mxu0 %v8494_v39  ;;  %9273 = vmatpush3.msra.mxu1 %v8526_v40  ;;  %v8596_v20 = vld [vmem:[%s13062_s14 + $0xf60] sm:$0xff]  ;;  %v8611_v39 = vld [vmem:[%s13062_s14 + $0xfd8] sm:$0xff] }
0x23be   : > { %9239 = vmatprep.subr.mxu0 %v8509_v41  ;;  %9274 = vmatprep.subr.mxu1 %v8541_v21  ;;  %v8563_v40 = vld [vmem:[%s13062_s14 + $0xe58] sm:$0xff]  ;;  %v8578_v21 = vld [vmem:[%s13062_s14 + $0xed0] sm:$0xff] }
0x23bf   : > { %9240 = vmatpush3.msra.mxu0 %v8493_v15  ;;  %9275 = vmatpush3.msra.mxu1 %v8525_v44  ;;  %v8595_v41 = vld [vmem:[%s13062_s14 + $0xf58] sm:$0xff]  ;;  %v8610_v15 = vld [vmem:[%s13062_s14 + $0xfd0] sm:$0xff] }
0x23c0   : > { %9241 = vmatprep.subr.mxu0 %v8508_v22  ;;  %9276 = vmatprep.subr.mxu1 %v8540_v5  ;;  %v8562_v44 = vld [vmem:[%s13062_s14 + $0xe50] sm:$0xff]  ;;  %v8577_v5 = vld [vmem:[%s13062_s14 + $0xec8] sm:$0xff] }
0x23c1   : > { %9242 = vmatpush3.msra.mxu0 %v8492_v51  ;;  %9277 = vmatpush3.msra.mxu1 %v8524_v43  ;;  %v8594_v22 = vld [vmem:[%s13062_s14 + $0xf50] sm:$0xff]  ;;  %v8609_v51 = vld [vmem:[%s13062_s14 + $0xfc8] sm:$0xff] }
0x23c2   : > { %9243 = vmatprep.subr.mxu0 %v8507_v46  ;;  %9278 = vmatprep.subr.mxu1 %v8539_v47  ;;  %v8561_v43 = vld [vmem:[%s13062_s14 + $0xe48] sm:$0xff]  ;;  %v8576_v47 = vld [vmem:[%s13062_s14 + $0xec0] sm:$0xff] }
0x23c3   : > { %9244 = vmatpush3.msra.mxu0 %v8491_v18  ;;  %9279 = vmatpush3.msra.mxu1 %v8523_v55  ;;  %v8593_v46 = vld [vmem:[%s13062_s14 + $0xf48] sm:$0xff]  ;;  %v8592_v18 = vld [vmem:[%s13062_s14 + $0xf40] sm:$0xff]  ;;  %v8575_v55 = vld [vmem:[%s13062_s14 + $0xeb8] sm:$0xff] }
0x23c4   : > { %9245 = vmatprep.subr.mxu0 %v8506_v16  ;;  %9280 = vmatprep.subr.mxu1 %v8538_v17  ;;  %v8607_v16 = vld [vmem:[%s13062_s14 + $0xfb8] sm:$0xff] }
0x23c5   : > { %9246 = vmatpush3.msra.mxu0 %v8490_v54  ;;  %9281 = vmatpush3.msra.mxu1 %v8522_v58  ;;  %v8559_v17 = vld [vmem:[%s13062_s14 + $0xe38] sm:$0xff]  ;;  %v8574_v54 = vld [vmem:[%s13062_s14 + $0xeb0] sm:$0xff] }
0x23c6   : > { %9247 = vmatprep.subr.mxu0 %v8505_v36  ;;  %9282 = vmatprep.subr.mxu1 %v8537_v60  ;;  %v8606_v58 = vld [vmem:[%s13062_s14 + $0xfb0] sm:$0xff]  ;;  %v8573_v36 = vld [vmem:[%s13062_s14 + $0xea8] sm:$0xff] }
0x23c7   : > { %9248 = vmatpush3.msra.mxu0 %v8489_v35  ;;  %9283 = vmatpush3.msra.mxu1 %v8521_v0  ;;  %v8605_v60 = vld [vmem:[%s13062_s14 + $0xfa8] sm:$0xff]  ;;  %v8604_v35 = vld [vmem:[%s13062_s14 + $0xfa0] sm:$0xff] }
0x23c8   : > { %9249 = vmatprep.subr.mxu0 %v8504_v2  ;;  %9284 = vmatprep.subr.mxu1 %v8536_v8  ;;  %v8556_v0 = vld [vmem:[%s13062_s14 + $0xe20] sm:$0xff]  ;;  %v8571_v8 = vld [vmem:[%s13062_s14 + $0xe98] sm:$0xff] }
0x23c9   : > { %9250 = vmatpush3.msra.mxu0 %v8488_v19  ;;  %9285 = vmatpush3.msra.mxu1 %v8520_v9  ;;  %v8588_v2 = vld [vmem:[%s13062_s14 + $0xf20] sm:$0xff]  ;;  %v6444_v19 = vrot.slane %v12526_v26, %v11054_v37  ;;  %v6452_v9 = vrot.slane %v12526_v26, %v11057_v38  ;;  %v8602_v37 = vld [vmem:[%s13062_s14 + $0xf90] sm:$0xff] }
0x23ca   : > { %7670 = vmatmul.mubr.f32.vlgmr.msra.gmra.mxu0 %v7052_v3  ;;  %7740 = vmatmul.mubr.f32.vlgmr.msra.gmra.mxu1 %v7054_v4  ;;  %v8587_v3 = vld [vmem:[%s13062_s14 + $0xf18] sm:$0xff]  ;;  %v8570_v4 = vld [vmem:[%s13062_s14 + $0xe90] sm:$0xff] }
0x23cb   : > { %9289 = vmatprep.subr.mxu0 %v8583_v49  ;;  %9324 = vmatprep.subr.mxu1 %v8615_v50  ;;  %v8554_v38 = vld [vmem:[%s13062_s14 + $0xe10] sm:$0xff]  ;;  %v8569_v49 = vld [vmem:[%s13062_s14 + $0xe88] sm:$0xff] }
0x23cc   : > { %9290 = vmatpush3.msra.mxu0 %v8567_v6  ;;  %7809 = vmatprep.mubr.f32.mxu0 %v7057_v7  ;;  %v8586_v26 = vld [vmem:[%s13062_s14 + $0xf10] sm:$0xff]  ;;  %v8601_v50 = vld [vmem:[%s13062_s14 + $0xf88] sm:$0xff]  ;;  %v6969_v6 = vadd.f32 %v12714_v45, %v6444_v19  ;;  %v7040_v7 = vadd.f32 %v12726_v42, %v6452_v9  ;;  %v8600_v45 = vld [vmem:[%s13062_s14 + $0xf80] sm:$0xff] }
0x23cd   : > { %9325 = vmatpush3.msra.mxu1 %v8599_v10  ;;  %7879 = vmatprep.mubr.f32.mxu1 %v7059_v11  ;;  %v8553_v10 = vld [vmem:[%s13062_s14 + $0xe08] sm:$0xff]  ;;  %v8552_v42 = vld [vmem:[%s13062_s14 + $0xe00] sm:$0xff] }
0x23ce   : > { %9291 = vmatprep.subr.mxu0 %v8582_v12  ;;  %9326 = vmatprep.subr.mxu1 %v8614_v13  ;;  %v8585_v11 = vld [vmem:[%s13062_s14 + $0xf08] sm:$0xff]  ;;  %v8568_v12 = vld [vmem:[%s13062_s14 + $0xe80] sm:$0xff] }
0x23cf   : > { %9292 = vmatpush3.msra.mxu0 %v8566_v24  ;;  %9327 = vmatpush3.msra.mxu1 %v8598_v25  ;;  %v8584_v13 = vld [vmem:[%s13062_s14 + $0xf00] sm:$0xff]  ;;  %v7056_v24 = vmax.f32 %v6969_v6, 0.0  ;;  %v7058_v25 = vmax.f32 %v7040_v7, 0.0 }
0x23d0   : > { %9293 = vmatprep.subr.mxu0 %v8581_v57  ;;  %9328 = vmatprep.subr.mxu1 %v8613_v28  ;;  %v7917_v19 = vld [vmem:[%s13068_s20] sm:$0xff] }
0x23d1   : > { %9294 = vmatpush3.msra.mxu0 %v8565_v29  ;;  %9329 = vmatpush3.msra.mxu1 %v8597_v30 }
0x23d2   : > { %9295 = vmatprep.subr.mxu0 %v8580_v31  ;;  %9330 = vmatprep.subr.mxu1 %v8612_v32  ;;  %v8617_v32 = vld [vmem:[%s13063_s15 + $0x1] ss:$0 sm:$0xff] }
0x23d3   : > { %9296 = vmatpush3.msra.mxu0 %v8564_v33  ;;  %9331 = vmatpush3.msra.mxu1 %v8596_v20 }
0x23d4   : > { %9297 = vmatprep.subr.mxu0 %v8579_v34  ;;  %9332 = vmatprep.subr.mxu1 %v8611_v39 }
0x23d5   : > { %9298 = vmatpush3.msra.mxu0 %v8563_v40  ;;  %9333 = vmatpush3.msra.mxu1 %v8595_v41 }
0x23d6   : > { %9299 = vmatprep.subr.mxu0 %v8578_v21  ;;  %9334 = vmatprep.subr.mxu1 %v8610_v15 }
0x23d7   : > { %9300 = vmatpush3.msra.mxu0 %v8562_v44  ;;  %9335 = vmatpush3.msra.mxu1 %v8594_v22 }
0x23d8   : > { %9301 = vmatprep.subr.mxu0 %v8577_v5  ;;  %9336 = vmatprep.subr.mxu1 %v8609_v51 }
0x23d9   : > { %9302 = vmatpush3.msra.mxu0 %v8561_v43  ;;  %9337 = vmatpush3.msra.mxu1 %v8593_v46 }
0x23da   : > { %9303 = vmatprep.subr.mxu0 %v8576_v47  ;;  %9338 = vmatprep.subr.mxu1 %v8608_v48 }
0x23db   : > { %9304 = vmatpush3.msra.mxu0 %v8560_v52  ;;  %9339 = vmatpush3.msra.mxu1 %v8592_v18 }
0x23dc   : > { %9305 = vmatprep.subr.mxu0 %v8575_v55  ;;  %9340 = vmatprep.subr.mxu1 %v8607_v16 }
0x23dd   : > { %9306 = vmatpush3.msra.mxu0 %v8559_v17  ;;  %9341 = vmatpush3.msra.mxu1 %v8591_v56 }
0x23de   : > { %9307 = vmatprep.subr.mxu0 %v8574_v54  ;;  %9342 = vmatprep.subr.mxu1 %v8606_v58 }
0x23df   : > { %9308 = vmatpush3.msra.mxu0 %v8558_v59  ;;  %9343 = vmatpush3.msra.mxu1 %v8590_v27 }
0x23e0   : > { %9309 = vmatprep.subr.mxu0 %v8573_v36  ;;  %9344 = vmatprep.subr.mxu1 %v8605_v60 }
0x23e1   : > { %9310 = vmatpush3.msra.mxu0 %v8557_v61  ;;  %9345 = vmatpush3.msra.mxu1 %v8589_v62 }
0x23e2   : > { %9311 = vmatprep.subr.mxu0 %v8572_v63  ;;  %9346 = vmatprep.subr.mxu1 %v8604_v35 }
0x23e3   : > { %9312 = vmatpush3.msra.mxu0 %v8556_v0  ;;  %9347 = vmatpush3.msra.mxu1 %v8588_v2 }
0x23e4   : > { %9313 = vmatprep.subr.mxu0 %v8571_v8  ;;  %9348 = vmatprep.subr.mxu1 %v8603_v23  ;;  %v7920_v8 = vld [vmem:[%s13068_s20 + $0x18] sm:$0xff]  ;;  %v7919_v23 = vld [vmem:[%s13068_s20 + $0x10] sm:$0xff] }
0x23e5   : > { %9314 = vmatpush3.msra.mxu0 %v8555_v14  ;;  %9349 = vmatpush3.msra.mxu1 %v8587_v3 }
0x23e6   : > { %9315 = vmatprep.subr.mxu0 %v8570_v4  ;;  %9350 = vmatprep.subr.mxu1 %v8602_v37  ;;  %v8620_v37 = vld [vmem:[%s13066_s18 + $0x1] ss:$0 sm:$0xff] }
0x23e7   : > { %9316 = vmatpush3.msra.mxu0 %v8554_v38  ;;  %9351 = vmatpush3.msra.mxu1 %v8586_v26  ;;  %v8621_v26 = vld [vmem:[%s13067_s19 + $0x1] ss:$0 sm:$0xff] }
0x23e8   : > { %9317 = vmatprep.subr.mxu0 %v8569_v49  ;;  %9352 = vmatprep.subr.mxu1 %v8601_v50 }
0x23e9   : > { %9318 = vmatpush3.msra.mxu0 %v8553_v10  ;;  %9353 = vmatpush3.msra.mxu1 %v8585_v11 }
0x23ea   : > { %9319 = vmatprep.subr.mxu0 %v8568_v12  ;;  %9354 = vmatprep.subr.mxu1 %v8600_v45 }
0x23eb   : > { %9320 = vmatpush3.msra.mxu0 %v8552_v42  ;;  %9355 = vmatpush3.msra.mxu1 %v8584_v13 }
0x23ec   : > { %7810 = vmatmul.mubr.f32.vlgmr.msra.gmra.mxu0 %v7056_v24  ;;  %7880 = vmatmul.mubr.f32.vlgmr.msra.gmra.mxu1 %v7058_v25 }
0x23ed   : > { %9759 = vmatprep.subr.mxu0 %v9913_v1  ;;  %9767 = vmatprep.mubr.msk.f32.mxu0 %vm9914_vm1, %v9913_v1 }
0x23ee   : > { %9760 = vmatpush3.msra.mxu0 %v7920_v8 }
0x23ef   : > { %9761 = vmatprep.subr.mxu0 %v9913_v1 }
0x23f0   : > { %9762 = vmatpush3.msra.mxu0 %v7919_v23 }
0x23f1   : > { %9763 = vmatprep.subr.mxu0 %v9913_v1 }
0x2447   : > { %v9111_v57 = vpop.f32.mrf.mxu0  ;;  %v9146_v29 = vpop.f32.mrf.mxu1 }
0x2449   : > { %v9112_v28 = vpop.f32.mrf.mxu0  ;;  %v9147_v33 = vpop.f32.mrf.mxu1 }
0x244a   : > { %v9113_v31 = vadd.f32 %v9112_v28, %v9111_v57  ;;  %v9148_v41 = vadd.f32 %v9147_v33, %v9146_v29 }
0x244c   : > { %v7392_v34 = vadd.f32 %v9113_v31, %v8617_v32 }
0x244e   : > { %v7462_v15 = vadd.f32 %v9148_v41, %v7392_v34 }
0x2468   : > { %v9181_v30 = vpop.f32.mrf.mxu0  ;;  %v9216_v39 = vpop.f32.mrf.mxu1 }
0x246a   : > { %v9182_v20 = vpop.f32.mrf.mxu0  ;;  %v9217_v44 = vpop.f32.mrf.mxu1 }
0x246b   : > { %v9183_v21 = vadd.f32 %v9182_v20, %v9181_v30  ;;  %v9218_v43 = vadd.f32 %v9217_v44, %v9216_v39 }
0x246d   : > { %v7532_v5 = vadd.f32 %v9183_v21, %v7462_v15 }
0x246f   : > { %v7602_v47 = vadd.f32 %v9218_v43, %v7532_v5 }
0x248a   : > { %v9251_v40 = vpop.f32.mrf.mxu0  ;;  %v9286_v51 = vpop.f32.mrf.mxu1 }
0x248c   : > { %v9252_v22 = vpop.f32.mrf.mxu0  ;;  %v9287_v48 = vpop.f32.mrf.mxu1 }
0x248d   : > { %v9253_v46 = vadd.f32 %v9252_v22, %v9251_v40  ;;  %v9288_v16 = vadd.f32 %v9287_v48, %v9286_v51 }
0x248f   : > { %v7672_v52 = vadd.f32 %v9253_v46, %v7602_v47 }
0x2491   : > { %v7742_v54 = vadd.f32 %v9288_v16, %v7672_v52 }
0x24ac   : > { %v9321_v18 = vpop.f32.mrf.mxu0  ;;  %v9356_v55 = vpop.f32.mrf.mxu1 }
0x24ae   : > { %v9322_v17 = vpop.f32.mrf.mxu0  ;;  %v9357_v56 = vpop.f32.mrf.mxu1 }
0x24af   : > { %v9323_v58 = vadd.f32 %v9322_v17, %v9321_v18  ;;  %v9358_v27 = vadd.f32 %v9357_v56, %v9356_v55 }
0x24b1   : > { %v7812_v59 = vadd.f32 %v9323_v58, %v7742_v54 }
0x24b3   : > { %v7882_v36 = vadd.f32 %v9358_v27, %v7812_v59 }
0x24b5   : > { %v7885_v60 = vadd.f32 %v7882_v36, %v11984_v53  ;;  %v7918_v53 = vld [vmem:[%s13068_s20 + $0x8] sm:$0xff] }
0x24b6   : > { %9764 = vmatpush3.msra.mxu0 %v7918_v53 }
0x24b7   : > { %v7890_v61 = vsel %vm781_vm3, %v7885_v60, 0.0  ;;  %9765 = vmatprep.subr.mxu0 %v9913_v1  ;;  %v7921_v1 = vld [vmem:[%s13069_s21] sm:$0x1] }
0x24b8   : > { %7891 = vadd.xlane.f32.xlu0 %v7890_v61  ;;  %9766 = vmatpush3.msra.mxu0 %v7917_v19 }
0x2541   : > { %v7892_v62 = vpop.xlane.xlu0 %7891 }
0x2542   : > { %v7893_v63 = vmul.f32 0.03125, %v7892_v62 }
0x2544   : > { %v7894_v35 = vsub.f32 %v7885_v60, %v7893_v63 }
0x2546   : > { %v7895_v0 = vmul.f32 %v7894_v35, %v7894_v35 }
0x2548   : > { %v7896_v2 = vsel %vm781_vm3, %v7895_v0, 0.0 }
0x2549   : > { %7897 = vadd.xlane.f32.xlu1 %v7896_v2 }
0x25d2   : > { %v7898_v9 = vpop.xlane.xlu1 %7897 }
0x25d3   : > { %v7899_v14 = vmul.f32 0.03125, %v7898_v9 }
0x25d5   : > { %v7900_v3 = vadd.f32 1e-05, %v7899_v14 }
0x25d7   : > { %9849 = vrsqrt.f32 %v7900_v3 }
0x25e4   : > { %v9850_v4 = vpop.eup %9849 }
0x25e5   : > { %v7902_v38 = vmul.f32 %v9850_v4, %v7894_v35 }
0x25e7   : > { %v7909_v49 = vmul.f32 %v8620_v37, %v7902_v38 }
0x25e9   : > { %v7916_v50 = vadd.f32 %v8621_v26, %v7909_v49 }
0x25eb   : > { %v7923_v6 = vrot.slane %v7916_v50, 7 }
0x25ed   : > { %9768 = vmatmul.mubr.msk.f32.vlgmr.msra.gmra.mxu0 %vm781_vm3, %v7923_v6 }
0x26ad   : > { %v7992_v7 = vpop.f32.mrf.mxu0 }
0x26ae   : > { %v7993_v10 = vadd.f32 %v7992_v7, %v7921_v1 }
0x26af   : > { %v9769_v11 = vpop.f32.mrf.mxu0 }
0x26b0   : > { %7997 = vst.msk [vmem:[%s673_s29] sm:$0x1] %vm7996_vm5, %v7993_v10 }
0x26b1   : > { %9864 = shalt.err (!%p9861_p3)
}
0x26b2   : > { %s9865_s25 = scalar_lea.hbm %s13013_s2, 16  ;;  %s9869_s30 = scalar_lea.hbm %s13114_s26, 32 }
0x26b3   : > { %p9866_p4 = scmp.ne.s32.totalorder %s13013_s2, %s9865_s25  ;;  %p9870_p9 = scmp.lt.s32.totalorder %s13013_s2, %s13114_s26 }
0x26b4   : > { %p9871_p10 = scmp.lt.s32.totalorder %s9869_s30, %s9865_s25 }
0x26b5   : > { %p9867_p7 = pnand %p9866_p4, %p10069_p5 }
0x26b6   : > { %p9872_p11 = por %p9871_p10, %p9870_p9 }
0x26b7   : > { %p9868_p8 = pneg %p9867_p7 }
0x26b9   : > { %p9873_p12 = pnand %p9872_p11, %p9868_p8 }
0x26bb   : > { %9876 = shalt.err (!%p9873_p12)
}
0x26bc   : > { %9770 = dma.vmem_to_hbm [thread:$0]  (%p10069_p5), %s8012_s3, 16, %s13013_s2, %s7999_s7  }
0x26bd PF: > { %s13115_s8 = sld [smem:[#allocation7_spill]] }
0x26be   : > { %s13116_s1 = sld [smem:[#allocation5_spill]] }
0x26c3   : > { %p9776_p13 = scmp.ge.s32.totalorder %s13115_s8, 2 }
0x26c4   : > { %s8023_s9 = sand.u32 1, %s13116_s1  }
0x26c5   : > { %p9773_p0 = pnand %p9776_p13, %p10073_p6  ;;  %s8024_s0 = scalar_lea.sflag [#allocation3], %s8023_s9 }
0x26c7   : > { %p9774_p1 = pneg %p9773_p0 }
0x26c9   : > { %9894 = dma.done.wait (%p9774_p1), %s8024_s0, 16  }
0x26ca   : > { %9896 = vsyncadd (%p9774_p1), %s8024_s0, 4294967280  ;;  %s13118_s30 = sld [smem:[#allocation8_spill]]  ;;  %s13121_s3 = smov %s9903_s28 }
0x26cb   : > { %s13119_s25 = sld [smem:[#allocation6_spill]] }
0x26cc   : > { %s13120_s29 = sld [smem:[#allocation9_spill]] }
0x26d0   : > { %p32_p2 = scmp.ge.s32.totalorder %s13118_s30, 4  }
0x26d1   : > { %s13122_s28 = smov %s13119_s25 }
0x26d2   :  { %34 = sbr.rel (!%p32_p2) target bundleno = 15 (0xf), region = 201 }
0x26d7   :  { %8028 = vsyncpa [#allocation3], 1 }
0x26d8   :  { %8030 = vsyncpa [#allocation3 + $0x1], 1 }

</bundles_post_ra>
